<compile_context>
chip_gen: v5e
topology: v5e:2x2
jax: 0.10.0
libtpu: 0.0.40
codegen_flags: <defaults>
</compile_context>

<pallas_src>
import jax
import jax.numpy as jnp
from jax.experimental import pallas as pl
from jax.experimental.pallas import tpu as pltpu

NEG_BIG = -1e30  # mask value for non-neighbors (self-loops guarantee >=1 neighbor)
LANE = 128


def _round_up(x, m):
    return ((x + m - 1) // m) * m


# ----------------------------------------------------------------------------
# Fused kernel factory: 3x (EdgeConv + readout) + LSTM + relu(lin_lstm) + lin3
# for a group of G graphs per grid step; everything stays in VMEM, only the
# lane-dense (G, OPAD) result block is written.
# ----------------------------------------------------------------------------
def _make_kernel(G, N, HPAD, OPAD, TI, n_layers=3):
    GN = G * N
    four_h = 4 * HPAD

    def kernel(x_ref, adj_ref, wc0_ref, wc1_ref, wc2_ref,
               wih_ref, whh_ref, wl_ref, w3_ref, b_ref,
               out_ref, h_scr):
        # Neighbor-mask bias computed ONCE per graph group, reused by all 3 layers.
        adjf = adj_ref[...].astype(jnp.float32)                       # (G, N, N)
        mask_bias = jnp.where(adjf > 0.0, 0.0, NEG_BIG)               # (G, N, N)

        def edgeconv(h_in, wc_ref, bconv):
            # Single fused matmul for all G graphs: wc = [Wt | (Wp - Wt)], 128-lane bands.
            full = jnp.dot(h_in, wc_ref[...],
                           preferred_element_type=jnp.float32)        # (GN, 2*HPAD)
            a3 = full[:, :HPAD].reshape(G, N, HPAD)                    # x_j @ Wt
            b3 = (full[:, HPAD:] + bconv).reshape(G, N, HPAD)          # x_i @ (Wp-Wt) + b
            # Tiled neighbor max: live intermediate is only (TI, N, HPAD).
            for g in range(G):
                a_g = a3[g]                                            # (N, HPAD)
                for i0 in range(0, N, TI):
                    ti = min(TI, N - i0)
                    mb = mask_bias[g, i0:i0 + ti, :]                   # (ti, N)
                    masked = a_g[None, :, :] + mb[:, :, None]          # (ti, N, HPAD)
                    hmax = jnp.max(masked, axis=1)                     # (ti, HPAD)
                    h_scr[g * N + i0:g * N + i0 + ti, :] = (
                        jax.nn.relu(hmax + b3[g, i0:i0 + ti, :]))
            h_new = h_scr[...]                                         # (GN, HPAD)
            h3 = h_new.reshape(G, N, HPAD)
            # mean / max graph readouts, batched over the G graphs (no concatenation)
            return h_new, jnp.mean(h3, axis=1), jnp.max(h3, axis=1)    # (G, HPAD) each

        h = x_ref[...].astype(jnp.float32).reshape(GN, -1)             # (GN, Cin)
        wcs = (wc0_ref, wc1_ref, wc2_ref)
        mean_ro, max_ro = [], []
        for layer in range(n_layers):
            h, m_r, x_r = edgeconv(h, wcs[layer], b_ref[layer:layer + 1, :HPAD])
            mean_ro.append(m_r)
            max_ro.append(x_r)

        # Single-layer LSTM over the L=3 readouts, batched across the G graphs.
        # wih rows: [0:HPAD] -> mean-readout half, [HPAD:2*HPAD] -> max-readout half,
        # so the (mean, max) concat is never materialized.
        wih_m = wih_ref[:HPAD, :]                                      # (HPAD, 4*HPAD)
        wih_x = wih_ref[HPAD:, :]                                      # (HPAD, 4*HPAD)
        whh = whh_ref[...]                                             # (HPAD, 4*HPAD)
        b_lstm = b_ref[n_layers:n_layers + 1, :four_h]                 # (1, 4*HPAD)
        h_t = jnp.zeros((G, HPAD), jnp.float32)
        c_t = jnp.zeros((G, HPAD), jnp.float32)
        for t in range(n_layers):  # static unroll, L == conv_layers (3)
            gates = (jnp.dot(mean_ro[t], wih_m, preferred_element_type=jnp.float32)
                     + jnp.dot(max_ro[t], wih_x, preferred_element_type=jnp.float32)
                     + jnp.dot(h_t, whh, preferred_element_type=jnp.float32)
                     + b_lstm)                                         # (G, 4*HPAD)
            i_g = jax.nn.sigmoid(gates[:, 0:HPAD])                     # 128-lane-band slices
            f_g = jax.nn.sigmoid(gates[:, HPAD:2 * HPAD])
            g_g = jnp.tanh(gates[:, 2 * HPAD:3 * HPAD])
            o_g = jax.nn.sigmoid(gates[:, 3 * HPAD:4 * HPAD])
            c_t = f_g * c_t + i_g * g_g
            h_t = o_g * jnp.tanh(c_t)

        # n = relu(lin_lstm(h_last)); dropout(p=0) identity; out = lin3(n)
        z = jax.nn.relu(jnp.dot(h_t, wl_ref[...], preferred_element_type=jnp.float32)
                        + b_ref[n_layers + 1:n_layers + 2, :HPAD])     # (G, HPAD)
        out = (jnp.dot(z, w3_ref[...], preferred_element_type=jnp.float32)
               + b_ref[n_layers + 2:n_layers + 3, :OPAD])              # (G, OPAD) lane-dense
        out_ref[...] = out.astype(out_ref.dtype)

    return kernel


def model_edgeconv_lstm_forward(adj, n_feat, params, *, group_size=None):
    B, N, cin = n_feat.shape
    hid = params["lin_lstm_w"].shape[0]
    out_feat = params["lin3_w"].shape[1]
    n_layers = len(params["conv"])
    assert n_layers == 3, "kernel is specialized for conv_layers == 3"

    HPAD = _round_up(hid, LANE)
    OPAD = _round_up(out_feat, LANE)
    BIAS_W = max(4 * HPAD, OPAD)

    # --- graph packing: aim G*N rows per step to fill MXU rows, capped for unroll/VMEM.
    if group_size is None:
        group_size = max(1, min(B, max(1, 256 // N), 16))
    G = max(1, int(group_size))
    B_pad = _round_up(B, G)
    steps = B_pad // G

    # --- i-tile for the neighbor max so the (TI, N, HPAD) intermediate stays <= ~2 MiB.
    TI = max(1, min(N, (2 << 20) // max(1, N * HPAD * 4)))
    if TI >= 8:
        TI = (TI // 8) * 8

    # --- lane-aligned fused conv weights: [Wt pad->HPAD | (Wp - Wt) pad->HPAD]
    def conv_weight(wt, wp, rows_pad):
        c_in = wt.shape[0]
        wc = jnp.zeros((rows_pad, 2 * HPAD), jnp.float32)
        wc = wc.at[:c_in, :hid].set(wt)
        wc = wc.at[:c_in, HPAD:HPAD + hid].set(wp - wt)
        return wc

    (wt0, wp0, b0), (wt1, wp1, b1), (wt2, wp2, b2) = params["conv"]
    wc0 = conv_weight(wt0, wp0, cin)      # layer-0 input keeps its native cin lanes
    wc1 = conv_weight(wt1, wp1, HPAD)
    wc2 = conv_weight(wt2, wp2, HPAD)

    # --- LSTM weights with each gate (i,f,g,o) in its own 128-lane band
    def gate_block(w_rows, rows_pad):
        r = w_rows.shape[0]
        out = jnp.zeros((rows_pad, 4 * HPAD), jnp.float32)
        for k in range(4):
            out = out.at[:r, k * HPAD:k * HPAD + hid].set(w_rows[:, k * hid:(k + 1) * hid])
        return out

    wih = params["lstm_wih"]                                           # (2*hid, 4*hid)
    wih_pad = jnp.concatenate([gate_block(wih[:hid], HPAD),            # mean-readout half
                               gate_block(wih[hid:], HPAD)], axis=0)   # max-readout half
    whh_pad = gate_block(params["lstm_whh"], HPAD)                     # (HPAD, 4*HPAD)

    wl_pad = jnp.zeros((HPAD, HPAD), jnp.float32).at[:hid, :hid].set(params["lin_lstm_w"])
    w3_pad = jnp.zeros((HPAD, OPAD), jnp.float32).at[:hid, :out_feat].set(params["lin3_w"])

    # --- all small bias vectors packed into one operand (rows: conv0..2, lstm, lin_lstm, lin3)
    biases = jnp.zeros((8, BIAS_W), jnp.float32)
    biases = biases.at[0, :hid].set(b0[0])
    biases = biases.at[1, :hid].set(b1[0])
    biases = biases.at[2, :hid].set(b2[0])
    b_lstm = params["lstm_b"][0]
    for k in range(4):
        biases = biases.at[3, k * HPAD:k * HPAD + hid].set(b_lstm[k * hid:(k + 1) * hid])
    biases = biases.at[4, :hid].set(params["lin_lstm_b"][0])
    biases = biases.at[5, :out_feat].set(params["lin3_b"][0])

    # --- inputs: int8 adjacency, batch zero-padded to a multiple of G
    x = n_feat.astype(jnp.float32)
    adj_i8 = (adj > 0).astype(jnp.int8)
    if B_pad != B:
        x = jnp.pad(x, ((0, B_pad - B), (0, 0), (0, 0)))
        adj_i8 = jnp.pad(adj_i8, ((0, B_pad - B), (0, 0), (0, 0)))

    kernel = _make_kernel(G, N, HPAD, OPAD, TI, n_layers)

    def w2d(a):  # whole-array weight block, constant index map (loaded once, stays resident)
        return pl.BlockSpec(a.shape, lambda s: (0, 0))

    out_padded = pl.pallas_call(
        kernel,
        grid=(steps,),
        in_specs=[
            pl.BlockSpec((G, N, cin), lambda s: (s, 0, 0)),
            pl.BlockSpec((G, N, N), lambda s: (s, 0, 0)),
            w2d(wc0), w2d(wc1), w2d(wc2),
            w2d(wih_pad), w2d(whh_pad), w2d(wl_pad), w2d(w3_pad), w2d(biases),
        ],
        out_specs=pl.BlockSpec((G, OPAD), lambda s: (s, 0)),
        out_shape=jax.ShapeDtypeStruct((B_pad, OPAD), jnp.float32),
        scratch_shapes=[pltpu.VMEM((G * N, HPAD), jnp.float32)],
        compiler_params=pltpu.CompilerParams(dimension_semantics=("parallel",)),
    )(x, adj_i8, wc0, wc1, wc2, wih_pad, whh_pad, wl_pad, w3_pad, biases)

    return out_padded[:B, :out_feat]


# ----------------------------------------------------------------------------
# Parameter construction
# ----------------------------------------------------------------------------
def init_params(key, in_feat, hid_feat, out_feat, conv_layers):
    params = {"conv": []}
    keys = jax.random.split(key, 4 * conv_layers + 8)
    ki = iter(range(len(keys)))

    def w(k, shape, scale=0.1):
        return (scale * jax.random.normal(keys[k], shape)).astype(jnp.float32)

    for layer in range(conv_layers):
        c_in = in_feat if layer == 0 else hid_feat
        wt = w(next(ki), (c_in, hid_feat))
        wp = w(next(ki), (c_in, hid_feat))
        b = w(next(ki), (1, hid_feat))
        params["conv"].append((wt, wp, b))

    params["lstm_wih"] = w(next(ki), (2 * hid_feat, 4 * hid_feat))
    params["lstm_whh"] = w(next(ki), (hid_feat, 4 * hid_feat))
    params["lstm_b"] = w(next(ki), (1, 4 * hid_feat))       # b_ih + b_hh combined
    params["lin_lstm_w"] = w(next(ki), (hid_feat, hid_feat))
    params["lin_lstm_b"] = w(next(ki), (1, hid_feat))
    params["lin3_w"] = w(next(ki), (hid_feat, out_feat))
    params["lin3_b"] = w(next(ki), (1, out_feat))
    return params


# ----------------------------------------------------------------------------
# Pure-JAX reference (same math, unfused) for a sanity check
# ----------------------------------------------------------------------------
def reference_forward(adj, n_feat, params):
    hp = jax.lax.Precision.HIGHEST
    hid = params["lin_lstm_w"].shape[0]
    feat = n_feat
    readouts = []
    for (wt, wp, b) in params["conv"]:
        a_part = jnp.einsum("bnc,ch->bnh", feat, wt, precision=hp)
        b_part = jnp.einsum("bnc,ch->bnh", feat, wp - wt, precision=hp) + b
        masked = jnp.where(adj[:, :, :, None] > 0.0, a_part[:, None, :, :], NEG_BIG)
        h = jax.nn.relu(jnp.max(masked, axis=2) + b_part)
        readouts.append(jnp.concatenate([h.mean(axis=1), h.max(axis=1)], axis=-1))
        feat = h
    seq = jnp.stack(readouts, axis=1)                                    # (B, 3, 2*hid)
    B = seq.shape[0]
    h_t = jnp.zeros((B, hid), jnp.float32)
    c_t = jnp.zeros((B, hid), jnp.float32)
    for t in range(seq.shape[1]):
        gates = (jnp.dot(seq[:, t], params["lstm_wih"], precision=hp)
                 + jnp.dot(h_t, params["lstm_whh"], precision=hp)
                 + params["lstm_b"])
        i_g = jax.nn.sigmoid(gates[:, :hid])
        f_g = jax.nn.sigmoid(gates[:, hid:2 * hid])
        g_g = jnp.tanh(gates[:, 2 * hid:3 * hid])
        o_g = jax.nn.sigmoid(gates[:, 3 * hid:])
        c_t = f_g * c_t + i_g * g_g
        h_t = o_g * jnp.tanh(c_t)
    z = jax.nn.relu(jnp.dot(h_t, params["lin_lstm_w"], precision=hp) + params["lin_lstm_b"])
    return jnp.dot(z, params["lin3_w"], precision=hp) + params["lin3_b"]


if __name__ == "__main__":
    B, N = 2, 16               # 2 graphs, 16 nodes each
    in_feat, hid_feat, out_feat = 4, 32, 8
    conv_layers = 3

    key = jax.random.PRNGKey(0)
    k_feat, k_adj, k_par = jax.random.split(key, 3)

    n_feat = jax.random.normal(k_feat, (B, N, in_feat), dtype=jnp.float32)

    # symmetric random adjacency with self-loops (no isolated nodes)
    rand = jax.random.uniform(k_adj, (B, N, N))
    adj = (rand > 0.6).astype(jnp.float32)
    adj = jnp.maximum(adj, jnp.transpose(adj, (0, 2, 1)))
    adj = jnp.maximum(adj, jnp.eye(N, dtype=jnp.float32)[None])

    params = init_params(k_par, in_feat, hid_feat, out_feat, conv_layers)

    out = model_edgeconv_lstm_forward(adj, n_feat, params)
    out = jax.block_until_ready(out)
    assert out.shape == (B, out_feat)
    assert bool(jnp.all(jnp.isfinite(out)))

    ref = reference_forward(adj, n_feat, params)
    assert bool(jnp.allclose(out, ref, atol=1e-2, rtol=1e-2)), float(
        jnp.max(jnp.abs(out - ref)))

    print("KERNEL_OK")
</pallas_src>

<mosaic_0001>
module attributes {stable_mosaic.version = 11 : i64} {
  func.func @kernel(%arg0: i32, %arg1: memref<2x16x4xf32, #tpu.memory_space<vmem>>, %arg2: memref<2x16x16xi8, #tpu.memory_space<vmem>>, %arg3: memref<4x256xf32, #tpu.memory_space<vmem>>, %arg4: memref<128x256xf32, #tpu.memory_space<vmem>>, %arg5: memref<128x256xf32, #tpu.memory_space<vmem>>, %arg6: memref<256x512xf32, #tpu.memory_space<vmem>>, %arg7: memref<128x512xf32, #tpu.memory_space<vmem>>, %arg8: memref<128x128xf32, #tpu.memory_space<vmem>>, %arg9: memref<128x128xf32, #tpu.memory_space<vmem>>, %arg10: memref<8x512xf32, #tpu.memory_space<vmem>>, %arg11: memref<2x128xf32, #tpu.memory_space<vmem>>, %arg12: memref<32x128xf32, #tpu.memory_space<vmem>>) attributes {dimension_semantics = [#tpu.dimension_semantics<parallel>], iteration_bounds = array<i64: 1>, scalar_prefetch = 0 : i64, scratch_operands = 1 : i64, tpu.core_type = #tpu.core_type<tc>, window_params = [{transform_indices = @transform_0, window_bounds = array<i64: 2, 16, 4>}, {transform_indices = @transform_1, window_bounds = array<i64: 2, 16, 16>}, {pipeline_mode = #tpu.pipeline_mode<synchronous>, transform_indices = @transform_2, window_bounds = array<i64: 4, 256>}, {pipeline_mode = #tpu.pipeline_mode<synchronous>, transform_indices = @transform_3, window_bounds = array<i64: 128, 256>}, {pipeline_mode = #tpu.pipeline_mode<synchronous>, transform_indices = @transform_4, window_bounds = array<i64: 128, 256>}, {pipeline_mode = #tpu.pipeline_mode<synchronous>, transform_indices = @transform_5, window_bounds = array<i64: 256, 512>}, {pipeline_mode = #tpu.pipeline_mode<synchronous>, transform_indices = @transform_6, window_bounds = array<i64: 128, 512>}, {pipeline_mode = #tpu.pipeline_mode<synchronous>, transform_indices = @transform_7, window_bounds = array<i64: 128, 128>}, {pipeline_mode = #tpu.pipeline_mode<synchronous>, transform_indices = @transform_8, window_bounds = array<i64: 128, 128>}, {pipeline_mode = #tpu.pipeline_mode<synchronous>, transform_indices = @transform_9, window_bounds = array<i64: 8, 512>}, {transform_indices = @transform_10, window_bounds = array<i64: 2, 128>}]} {
    %c0 = arith.constant 0 : index
    %c0_0 = arith.constant 0 : index
    %c0_1 = arith.constant 0 : index
    %0 = vector.load %arg2[%c0, %c0_0, %c0_1] : memref<2x16x16xi8, #tpu.memory_space<vmem>>, vector<2x16x16xi8>
    %1 = arith.sitofp %0 : vector<2x16x16xi8> to vector<2x16x16xf32>
    %cst = arith.constant 0.000000e+00 : f32
    %2 = vector.broadcast %cst : f32 to vector<2x16x16xf32>
    %3 = arith.cmpf ogt, %1, %2 : vector<2x16x16xf32>
    %cst_2 = arith.constant 0.000000e+00 : f32
    %cst_3 = arith.constant -1.000000e+30 : f32
    %4 = vector.broadcast %cst_2 : f32 to vector<2x16x16xf32>
    %5 = vector.broadcast %cst_3 : f32 to vector<2x16x16xf32>
    %6 = arith.select %3, %4, %5 : vector<2x16x16xi1>, vector<2x16x16xf32>
    %c0_4 = arith.constant 0 : index
    %c0_5 = arith.constant 0 : index
    %c0_6 = arith.constant 0 : index
    %7 = vector.load %arg1[%c0_4, %c0_5, %c0_6] : memref<2x16x4xf32, #tpu.memory_space<vmem>>, vector<2x16x4xf32>
    %8 = vector.shape_cast %7 : vector<2x16x4xf32> to vector<32x4xf32>
    %c0_7 = arith.constant 0 : index
    %c0_8 = arith.constant 0 : index
    %9 = vector.load %arg10[%c0_7, %c0_8] : memref<8x512xf32, #tpu.memory_space<vmem>>, vector<1x128xf32>
    %c0_9 = arith.constant 0 : index
    %c0_10 = arith.constant 0 : index
    %10 = vector.load %arg3[%c0_9, %c0_10] : memref<4x256xf32, #tpu.memory_space<vmem>>, vector<4x256xf32>
    %cst_11 = arith.constant dense<0.000000e+00> : vector<32x256xf32>
    %11 = tpu.matmul %8, %10, %cst_11 {dimension_numbers = #tpu.dot_dimension_numbers<[1], [0], [0], [1], [0, 0, 1, 1], [], []>} : vector<32x4xf32>, vector<4x256xf32>, vector<32x256xf32> -> vector<32x256xf32>
    %12 = vector.extract_strided_slice %11 {offsets = [0, 0], sizes = [32, 128], strides = [1, 1]} : vector<32x256xf32> to vector<32x128xf32>
    %13 = vector.shape_cast %12 : vector<32x128xf32> to vector<2x16x128xf32>
    %14 = vector.extract_strided_slice %11 {offsets = [0, 128], sizes = [32, 128], strides = [1, 1]} : vector<32x256xf32> to vector<32x128xf32>
    %15 = vector.broadcast %9 : vector<1x128xf32> to vector<32x128xf32>
    %16 = arith.addf %14, %15 : vector<32x128xf32>
    %17 = vector.shape_cast %16 : vector<32x128xf32> to vector<2x16x128xf32>
    %18 = vector.extract_strided_slice %13 {offsets = [0, 0, 0], sizes = [1, 16, 128], strides = [1, 1, 1]} : vector<2x16x128xf32> to vector<1x16x128xf32>
    %19 = vector.shape_cast %18 : vector<1x16x128xf32> to vector<16x128xf32>
    %20 = vector.extract_strided_slice %6 {offsets = [0, 0, 0], sizes = [1, 16, 16], strides = [1, 1, 1]} : vector<2x16x16xf32> to vector<1x16x16xf32>
    %21 = vector.shape_cast %20 : vector<1x16x16xf32> to vector<16x16xf32>
    %22 = vector.shape_cast %19 : vector<16x128xf32> to vector<1x16x128xf32>
    %23 = vector.shape_cast %21 : vector<16x16xf32> to vector<16x16x1xf32>
    %24 = vector.broadcast %22 : vector<1x16x128xf32> to vector<16x16x128xf32>
    %25 = vector.broadcast %23 : vector<16x16x1xf32> to vector<16x16x128xf32>
    %26 = arith.addf %24, %25 : vector<16x16x128xf32>
    %cst_12 = arith.constant dense<0xFF800000> : vector<16x128xf32>
    %27 = vector.multi_reduction <maximumf>, %26, %cst_12 [1] : vector<16x16x128xf32> to vector<16x128xf32>
    %28 = vector.extract_strided_slice %17 {offsets = [0, 0, 0], sizes = [1, 16, 128], strides = [1, 1, 1]} : vector<2x16x128xf32> to vector<1x16x128xf32>
    %29 = vector.shape_cast %28 : vector<1x16x128xf32> to vector<16x128xf32>
    %30 = arith.addf %27, %29 : vector<16x128xf32>
    %cst_13 = arith.constant 0.000000e+00 : f32
    %31 = vector.broadcast %cst_13 : f32 to vector<16x128xf32>
    %32 = arith.maximumf %30, %31 : vector<16x128xf32>
    %c0_14 = arith.constant 0 : index
    %c0_15 = arith.constant 0 : index
    %33 = vector.load %arg12[%c0_14, %c0_15] : memref<32x128xf32, #tpu.memory_space<vmem>>, vector<16x128xf32>
    tpu.vector_store %arg12[%c0_14, %c0_15], %32 {strides = array<i32>} : memref<32x128xf32, #tpu.memory_space<vmem>>, vector<16x128xf32>,
    %34 = vector.extract_strided_slice %13 {offsets = [1, 0, 0], sizes = [1, 16, 128], strides = [1, 1, 1]} : vector<2x16x128xf32> to vector<1x16x128xf32>
    %35 = vector.shape_cast %34 : vector<1x16x128xf32> to vector<16x128xf32>
    %36 = vector.extract_strided_slice %6 {offsets = [1, 0, 0], sizes = [1, 16, 16], strides = [1, 1, 1]} : vector<2x16x16xf32> to vector<1x16x16xf32>
    %37 = vector.shape_cast %36 : vector<1x16x16xf32> to vector<16x16xf32>
    %38 = vector.shape_cast %35 : vector<16x128xf32> to vector<1x16x128xf32>
    %39 = vector.shape_cast %37 : vector<16x16xf32> to vector<16x16x1xf32>
    %40 = vector.broadcast %38 : vector<1x16x128xf32> to vector<16x16x128xf32>
    %41 = vector.broadcast %39 : vector<16x16x1xf32> to vector<16x16x128xf32>
    %42 = arith.addf %40, %41 : vector<16x16x128xf32>
    %cst_16 = arith.constant dense<0xFF800000> : vector<16x128xf32>
    %43 = vector.multi_reduction <maximumf>, %42, %cst_16 [1] : vector<16x16x128xf32> to vector<16x128xf32>
    %44 = vector.extract_strided_slice %17 {offsets = [1, 0, 0], sizes = [1, 16, 128], strides = [1, 1, 1]} : vector<2x16x128xf32> to vector<1x16x128xf32>
    %45 = vector.shape_cast %44 : vector<1x16x128xf32> to vector<16x128xf32>
    %46 = arith.addf %43, %45 : vector<16x128xf32>
    %cst_17 = arith.constant 0.000000e+00 : f32
    %47 = vector.broadcast %cst_17 : f32 to vector<16x128xf32>
    %48 = arith.maximumf %46, %47 : vector<16x128xf32>
    %c16 = arith.constant 16 : index
    %c0_18 = arith.constant 0 : index
    %49 = vector.load %arg12[%c16, %c0_18] : memref<32x128xf32, #tpu.memory_space<vmem>>, vector<16x128xf32>
    tpu.vector_store %arg12[%c16, %c0_18], %48 {strides = array<i32>} : memref<32x128xf32, #tpu.memory_space<vmem>>, vector<16x128xf32>,
    %c0_19 = arith.constant 0 : index
    %c0_20 = arith.constant 0 : index
    %50 = vector.load %arg12[%c0_19, %c0_20] : memref<32x128xf32, #tpu.memory_space<vmem>>, vector<32x128xf32>
    %51 = vector.shape_cast %50 : vector<32x128xf32> to vector<2x16x128xf32>
    %cst_21 = arith.constant dense<0.000000e+00> : vector<2x128xf32>
    %52 = vector.multi_reduction <add>, %51, %cst_21 [1] : vector<2x16x128xf32> to vector<2x128xf32>
    %cst_22 = arith.constant 1.600000e+01 : f32
    %53 = vector.broadcast %cst_22 : f32 to vector<2x128xf32>
    %54 = arith.divf %52, %53 : vector<2x128xf32>
    %cst_23 = arith.constant dense<0xFF800000> : vector<2x128xf32>
    %55 = vector.multi_reduction <maximumf>, %51, %cst_23 [1] : vector<2x16x128xf32> to vector<2x128xf32>
    %c1 = arith.constant 1 : index
    %c0_24 = arith.constant 0 : index
    %56 = vector.load %arg10[%c1, %c0_24] : memref<8x512xf32, #tpu.memory_space<vmem>>, vector<1x128xf32>
    %c0_25 = arith.constant 0 : index
    %c0_26 = arith.constant 0 : index
    %57 = vector.load %arg4[%c0_25, %c0_26] : memref<128x256xf32, #tpu.memory_space<vmem>>, vector<128x256xf32>
    %cst_27 = arith.constant dense<0.000000e+00> : vector<32x256xf32>
    %58 = tpu.matmul %50, %57, %cst_27 {dimension_numbers = #tpu.dot_dimension_numbers<[1], [0], [0], [1], [0, 0, 1, 1], [], []>} : vector<32x128xf32>, vector<128x256xf32>, vector<32x256xf32> -> vector<32x256xf32>
    %59 = vector.extract_strided_slice %58 {offsets = [0, 0], sizes = [32, 128], strides = [1, 1]} : vector<32x256xf32> to vector<32x128xf32>
    %60 = vector.shape_cast %59 : vector<32x128xf32> to vector<2x16x128xf32>
    %61 = vector.extract_strided_slice %58 {offsets = [0, 128], sizes = [32, 128], strides = [1, 1]} : vector<32x256xf32> to vector<32x128xf32>
    %62 = vector.broadcast %56 : vector<1x128xf32> to vector<32x128xf32>
    %63 = arith.addf %61, %62 : vector<32x128xf32>
    %64 = vector.shape_cast %63 : vector<32x128xf32> to vector<2x16x128xf32>
    %65 = vector.extract_strided_slice %60 {offsets = [0, 0, 0], sizes = [1, 16, 128], strides = [1, 1, 1]} : vector<2x16x128xf32> to vector<1x16x128xf32>
    %66 = vector.shape_cast %65 : vector<1x16x128xf32> to vector<16x128xf32>
    %67 = vector.extract_strided_slice %6 {offsets = [0, 0, 0], sizes = [1, 16, 16], strides = [1, 1, 1]} : vector<2x16x16xf32> to vector<1x16x16xf32>
    %68 = vector.shape_cast %67 : vector<1x16x16xf32> to vector<16x16xf32>
    %69 = vector.shape_cast %66 : vector<16x128xf32> to vector<1x16x128xf32>
    %70 = vector.shape_cast %68 : vector<16x16xf32> to vector<16x16x1xf32>
    %71 = vector.broadcast %69 : vector<1x16x128xf32> to vector<16x16x128xf32>
    %72 = vector.broadcast %70 : vector<16x16x1xf32> to vector<16x16x128xf32>
    %73 = arith.addf %71, %72 : vector<16x16x128xf32>
    %cst_28 = arith.constant dense<0xFF800000> : vector<16x128xf32>
    %74 = vector.multi_reduction <maximumf>, %73, %cst_28 [1] : vector<16x16x128xf32> to vector<16x128xf32>
    %75 = vector.extract_strided_slice %64 {offsets = [0, 0, 0], sizes = [1, 16, 128], strides = [1, 1, 1]} : vector<2x16x128xf32> to vector<1x16x128xf32>
    %76 = vector.shape_cast %75 : vector<1x16x128xf32> to vector<16x128xf32>
    %77 = arith.addf %74, %76 : vector<16x128xf32>
    %cst_29 = arith.constant 0.000000e+00 : f32
    %78 = vector.broadcast %cst_29 : f32 to vector<16x128xf32>
    %79 = arith.maximumf %77, %78 : vector<16x128xf32>
    %c0_30 = arith.constant 0 : index
    %c0_31 = arith.constant 0 : index
    %80 = vector.load %arg12[%c0_30, %c0_31] : memref<32x128xf32, #tpu.memory_space<vmem>>, vector<16x128xf32>
    tpu.vector_store %arg12[%c0_30, %c0_31], %79 {strides = array<i32>} : memref<32x128xf32, #tpu.memory_space<vmem>>, vector<16x128xf32>,
    %81 = vector.extract_strided_slice %60 {offsets = [1, 0, 0], sizes = [1, 16, 128], strides = [1, 1, 1]} : vector<2x16x128xf32> to vector<1x16x128xf32>
    %82 = vector.shape_cast %81 : vector<1x16x128xf32> to vector<16x128xf32>
    %83 = vector.extract_strided_slice %6 {offsets = [1, 0, 0], sizes = [1, 16, 16], strides = [1, 1, 1]} : vector<2x16x16xf32> to vector<1x16x16xf32>
    %84 = vector.shape_cast %83 : vector<1x16x16xf32> to vector<16x16xf32>
    %85 = vector.shape_cast %82 : vector<16x128xf32> to vector<1x16x128xf32>
    %86 = vector.shape_cast %84 : vector<16x16xf32> to vector<16x16x1xf32>
    %87 = vector.broadcast %85 : vector<1x16x128xf32> to vector<16x16x128xf32>
    %88 = vector.broadcast %86 : vector<16x16x1xf32> to vector<16x16x128xf32>
    %89 = arith.addf %87, %88 : vector<16x16x128xf32>
    %cst_32 = arith.constant dense<0xFF800000> : vector<16x128xf32>
    %90 = vector.multi_reduction <maximumf>, %89, %cst_32 [1] : vector<16x16x128xf32> to vector<16x128xf32>
    %91 = vector.extract_strided_slice %64 {offsets = [1, 0, 0], sizes = [1, 16, 128], strides = [1, 1, 1]} : vector<2x16x128xf32> to vector<1x16x128xf32>
    %92 = vector.shape_cast %91 : vector<1x16x128xf32> to vector<16x128xf32>
    %93 = arith.addf %90, %92 : vector<16x128xf32>
    %cst_33 = arith.constant 0.000000e+00 : f32
    %94 = vector.broadcast %cst_33 : f32 to vector<16x128xf32>
    %95 = arith.maximumf %93, %94 : vector<16x128xf32>
    %c16_34 = arith.constant 16 : index
    %c0_35 = arith.constant 0 : index
    %96 = vector.load %arg12[%c16_34, %c0_35] : memref<32x128xf32, #tpu.memory_space<vmem>>, vector<16x128xf32>
    tpu.vector_store %arg12[%c16_34, %c0_35], %95 {strides = array<i32>} : memref<32x128xf32, #tpu.memory_space<vmem>>, vector<16x128xf32>,
    %c0_36 = arith.constant 0 : index
    %c0_37 = arith.constant 0 : index
    %97 = vector.load %arg12[%c0_36, %c0_37] : memref<32x128xf32, #tpu.memory_space<vmem>>, vector<32x128xf32>
    %98 = vector.shape_cast %97 : vector<32x128xf32> to vector<2x16x128xf32>
    %cst_38 = arith.constant dense<0.000000e+00> : vector<2x128xf32>
    %99 = vector.multi_reduction <add>, %98, %cst_38 [1] : vector<2x16x128xf32> to vector<2x128xf32>
    %cst_39 = arith.constant 1.600000e+01 : f32
    %100 = vector.broadcast %cst_39 : f32 to vector<2x128xf32>
    %101 = arith.divf %99, %100 : vector<2x128xf32>
    %cst_40 = arith.constant dense<0xFF800000> : vector<2x128xf32>
    %102 = vector.multi_reduction <maximumf>, %98, %cst_40 [1] : vector<2x16x128xf32> to vector<2x128xf32>
    %c2 = arith.constant 2 : index
    %c0_41 = arith.constant 0 : index
    %103 = vector.load %arg10[%c2, %c0_41] : memref<8x512xf32, #tpu.memory_space<vmem>>, vector<1x128xf32>
    %c0_42 = arith.constant 0 : index
    %c0_43 = arith.constant 0 : index
    %104 = vector.load %arg5[%c0_42, %c0_43] : memref<128x256xf32, #tpu.memory_space<vmem>>, vector<128x256xf32>
    %cst_44 = arith.constant dense<0.000000e+00> : vector<32x256xf32>
    %105 = tpu.matmul %97, %104, %cst_44 {dimension_numbers = #tpu.dot_dimension_numbers<[1], [0], [0], [1], [0, 0, 1, 1], [], []>} : vector<32x128xf32>, vector<128x256xf32>, vector<32x256xf32> -> vector<32x256xf32>
    %106 = vector.extract_strided_slice %105 {offsets = [0, 0], sizes = [32, 128], strides = [1, 1]} : vector<32x256xf32> to vector<32x128xf32>
    %107 = vector.shape_cast %106 : vector<32x128xf32> to vector<2x16x128xf32>
    %108 = vector.extract_strided_slice %105 {offsets = [0, 128], sizes = [32, 128], strides = [1, 1]} : vector<32x256xf32> to vector<32x128xf32>
    %109 = vector.broadcast %103 : vector<1x128xf32> to vector<32x128xf32>
    %110 = arith.addf %108, %109 : vector<32x128xf32>
    %111 = vector.shape_cast %110 : vector<32x128xf32> to vector<2x16x128xf32>
    %112 = vector.extract_strided_slice %107 {offsets = [0, 0, 0], sizes = [1, 16, 128], strides = [1, 1, 1]} : vector<2x16x128xf32> to vector<1x16x128xf32>
    %113 = vector.shape_cast %112 : vector<1x16x128xf32> to vector<16x128xf32>
    %114 = vector.extract_strided_slice %6 {offsets = [0, 0, 0], sizes = [1, 16, 16], strides = [1, 1, 1]} : vector<2x16x16xf32> to vector<1x16x16xf32>
    %115 = vector.shape_cast %114 : vector<1x16x16xf32> to vector<16x16xf32>
    %116 = vector.shape_cast %113 : vector<16x128xf32> to vector<1x16x128xf32>
    %117 = vector.shape_cast %115 : vector<16x16xf32> to vector<16x16x1xf32>
    %118 = vector.broadcast %116 : vector<1x16x128xf32> to vector<16x16x128xf32>
    %119 = vector.broadcast %117 : vector<16x16x1xf32> to vector<16x16x128xf32>
    %120 = arith.addf %118, %119 : vector<16x16x128xf32>
    %cst_45 = arith.constant dense<0xFF800000> : vector<16x128xf32>
    %121 = vector.multi_reduction <maximumf>, %120, %cst_45 [1] : vector<16x16x128xf32> to vector<16x128xf32>
    %122 = vector.extract_strided_slice %111 {offsets = [0, 0, 0], sizes = [1, 16, 128], strides = [1, 1, 1]} : vector<2x16x128xf32> to vector<1x16x128xf32>
    %123 = vector.shape_cast %122 : vector<1x16x128xf32> to vector<16x128xf32>
    %124 = arith.addf %121, %123 : vector<16x128xf32>
    %cst_46 = arith.constant 0.000000e+00 : f32
    %125 = vector.broadcast %cst_46 : f32 to vector<16x128xf32>
    %126 = arith.maximumf %124, %125 : vector<16x128xf32>
    %c0_47 = arith.constant 0 : index
    %c0_48 = arith.constant 0 : index
    %127 = vector.load %arg12[%c0_47, %c0_48] : memref<32x128xf32, #tpu.memory_space<vmem>>, vector<16x128xf32>
    tpu.vector_store %arg12[%c0_47, %c0_48], %126 {strides = array<i32>} : memref<32x128xf32, #tpu.memory_space<vmem>>, vector<16x128xf32>,
    %128 = vector.extract_strided_slice %107 {offsets = [1, 0, 0], sizes = [1, 16, 128], strides = [1, 1, 1]} : vector<2x16x128xf32> to vector<1x16x128xf32>
    %129 = vector.shape_cast %128 : vector<1x16x128xf32> to vector<16x128xf32>
    %130 = vector.extract_strided_slice %6 {offsets = [1, 0, 0], sizes = [1, 16, 16], strides = [1, 1, 1]} : vector<2x16x16xf32> to vector<1x16x16xf32>
    %131 = vector.shape_cast %130 : vector<1x16x16xf32> to vector<16x16xf32>
    %132 = vector.shape_cast %129 : vector<16x128xf32> to vector<1x16x128xf32>
    %133 = vector.shape_cast %131 : vector<16x16xf32> to vector<16x16x1xf32>
    %134 = vector.broadcast %132 : vector<1x16x128xf32> to vector<16x16x128xf32>
    %135 = vector.broadcast %133 : vector<16x16x1xf32> to vector<16x16x128xf32>
    %136 = arith.addf %134, %135 : vector<16x16x128xf32>
    %cst_49 = arith.constant dense<0xFF800000> : vector<16x128xf32>
    %137 = vector.multi_reduction <maximumf>, %136, %cst_49 [1] : vector<16x16x128xf32> to vector<16x128xf32>
    %138 = vector.extract_strided_slice %111 {offsets = [1, 0, 0], sizes = [1, 16, 128], strides = [1, 1, 1]} : vector<2x16x128xf32> to vector<1x16x128xf32>
    %139 = vector.shape_cast %138 : vector<1x16x128xf32> to vector<16x128xf32>
    %140 = arith.addf %137, %139 : vector<16x128xf32>
    %cst_50 = arith.constant 0.000000e+00 : f32
    %141 = vector.broadcast %cst_50 : f32 to vector<16x128xf32>
    %142 = arith.maximumf %140, %141 : vector<16x128xf32>
    %c16_51 = arith.constant 16 : index
    %c0_52 = arith.constant 0 : index
    %143 = vector.load %arg12[%c16_51, %c0_52] : memref<32x128xf32, #tpu.memory_space<vmem>>, vector<16x128xf32>
    tpu.vector_store %arg12[%c16_51, %c0_52], %142 {strides = array<i32>} : memref<32x128xf32, #tpu.memory_space<vmem>>, vector<16x128xf32>,
    %c0_53 = arith.constant 0 : index
    %c0_54 = arith.constant 0 : index
    %144 = vector.load %arg12[%c0_53, %c0_54] : memref<32x128xf32, #tpu.memory_space<vmem>>, vector<32x128xf32>
    %145 = vector.shape_cast %144 : vector<32x128xf32> to vector<2x16x128xf32>
    %cst_55 = arith.constant dense<0.000000e+00> : vector<2x128xf32>
    %146 = vector.multi_reduction <add>, %145, %cst_55 [1] : vector<2x16x128xf32> to vector<2x128xf32>
    %cst_56 = arith.constant 1.600000e+01 : f32
    %147 = vector.broadcast %cst_56 : f32 to vector<2x128xf32>
    %148 = arith.divf %146, %147 : vector<2x128xf32>
    %cst_57 = arith.constant dense<0xFF800000> : vector<2x128xf32>
    %149 = vector.multi_reduction <maximumf>, %145, %cst_57 [1] : vector<2x16x128xf32> to vector<2x128xf32>
    %c0_58 = arith.constant 0 : index
    %c0_59 = arith.constant 0 : index
    %150 = vector.load %arg6[%c0_58, %c0_59] : memref<256x512xf32, #tpu.memory_space<vmem>>, vector<128x512xf32>
    %c128 = arith.constant 128 : index
    %c0_60 = arith.constant 0 : index
    %151 = vector.load %arg6[%c128, %c0_60] : memref<256x512xf32, #tpu.memory_space<vmem>>, vector<128x512xf32>
    %c0_61 = arith.constant 0 : index
    %c0_62 = arith.constant 0 : index
    %152 = vector.load %arg7[%c0_61, %c0_62] : memref<128x512xf32, #tpu.memory_space<vmem>>, vector<128x512xf32>
    %c3 = arith.constant 3 : index
    %c0_63 = arith.constant 0 : index
    %153 = vector.load %arg10[%c3, %c0_63] : memref<8x512xf32, #tpu.memory_space<vmem>>, vector<1x512xf32>
    %cst_64 = arith.constant 0.000000e+00 : f32
    %154 = vector.broadcast %cst_64 : f32 to vector<2x128xf32>
    %cst_65 = arith.constant 0.000000e+00 : f32
    %155 = vector.broadcast %cst_65 : f32 to vector<2x128xf32>
    %cst_66 = arith.constant dense<0.000000e+00> : vector<2x512xf32>
    %156 = tpu.matmul %54, %150, %cst_66 {dimension_numbers = #tpu.dot_dimension_numbers<[1], [0], [0], [1], [0, 0, 1, 1], [], []>} : vector<2x128xf32>, vector<128x512xf32>, vector<2x512xf32> -> vector<2x512xf32>
    %cst_67 = arith.constant dense<0.000000e+00> : vector<2x512xf32>
    %157 = tpu.matmul %55, %151, %cst_67 {dimension_numbers = #tpu.dot_dimension_numbers<[1], [0], [0], [1], [0, 0, 1, 1], [], []>} : vector<2x128xf32>, vector<128x512xf32>, vector<2x512xf32> -> vector<2x512xf32>
    %158 = arith.addf %156, %157 : vector<2x512xf32>
    %cst_68 = arith.constant dense<0.000000e+00> : vector<2x512xf32>
    %159 = tpu.matmul %154, %152, %cst_68 {dimension_numbers = #tpu.dot_dimension_numbers<[1], [0], [0], [1], [0, 0, 1, 1], [], []>} : vector<2x128xf32>, vector<128x512xf32>, vector<2x512xf32> -> vector<2x512xf32>
    %160 = arith.addf %158, %159 : vector<2x512xf32>
    %161 = vector.broadcast %153 : vector<1x512xf32> to vector<2x512xf32>
    %162 = arith.addf %160, %161 : vector<2x512xf32>
    %163 = vector.extract_strided_slice %162 {offsets = [0, 0], sizes = [2, 128], strides = [1, 1]} : vector<2x512xf32> to vector<2x128xf32>
    %164 = arith.negf %163 : vector<2x128xf32>
    %165 = math.exp %164 : vector<2x128xf32>
    %cst_69 = arith.constant 1.000000e+00 : f32
    %166 = vector.broadcast %cst_69 : f32 to vector<2x128xf32>
    %167 = arith.addf %166, %165 : vector<2x128xf32>
    %168 = arith.divf %166, %167 : vector<2x128xf32>
    %169 = vector.extract_strided_slice %162 {offsets = [0, 128], sizes = [2, 128], strides = [1, 1]} : vector<2x512xf32> to vector<2x128xf32>
    %170 = arith.negf %169 : vector<2x128xf32>
    %171 = math.exp %170 : vector<2x128xf32>
    %cst_70 = arith.constant 1.000000e+00 : f32
    %172 = vector.broadcast %cst_70 : f32 to vector<2x128xf32>
    %173 = arith.addf %172, %171 : vector<2x128xf32>
    %174 = arith.divf %172, %173 : vector<2x128xf32>
    %175 = vector.extract_strided_slice %162 {offsets = [0, 256], sizes = [2, 128], strides = [1, 1]} : vector<2x512xf32> to vector<2x128xf32>
    %176 = math.tanh %175 : vector<2x128xf32>
    %177 = vector.extract_strided_slice %162 {offsets = [0, 384], sizes = [2, 128], strides = [1, 1]} : vector<2x512xf32> to vector<2x128xf32>
    %178 = arith.negf %177 : vector<2x128xf32>
    %179 = math.exp %178 : vector<2x128xf32>
    %cst_71 = arith.constant 1.000000e+00 : f32
    %180 = vector.broadcast %cst_71 : f32 to vector<2x128xf32>
    %181 = arith.addf %180, %179 : vector<2x128xf32>
    %182 = arith.divf %180, %181 : vector<2x128xf32>
    %183 = arith.mulf %174, %155 : vector<2x128xf32>
    %184 = arith.mulf %168, %176 : vector<2x128xf32>
    %185 = arith.addf %183, %184 : vector<2x128xf32>
    %186 = math.tanh %185 : vector<2x128xf32>
    %187 = arith.mulf %182, %186 : vector<2x128xf32>
    %cst_72 = arith.constant dense<0.000000e+00> : vector<2x512xf32>
    %188 = tpu.matmul %101, %150, %cst_72 {dimension_numbers = #tpu.dot_dimension_numbers<[1], [0], [0], [1], [0, 0, 1, 1], [], []>} : vector<2x128xf32>, vector<128x512xf32>, vector<2x512xf32> -> vector<2x512xf32>
    %cst_73 = arith.constant dense<0.000000e+00> : vector<2x512xf32>
    %189 = tpu.matmul %102, %151, %cst_73 {dimension_numbers = #tpu.dot_dimension_numbers<[1], [0], [0], [1], [0, 0, 1, 1], [], []>} : vector<2x128xf32>, vector<128x512xf32>, vector<2x512xf32> -> vector<2x512xf32>
    %190 = arith.addf %188, %189 : vector<2x512xf32>
    %cst_74 = arith.constant dense<0.000000e+00> : vector<2x512xf32>
    %191 = tpu.matmul %187, %152, %cst_74 {dimension_numbers = #tpu.dot_dimension_numbers<[1], [0], [0], [1], [0, 0, 1, 1], [], []>} : vector<2x128xf32>, vector<128x512xf32>, vector<2x512xf32> -> vector<2x512xf32>
    %192 = arith.addf %190, %191 : vector<2x512xf32>
    %193 = vector.broadcast %153 : vector<1x512xf32> to vector<2x512xf32>
    %194 = arith.addf %192, %193 : vector<2x512xf32>
    %195 = vector.extract_strided_slice %194 {offsets = [0, 0], sizes = [2, 128], strides = [1, 1]} : vector<2x512xf32> to vector<2x128xf32>
    %196 = arith.negf %195 : vector<2x128xf32>
    %197 = math.exp %196 : vector<2x128xf32>
    %cst_75 = arith.constant 1.000000e+00 : f32
    %198 = vector.broadcast %cst_75 : f32 to vector<2x128xf32>
    %199 = arith.addf %198, %197 : vector<2x128xf32>
    %200 = arith.divf %198, %199 : vector<2x128xf32>
    %201 = vector.extract_strided_slice %194 {offsets = [0, 128], sizes = [2, 128], strides = [1, 1]} : vector<2x512xf32> to vector<2x128xf32>
    %202 = arith.negf %201 : vector<2x128xf32>
    %203 = math.exp %202 : vector<2x128xf32>
    %cst_76 = arith.constant 1.000000e+00 : f32
    %204 = vector.broadcast %cst_76 : f32 to vector<2x128xf32>
    %205 = arith.addf %204, %203 : vector<2x128xf32>
    %206 = arith.divf %204, %205 : vector<2x128xf32>
    %207 = vector.extract_strided_slice %194 {offsets = [0, 256], sizes = [2, 128], strides = [1, 1]} : vector<2x512xf32> to vector<2x128xf32>
    %208 = math.tanh %207 : vector<2x128xf32>
    %209 = vector.extract_strided_slice %194 {offsets = [0, 384], sizes = [2, 128], strides = [1, 1]} : vector<2x512xf32> to vector<2x128xf32>
    %210 = arith.negf %209 : vector<2x128xf32>
    %211 = math.exp %210 : vector<2x128xf32>
    %cst_77 = arith.constant 1.000000e+00 : f32
    %212 = vector.broadcast %cst_77 : f32 to vector<2x128xf32>
    %213 = arith.addf %212, %211 : vector<2x128xf32>
    %214 = arith.divf %212, %213 : vector<2x128xf32>
    %215 = arith.mulf %206, %185 : vector<2x128xf32>
    %216 = arith.mulf %200, %208 : vector<2x128xf32>
    %217 = arith.addf %215, %216 : vector<2x128xf32>
    %218 = math.tanh %217 : vector<2x128xf32>
    %219 = arith.mulf %214, %218 : vector<2x128xf32>
    %cst_78 = arith.constant dense<0.000000e+00> : vector<2x512xf32>
    %220 = tpu.matmul %148, %150, %cst_78 {dimension_numbers = #tpu.dot_dimension_numbers<[1], [0], [0], [1], [0, 0, 1, 1], [], []>} : vector<2x128xf32>, vector<128x512xf32>, vector<2x512xf32> -> vector<2x512xf32>
    %cst_79 = arith.constant dense<0.000000e+00> : vector<2x512xf32>
    %221 = tpu.matmul %149, %151, %cst_79 {dimension_numbers = #tpu.dot_dimension_numbers<[1], [0], [0], [1], [0, 0, 1, 1], [], []>} : vector<2x128xf32>, vector<128x512xf32>, vector<2x512xf32> -> vector<2x512xf32>
    %222 = arith.addf %220, %221 : vector<2x512xf32>
    %cst_80 = arith.constant dense<0.000000e+00> : vector<2x512xf32>
    %223 = tpu.matmul %219, %152, %cst_80 {dimension_numbers = #tpu.dot_dimension_numbers<[1], [0], [0], [1], [0, 0, 1, 1], [], []>} : vector<2x128xf32>, vector<128x512xf32>, vector<2x512xf32> -> vector<2x512xf32>
    %224 = arith.addf %222, %223 : vector<2x512xf32>
    %225 = vector.broadcast %153 : vector<1x512xf32> to vector<2x512xf32>
    %226 = arith.addf %224, %225 : vector<2x512xf32>
    %227 = vector.extract_strided_slice %226 {offsets = [0, 0], sizes = [2, 128], strides = [1, 1]} : vector<2x512xf32> to vector<2x128xf32>
    %228 = arith.negf %227 : vector<2x128xf32>
    %229 = math.exp %228 : vector<2x128xf32>
    %cst_81 = arith.constant 1.000000e+00 : f32
    %230 = vector.broadcast %cst_81 : f32 to vector<2x128xf32>
    %231 = arith.addf %230, %229 : vector<2x128xf32>
    %232 = arith.divf %230, %231 : vector<2x128xf32>
    %233 = vector.extract_strided_slice %226 {offsets = [0, 128], sizes = [2, 128], strides = [1, 1]} : vector<2x512xf32> to vector<2x128xf32>
    %234 = arith.negf %233 : vector<2x128xf32>
    %235 = math.exp %234 : vector<2x128xf32>
    %cst_82 = arith.constant 1.000000e+00 : f32
    %236 = vector.broadcast %cst_82 : f32 to vector<2x128xf32>
    %237 = arith.addf %236, %235 : vector<2x128xf32>
    %238 = arith.divf %236, %237 : vector<2x128xf32>
    %239 = vector.extract_strided_slice %226 {offsets = [0, 256], sizes = [2, 128], strides = [1, 1]} : vector<2x512xf32> to vector<2x128xf32>
    %240 = math.tanh %239 : vector<2x128xf32>
    %241 = vector.extract_strided_slice %226 {offsets = [0, 384], sizes = [2, 128], strides = [1, 1]} : vector<2x512xf32> to vector<2x128xf32>
    %242 = arith.negf %241 : vector<2x128xf32>
    %243 = math.exp %242 : vector<2x128xf32>
    %cst_83 = arith.constant 1.000000e+00 : f32
    %244 = vector.broadcast %cst_83 : f32 to vector<2x128xf32>
    %245 = arith.addf %244, %243 : vector<2x128xf32>
    %246 = arith.divf %244, %245 : vector<2x128xf32>
    %247 = arith.mulf %238, %217 : vector<2x128xf32>
    %248 = arith.mulf %232, %240 : vector<2x128xf32>
    %249 = arith.addf %247, %248 : vector<2x128xf32>
    %250 = math.tanh %249 : vector<2x128xf32>
    %251 = arith.mulf %246, %250 : vector<2x128xf32>
    %c0_84 = arith.constant 0 : index
    %c0_85 = arith.constant 0 : index
    %252 = vector.load %arg8[%c0_84, %c0_85] : memref<128x128xf32, #tpu.memory_space<vmem>>, vector<128x128xf32>
    %cst_86 = arith.constant dense<0.000000e+00> : vector<2x128xf32>
    %253 = tpu.matmul %251, %252, %cst_86 {dimension_numbers = #tpu.dot_dimension_numbers<[1], [0], [0], [1], [0, 0, 1, 1], [], []>} : vector<2x128xf32>, vector<128x128xf32>, vector<2x128xf32> -> vector<2x128xf32>
    %c4 = arith.constant 4 : index
    %c0_87 = arith.constant 0 : index
    %254 = vector.load %arg10[%c4, %c0_87] : memref<8x512xf32, #tpu.memory_space<vmem>>, vector<1x128xf32>
    %255 = vector.broadcast %254 : vector<1x128xf32> to vector<2x128xf32>
    %256 = arith.addf %253, %255 : vector<2x128xf32>
    %cst_88 = arith.constant 0.000000e+00 : f32
    %257 = vector.broadcast %cst_88 : f32 to vector<2x128xf32>
    %258 = arith.maximumf %256, %257 : vector<2x128xf32>
    %c0_89 = arith.constant 0 : index
    %c0_90 = arith.constant 0 : index
    %259 = vector.load %arg9[%c0_89, %c0_90] : memref<128x128xf32, #tpu.memory_space<vmem>>, vector<128x128xf32>
    %cst_91 = arith.constant dense<0.000000e+00> : vector<2x128xf32>
    %260 = tpu.matmul %258, %259, %cst_91 {dimension_numbers = #tpu.dot_dimension_numbers<[1], [0], [0], [1], [0, 0, 1, 1], [], []>} : vector<2x128xf32>, vector<128x128xf32>, vector<2x128xf32> -> vector<2x128xf32>
    %c5 = arith.constant 5 : index
    %c0_92 = arith.constant 0 : index
    %261 = vector.load %arg10[%c5, %c0_92] : memref<8x512xf32, #tpu.memory_space<vmem>>, vector<1x128xf32>
    %262 = vector.broadcast %261 : vector<1x128xf32> to vector<2x128xf32>
    %263 = arith.addf %260, %262 : vector<2x128xf32>
    %c0_93 = arith.constant 0 : index
    %c0_94 = arith.constant 0 : index
    %264 = vector.load %arg11[%c0_93, %c0_94] : memref<2x128xf32, #tpu.memory_space<vmem>>, vector<2x128xf32>
    tpu.vector_store %arg11[%c0_93, %c0_94], %263 {strides = array<i32>} : memref<2x128xf32, #tpu.memory_space<vmem>>, vector<2x128xf32>,
    return
  }
  func.func @transform_0(%arg0: i32) -> (i32, i32, i32) {
    %c0_i32 = arith.constant 0 : i32
    %c0_i32_0 = arith.constant 0 : i32
    %c0_i32_1 = arith.constant 0 : i32
    return %arg0, %c0_i32, %c0_i32_0 : i32, i32, i32
  }
  func.func @transform_1(%arg0: i32) -> (i32, i32, i32) {
    %c0_i32 = arith.constant 0 : i32
    %c0_i32_0 = arith.constant 0 : i32
    %c0_i32_1 = arith.constant 0 : i32
    return %arg0, %c0_i32, %c0_i32_0 : i32, i32, i32
  }
  func.func @transform_2(%arg0: i32) -> (i32, i32) {
    %c0_i32 = arith.constant 0 : i32
    %c0_i32_0 = arith.constant 0 : i32
    %c0_i32_1 = arith.constant 0 : i32
    return %c0_i32, %c0_i32_0 : i32, i32
  }
  func.func @transform_3(%arg0: i32) -> (i32, i32) {
    %c0_i32 = arith.constant 0 : i32
    %c0_i32_0 = arith.constant 0 : i32
    %c0_i32_1 = arith.constant 0 : i32
    return %c0_i32, %c0_i32_0 : i32, i32
  }
  func.func @transform_4(%arg0: i32) -> (i32, i32) {
    %c0_i32 = arith.constant 0 : i32
    %c0_i32_0 = arith.constant 0 : i32
    %c0_i32_1 = arith.constant 0 : i32
    return %c0_i32, %c0_i32_0 : i32, i32
  }
  func.func @transform_5(%arg0: i32) -> (i32, i32) {
    %c0_i32 = arith.constant 0 : i32
    %c0_i32_0 = arith.constant 0 : i32
    %c0_i32_1 = arith.constant 0 : i32
    return %c0_i32, %c0_i32_0 : i32, i32
  }
  func.func @transform_6(%arg0: i32) -> (i32, i32) {
    %c0_i32 = arith.constant 0 : i32
    %c0_i32_0 = arith.constant 0 : i32
    %c0_i32_1 = arith.constant 0 : i32
    return %c0_i32, %c0_i32_0 : i32, i32
  }
  func.func @transform_7(%arg0: i32) -> (i32, i32) {
    %c0_i32 = arith.constant 0 : i32
    %c0_i32_0 = arith.constant 0 : i32
    %c0_i32_1 = arith.constant 0 : i32
    return %c0_i32, %c0_i32_0 : i32, i32
  }
  func.func @transform_8(%arg0: i32) -> (i32, i32) {
    %c0_i32 = arith.constant 0 : i32
    %c0_i32_0 = arith.constant 0 : i32
    %c0_i32_1 = arith.constant 0 : i32
    return %c0_i32, %c0_i32_0 : i32, i32
  }
  func.func @transform_9(%arg0: i32) -> (i32, i32) {
    %c0_i32 = arith.constant 0 : i32
    %c0_i32_0 = arith.constant 0 : i32
    %c0_i32_1 = arith.constant 0 : i32
    return %c0_i32, %c0_i32_0 : i32, i32
  }
  func.func @transform_10(%arg0: i32) -> (i32, i32) {
    %c0_i32 = arith.constant 0 : i32
    %c0_i32_0 = arith.constant 0 : i32
    return %arg0, %c0_i32 : i32, i32
  }
}

</mosaic_0001>

<bundles_post_ra>
// kernel: tpu_custom_call.1
= control target key start
LH: loop header
LB: loop body
LE: loop exit
PB: predicated region body
PF: predicated region fallthrough
CT: control target
= control target key end

     0   :  { %15 = vsyncpa [#allocation4], 0  ;;  %s6349_s0 = inlined_call_operand.vmem [shape: f32[2,16,4], index: 0, kind: input, shape index: {}]   ;;  %s6350_s1 = inlined_call_operand.vmem [shape: s8[2,16,16], index: 1, kind: input, shape index: {}]   ;;  %s6351_s2 = inlined_call_operand.vmem [shape: f32[4,256], index: 2, kind: input, shape index: {}]   ;;  %s6352_s3 = inlined_call_operand.hbm [shape: f32[128,256], index: 3, kind: input, shape index: {}]   ;;  %s6353_s4 = inlined_call_operand.hbm [shape: f32[128,256], index: 4, kind: input, shape index: {}]   ;;  %s6354_s5 = inlined_call_operand.hbm [shape: f32[256,512], index: 5, kind: input, shape index: {}]   ;;  %s6355_s6 = inlined_call_operand.hbm [shape: f32[128,512], index: 6, kind: input, shape index: {}]   ;;  %s6356_s7 = inlined_call_operand.hbm [shape: f32[128,128], index: 7, kind: input, shape index: {}]   ;;  %s6357_s8 = inlined_call_operand.hbm [shape: f32[128,128], index: 8, kind: input, shape index: {}]   ;;  %s6358_s9 = inlined_call_operand.vmem [shape: f32[8,512], index: 9, kind: input, shape index: {}]   ;;  %s6359_s10 = inlined_call_operand.hbm [shape: f32[2,128], index: 10, kind: output, shape index: {}]  }
   0x1   :  { %16 = vsyncpa [#allocation7], 0 }
   0x2   :  { %17 = vsyncpa [#allocation10], 0 }
   0x3   :  { %18 = vsyncpa [#allocation13], 0 }
   0x4   :  { %19 = vsyncpa [#allocation5], 0  ;;  %s43_s15 = sshll.u32 %s6353_s4, 4  ;;  %s4333_s16 = smov [#allocation6]   ;;  %s44_s15 = int_to_ptr.hbm [resolvable:$true] %s43_s15 }
   0x5   :  { %s45_s17 = sshll.u32 %s4333_s16, 4  ;;  %s4334_s18 = smov 256   ;;  %s46_s17 = int_to_ptr.vmem [resolvable:$true] %s45_s17 }
   0x6   :  { %s4335_s19 = smov 16   ;;  %s69_s22 = sshll.u32 %s6355_s6, 4  ;;  %s70_s22 = int_to_ptr.hbm [resolvable:$true] %s69_s22 }
   0x7   :  { %51 = dma.hbm_to_vmem [thread:$0]  %s44_s15, 4096, %s46_s17, [#allocation7], %s4334_s18, %s4334_s18, %s4335_s19  }
   0x8   :  { %s4336_s23 = smov [#allocation9]   ;;  %s30_s27 = sshll.u32 %s6352_s3, 4  ;;  %s31_s27 = int_to_ptr.hbm [resolvable:$true] %s30_s27 }
   0x9   :  { %s71_s24 = sshll.u32 %s4336_s23, 4  ;;  %s4337_s4 = smov 512   ;;  %s72_s24 = int_to_ptr.vmem [resolvable:$true] %s71_s24 }
   0xa   :  { %s4338_s28 = smov 32   ;;  %s56_s11 = sshll.u32 %s6354_s5, 4  ;;  %s57_s11 = int_to_ptr.hbm [resolvable:$true] %s56_s11 }
   0xb   :  { %77 = dma.hbm_to_vmem [thread:$0]  %s70_s22, 8192, %s72_s24, [#allocation10], %s4337_s4, %s4337_s4, %s4338_s28  }
   0xc   :  { %s4339_s12 = smov [#allocation3]   ;;  %s4340_s6 = smov [#allocation8]  }
   0xd   :  { %s32_s13 = sshll.u32 %s4339_s12, 4  ;;  %s58_s14 = sshll.u32 %s4340_s6, 4  ;;  %s33_s13 = int_to_ptr.vmem [resolvable:$true] %s32_s13  ;;  %s59_s14 = int_to_ptr.vmem [resolvable:$true] %s58_s14 }
   0xe   :  { %38 = dma.hbm_to_vmem [thread:$0]  %s31_s27, 4096, %s33_s13, [#allocation4], %s4334_s18, %s4334_s18, %s4335_s19  }
   0xf   :  { %s82_s3 = sshll.u32 %s6356_s7, 4  ;;  %s4341_s17 = smov [#allocation11]   ;;  %s83_s3 = int_to_ptr.hbm [resolvable:$true] %s82_s3 }
  0x10   :  { %64 = dma.hbm_to_vmem [thread:$0]  %s57_s11, 16384, %s59_s14, [#allocation7], %s4337_s4, %s4337_s4, %s4338_s28  }
  0x11   :  { %s84_s20 = sshll.u32 %s4341_s17, 4  ;;  %s95_s5 = sshll.u32 %s6357_s8, 4  ;;  %s85_s20 = int_to_ptr.vmem [resolvable:$true] %s84_s20  ;;  %s96_s5 = int_to_ptr.hbm [resolvable:$true] %s95_s5 }
  0x12   :  { %s4342_s23 = smov 128   ;;  %s4343_s24 = smov 8  }
  0x13   :  { %90 = dma.hbm_to_vmem [thread:$0]  %s83_s3, 2048, %s85_s20, [#allocation10], %s4342_s23, %s4342_s23, %s4343_s24  }
  0x14   :  { %s4344_s18 = smov [#allocation12]  }
  0x15   :  { %s97_s19 = sshll.u32 %s4344_s18, 4  ;;  %s98_s19 = int_to_ptr.vmem [resolvable:$true] %s97_s19 }
  0x16   :  { %103 = dma.hbm_to_vmem [thread:$0]  %s96_s5, 2048, %s98_s19, [#allocation13], %s4342_s23, %s4342_s23, %s4343_s24  }
  0x17   :  { %4323 = dma.done.wait [#allocation4], 4096  }
  0x18   :  { %4324 = vsyncadd [#allocation4], 4294963200 }
  0x19   :  { %4325 = dma.done.wait [#allocation7], 20480  }
  0x1a   :  { %4326 = vsyncadd [#allocation7], 4294946816 }
  0x1b   :  { %4327 = dma.done.wait [#allocation10], 10240  }
  0x1c   :  { %4328 = vsyncadd [#allocation10], 4294957056 }
  0x1d   :  { %4329 = dma.done.wait [#allocation13], 2048  }
  0x1e   :  { %4330 = vsyncadd [#allocation13], 4294965248  ;;  %v241_v0 = vlaneseq  ;;  %v155_v2 = vld [vmem:[%s6351_s2] sm:$0xff]  ;;  %vm173_vm1 = vcmask 1043456   ;;  %v4345_v6 = vmov -1e+30  }
  0x1f   :  { %v3775_v3 = vld [vmem:[%s6350_s1] sm:$0xff]   ;;  %157 = vst [vmem:[#allocation1] ss:$2 sm:$0xff] %v155_v2  ;;  %vm160_vm2 = vcmask 31744   ;;  %v151_v18 = vld [vmem:[%s6349_s0 + $0x8] sm:$0xff]  ;;  %v152_v37 = vld [vmem:[%s6349_s0 + $0x10] sm:$0xff] }
  0x20   :  { %v4422_v1 = vshrl.u32 %v241_v0, 7  ;;  %v3776_v4 = vunpack.c.0.s8 %v3775_v3  ;;  %v3777_v12 = vunpack.c.1.s8 %v3775_v3  ;;  %v150_v13 = vld [vmem:[%s6349_s0] sm:$0xff]  ;;  %v3780_v21 = vunpack.c.2.s8 %v3775_v3  ;;  %v153_v39 = vld [vmem:[%s6349_s0 + $0x18] sm:$0xff]  ;;  %v1245_v56 = vld [vmem:[#allocation3 + $0xe0] sm:$0xff]  ;;  %s4348_s8 = smov [#allocation14]   ;;  %s3741_s27 = sshll.u32 %s6359_s10, 4  ;;  %s3742_s27 = int_to_ptr.hbm [resolvable:$true] %s3741_s27 }
  0x21   :  { %v3781_v25 = vunpack.c.3.s8 %v3775_v3  ;;  %v1247_v53 = vld [vmem:[#allocation3 + $0xf0] sm:$0xff]  ;;  %v1248_v54 = vld [vmem:[#allocation3 + $0xf8] sm:$0xff]  ;;  %v1246_v57 = vld [vmem:[#allocation3 + $0xe8] sm:$0xff]  ;;  %vm673_vm6 = vcmask 1041409   ;;  %vm676_vm7 = vcmask 1042434   ;;  %vm679_vm8 = vcmask 1043459  }
  0x22   :  { %3802 = vset.pattern.permute.xlu2 %v4422_v1  ;;  %3800 = vset.pattern.permute.xlu1 %v4422_v1  ;;  %v138_v5 = vcvt.s32.f32 %v3776_v4  ;;  %v139_v15 = vcvt.s32.f32 %v3777_v12  ;;  %v4446_v16 = vadd.s32 8, %v4422_v1  ;;  %v140_v22 = vcvt.s32.f32 %v3780_v21  ;;  %v1243_v58 = vld [vmem:[#allocation3 + $0xd0] sm:$0xff]  ;;  %v1244_v59 = vld [vmem:[#allocation3 + $0xd8] sm:$0xff]  ;;  %v1241_v61 = vld [vmem:[#allocation3 + $0xc0] sm:$0xff]  ;;  %s3739_s25 = sshll.u32 %s4348_s8, 4  ;;  %s3740_s25 = int_to_ptr.vmem [resolvable:$true] %s3739_s25 }
  0x23   :  { %3799 = vset.pattern.permute.xlu0 %v4422_v1  ;;  %v141_v27 = vcvt.s32.f32 %v3781_v25  ;;  %1249 = vmatpush.msra.mxu2 %v1247_v53  ;;  %v1242_v62 = vld [vmem:[#allocation3 + $0xc8] sm:$0xff]  ;;  %v1239_v0 = vld [vmem:[#allocation3 + $0xb0] sm:$0xff]  ;;  %v1240_v2 = vld [vmem:[#allocation3 + $0xb8] sm:$0xff]  ;;  %vm682_vm9 = vcmask 1044484   ;;  %vm685_vm10 = vcmask 1045509   ;;  %vm688_vm11 = vcmask 1046534  }
  0x24   :  { %vm142_vm0 = vcmp.gt.f32.partialorder %v138_v5, 0.0  ;;  %vm143_vm3 = vcmp.gt.f32.partialorder %v139_v15, 0.0  ;;  %vm144_vm4 = vcmp.gt.f32.partialorder %v140_v22, 0.0  ;;  %1278 = vmatpush.msra.mxu3 %v1248_v54  ;;  %v1233_v15 = vld [vmem:[#allocation3 + $0x80] sm:$0xff]  ;;  %vm691_vm12 = vcmask 1047559  }
  0x25   :  { %v4433_v7 = vsel %vm142_vm0, 0.0, %v4345_v6  ;;  %v4455_v19 = vsel %vm143_vm3, 0.0, %v4345_v6  ;;  %v4464_v26 = vsel %vm144_vm4, 0.0, %v4345_v6  ;;  %vm145_vm5 = vcmp.gt.f32.partialorder %v141_v27, 0.0  ;;  %1250 = vmatpush.msra.mxu2 %v1245_v56  ;;  %v1225_v54 = vld [vmem:[#allocation3 + $0x40] sm:$0xff]  ;;  %v1226_v56 = vld [vmem:[#allocation3 + $0x48] sm:$0xff] }
  0x26   :  { %v266_v8 = vperm.slane %v4433_v7, 2  ;;  %v253_v9 = vperm.slane %v4433_v7, 1  ;;  %v240_v10 = vperm.slane %v4433_v7, 0  ;;  %v158_v11 = vld.sshfl [vmem:[#allocation1] sm:$0xff pattern:$0x75316420]  ;;  %1279 = vmatpush.msra.mxu3 %v1246_v57 }
  0x27   :  { %3754 = vmatpush.msk.msra.mxu0 %vm173_vm1, %v158_v11  ;;  %v159_v14 = vld.sshfl [vmem:[#allocation1 + $0x8] sm:$0xff pattern:$0x75316420]  ;;  %v292_v17 = vperm.slane %v4433_v7, 4  ;;  %v370_v20 = vperm.slane %v4455_v19, 2  ;;  %v422_v23 = vperm.slane %v4455_v19, 6  ;;  %1251 = vmatpush.msra.mxu2 %v1243_v58 }
  0x28   :  { %3755 = vmatmul.msk.f32.vlgmr.msra.gmra.mxu0 %vm160_vm2, %v150_v13  ;;  %3759 = vmatpush.msk.msra.mxu1 %vm173_vm1, %v159_v14  ;;  %v279_v24 = vperm.slane %v4433_v7, 3  ;;  %v750_v28 = vperm.slane %v4464_v26, 3  ;;  %v4470_v29 = vsel %vm145_vm5, 0.0, %v4345_v6  ;;  %v305_v31 = vperm.slane %v4433_v7, 5  ;;  %v1237_v6 = vld [vmem:[#allocation3 + $0xa0] sm:$0xff] }
  0x29   :  { %3760 = vmatmul.msk.f32.vlgmr.msra.gmra.mxu1 %vm160_vm2, %v150_v13  ;;  %v828_v30 = vperm.slane %v4470_v29, 1  ;;  %v6360_v32 = vperm.slane %v4470_v29, 5  ;;  %v318_v33 = vperm.slane %v4433_v7, 6  ;;  %v331_v34 = vperm.slane %v4433_v7, 7  ;;  %1280 = vmatpush.msra.mxu3 %v1244_v59  ;;  %v1238_v7 = vld [vmem:[#allocation3 + $0xa8] sm:$0xff] }
  0x2a   :  { %271 = vperm.xlu1 %3800, %v266_v8   ;;  %245 = vperm.xlu2 %3802, %v240_v10   ;;  %v357_v35 = vperm.slane %v4455_v19, 1  ;;  %v383_v36 = vperm.slane %v4455_v19, 3  ;;  %v344_v38 = vperm.slane %v4455_v19, 0  ;;  %v724_v40 = vperm.slane %v4464_v26, 1 }
  0x2b   :  { %258 = vperm.xlu0 %3799, %v253_v9   ;;  %v396_v41 = vperm.slane %v4455_v19, 4  ;;  %v409_v43 = vperm.slane %v4455_v19, 5  ;;  %v435_v46 = vperm.slane %v4455_v19, 7  ;;  %v776_v63 = vperm.slane %v4464_v26, 5  ;;  %1252 = vmatpush.msra.mxu2 %v1241_v61  ;;  %v1223_v61 = vld [vmem:[#allocation3 + $0x30] sm:$0xff] }
  0x2c   :  { %1281 = vmatpush.msra.mxu3 %v1242_v62  ;;  %v737_v3 = vperm.slane %v4464_v26, 2  ;;  %v711_v25 = vperm.slane %v4464_v26, 0  ;;  %v1224_v62 = vld [vmem:[#allocation3 + $0x38] sm:$0xff] }
  0x2d   :  { %1253 = vmatpush.msra.mxu2 %v1239_v0 }
  0x2e   :  { %1282 = vmatpush.msra.mxu3 %v1240_v2 }
  0x2f   :  { %1254 = vmatpush.msra.mxu2 %v1237_v6 }
  0x30   :  { %3756 = vmatmul.msk.f32.gmra.mxu0 %vm160_vm2, %v151_v18  ;;  %1283 = vmatpush.msra.mxu3 %v1238_v7  ;;  %v1221_v7 = vld [vmem:[#allocation3 + $0x20] sm:$0xff] }
  0x31   :  { %3761 = vmatmul.msk.f32.gmra.mxu1 %vm160_vm2, %v151_v18 }
  0x32   :  { %3801 = vset.pattern.permute.xlu1 %v4446_v16  ;;  %3803 = vset.pattern.permute.xlu2 %v4446_v16 }
  0x33   :  { %297 = vperm.xlu0 %3799, %v292_v17  }
  0x38   :  { %3757 = vmatmul.msk.f32.gmra.mxu0 %vm160_vm2, %v152_v37 }
  0x39   :  { %3762 = vmatmul.msk.f32.gmra.mxu1 %vm160_vm2, %v152_v37 }
  0x3a   :  { %277 = vperm.xlu1 %3801, %v266_v8   ;;  %251 = vperm.xlu2 %3803, %v240_v10   ;;  %v1236_v10 = vld [vmem:[#allocation3 + $0x98] sm:$0xff] }
  0x3b   :  { %375 = vperm.xlu0 %3799, %v370_v20   ;;  %1284 = vmatpush.msra.mxu3 %v1236_v10 }
  0x40   :  { %3758 = vmatmul.msk.f32.gmra.mxu0 %vm160_vm2, %v153_v39 }
  0x41   :  { %3763 = vmatmul.msk.f32.gmra.mxu1 %vm160_vm2, %v153_v39  ;;  %v1228_v39 = vld [vmem:[#allocation3 + $0x58] sm:$0xff] }
  0x42   :  { %3804 = vset.pattern.permute.xlu1 %v4422_v1  ;;  %290 = vperm.xlu2 %3803, %v279_v24  }
  0x43   :  { %427 = vperm.xlu0 %3799, %v422_v23  }
  0x4a   :  { %284 = vperm.xlu1 %3804, %v279_v24   ;;  %3806 = vset.pattern.permute.xlu2 %v4422_v1  ;;  %v1232_v24 = vld [vmem:[#allocation3 + $0x78] sm:$0xff] }
  0x4b   :  { %755 = vperm.xlu0 %3799, %v750_v28  }
  0x52   :  { %3805 = vset.pattern.permute.xlu1 %v4446_v16  ;;  %310 = vperm.xlu2 %3806, %v305_v31  }
  0x53   :  { %833 = vperm.xlu0 %3799, %v828_v30  }
  0x5a   :  { %303 = vperm.xlu1 %3805, %v292_v17   ;;  %323 = vperm.xlu2 %3806, %v318_v33   ;;  %v1234_v17 = vld [vmem:[#allocation3 + $0x88] sm:$0xff] }
  0x5b   :  { %885 = vperm.xlu0 %3799, %v6360_v32   ;;  %1285 = vmatpush.msra.mxu3 %v1234_v17 }
  0x5d   :  { %1286 = vmatpush.msra.mxu3 %v1232_v24 }
  0x62   :  { %316 = vperm.xlu1 %3805, %v305_v31   ;;  %3808 = vset.pattern.permute.xlu2 %v4446_v16 }
  0x63   :  { %3825 = vset.pattern.permute.xlu0 %v4446_v16 }
  0x6a   :  { %3807 = vset.pattern.permute.xlu1 %v4422_v1  ;;  %342 = vperm.xlu2 %3808, %v331_v34  }
  0x6b   :  { %264 = vperm.xlu0 %3825, %v253_v9   ;;  %v1235_v9 = vld [vmem:[#allocation3 + $0x90] sm:$0xff] }
  0x6c   :  { %1255 = vmatpush.msra.mxu2 %v1235_v9  ;;  %v1222_v9 = vld [vmem:[#allocation3 + $0x28] sm:$0xff] }
  0x6e   :  { %1256 = vmatpush.msra.mxu2 %v1233_v15  ;;  %v1220_v15 = vld [vmem:[#allocation3 + $0x18] sm:$0xff] }
  0x72   :  { %336 = vperm.xlu1 %3807, %v331_v34   ;;  %368 = vperm.xlu2 %3808, %v357_v35  }
  0x73   :  { %329 = vperm.xlu0 %3825, %v318_v33  }
  0x7a   :  { %362 = vperm.xlu1 %3807, %v357_v35   ;;  %3810 = vset.pattern.permute.xlu2 %v4422_v1  ;;  %v1229_v35 = vld [vmem:[#allocation3 + $0x60] sm:$0xff] }
  0x7b   :  { %394 = vperm.xlu0 %3825, %v383_v36  }
  0x82   :  { %3809 = vset.pattern.permute.xlu1 %v4446_v16  ;;  %349 = vperm.xlu2 %3810, %v344_v38  }
  0x83   :  { %735 = vperm.xlu0 %3825, %v724_v40  }
  0x84   :  { %v4516_v48 = vpop.permute.xlu2 %245 }
  0x85   :  { %6522 = vst [vmem:[#allocation24_spill] sm:$0xff] %v4516_v48 }
  0x8a   :  { %381 = vperm.xlu1 %3809, %v370_v20   ;;  %388 = vperm.xlu2 %3810, %v383_v36   ;;  %v1230_v36 = vld [vmem:[#allocation3 + $0x68] sm:$0xff] }
  0x8b   :  { %787 = vperm.xlu0 %3825, %v776_v63   ;;  %1287 = vmatpush.msra.mxu3 %v1230_v36  ;;  %v4586_v36 = vld [vmem:[%s6358_s9] ss:$0 sm:$0xff] }
  0x8d   :  { %1288 = vmatpush.msra.mxu3 %v1228_v39 }
  0x8f   :  { %1289 = vmatpush.msra.mxu3 %v1226_v56 }
  0x91   :  { %1290 = vmatpush.msra.mxu3 %v1224_v62 }
  0x92   :  { %355 = vperm.xlu1 %3809, %v344_v38   ;;  %3812 = vset.pattern.permute.xlu2 %v4446_v16  ;;  %v1227_v38 = vld [vmem:[#allocation3 + $0x50] sm:$0xff] }
  0x93   :  { %1291 = vmatpush.msra.mxu3 %v1222_v9 }
  0x94   :  { %v4526_v52 = vpop.permute.xlu2 %251 }
  0x95   :  { %1292 = vmatpush.msra.mxu3 %v1220_v15 }
  0x9a   :  { %3811 = vset.pattern.permute.xlu1 %v4422_v1  ;;  %407 = vperm.xlu2 %3812, %v396_v41  }
  0x9c   :  { %v4514_v47 = vpop.permute.xlu1 %271  ;;  %v4539_v5 = vpop.permute.xlu2 %290 }
  0x9d   :  { %v4504_v42 = vpop.permute.xlu0 %258  ;;  %6521 = vst [vmem:[#allocation23_spill] sm:$0xff] %v4514_v47 }
  0x9e   :  { %6518 = vst [vmem:[#allocation20_spill] sm:$0xff] %v4504_v42 }
  0x9f   :  { %6527 = vst [vmem:[#allocation29_spill] sm:$0xff] %v4539_v5 }
  0xa2   :  { %401 = vperm.xlu1 %3811, %v396_v41   ;;  %420 = vperm.xlu2 %3812, %v409_v43  }
  0xa5   :  { %v4507_v44 = vpop.permute.xlu0 %297  ;;  %v4524_v51 = vpop.f32.mrf.mxu0 }
  0xa6   :  { %6519 = vst [vmem:[#allocation21_spill] sm:$0xff] %v4507_v44  ;;  %v448_v18 = vadd.f32 %v4516_v48, %v4524_v51  ;;  %v452_v19 = vadd.f32 %v4514_v47, %v4524_v51  ;;  %v456_v20 = vadd.f32 %v4507_v44, %v4524_v51 }
  0xaa   :  { %414 = vperm.xlu1 %3811, %v409_v43   ;;  %3814 = vset.pattern.permute.xlu2 %v4422_v1 }
  0xac   :  { %v4522_v50 = vpop.permute.xlu1 %277  ;;  %v4563_v34 = vpop.permute.xlu2 %310 }
  0xad   :  { %v4510_v45 = vpop.permute.xlu0 %375  ;;  %6524 = vst [vmem:[#allocation26_spill] sm:$0xff] %v4522_v50  ;;  %v4537_v4 = vpop.f32.mrf.mxu0  ;;  %v458_v57 = vadd.f32 %v4563_v34, %v4524_v51 }
  0xae   :  { %6520 = vst [vmem:[#allocation22_spill] sm:$0xff] %v4510_v45  ;;  %v449_v11 = vadd.f32 %v4526_v52, %v4537_v4  ;;  %v453_v12 = vadd.f32 %v4522_v50, %v4537_v4  ;;  %v455_v21 = vadd.f32 %v4539_v5, %v4537_v4 }
  0xaf   :  { %6530 = vst [vmem:[#allocation32_spill] sm:$0xff] %v4563_v34 }
  0xb0   :  { %v480_v27 = vmax.f32 %v448_v18, %v449_v11  ;;  %v494_v31 = vmax.f32 %v452_v19, %v453_v12 }
  0xb2   :  { %3813 = vset.pattern.permute.xlu1 %v4446_v16  ;;  %440 = vperm.xlu2 %3814, %v435_v46   ;;  %v481_v41 = vrot.slane %v480_v27, 4  ;;  %v495_v43 = vrot.slane %v494_v31, 4 }
  0xb4   :  { %v482_v2 = vmax.f32 %v480_v27, %v481_v41  ;;  %v4573_v12 = vpop.permute.xlu2 %323 }
  0xb5   :  { %v4518_v49 = vpop.permute.xlu0 %427  ;;  %6533 = vst [vmem:[#allocation35_spill] sm:$0xff] %v4573_v12  ;;  %v460_v9 = vadd.f32 %v4573_v12, %v4524_v51 }
  0xb6   :  { %6523 = vst [vmem:[#allocation25_spill] sm:$0xff] %v4518_v49  ;;  %v483_v17 = vrot.slane %v482_v2, 2 }
  0xba   :  { %433 = vperm.xlu1 %3813, %v422_v23   ;;  %729 = vperm.xlu2 %3814, %v724_v40   ;;  %v1231_v23 = vld [vmem:[#allocation3 + $0x70] sm:$0xff] }
  0xbb   :  { %1257 = vmatpush.msra.mxu2 %v1231_v23 }
  0xbc   :  { %v4531_v60 = vpop.permute.xlu1 %284 }
  0xbd   :  { %v4528_v55 = vpop.permute.xlu0 %755  ;;  %6526 = vst [vmem:[#allocation28_spill] sm:$0xff] %v4531_v60  ;;  %v454_v13 = vadd.f32 %v4531_v60, %v4524_v51  ;;  %1258 = vmatpush.msra.mxu2 %v1229_v35 }
  0xbe   :  { %6525 = vst [vmem:[#allocation27_spill] sm:$0xff] %v4528_v55 }
  0xbf   :  { %v501_v33 = vmax.f32 %v454_v13, %v455_v21  ;;  %1259 = vmatpush.msra.mxu2 %v1227_v38  ;;  %v1219_v13 = vld [vmem:[#allocation3 + $0x10] sm:$0xff]  ;;  %v1217_v21 = vld [vmem:[#allocation3] sm:$0xff] }
  0xc1   :  { %1260 = vmatpush.msra.mxu2 %v1225_v54 }
  0xc2   :  { %446 = vperm.xlu1 %3813, %v435_v46   ;;  %3816 = vset.pattern.permute.xlu2 %v4446_v16  ;;  %v502_v46 = vrot.slane %v501_v33, 4 }
  0xc3   :  { %1261 = vmatpush.msra.mxu2 %v1223_v61 }
  0xc4   :  { %v503_v6 = vmax.f32 %v501_v33, %v502_v46  ;;  %v484_v33 = vmax.f32 %v482_v2, %v483_v17  ;;  %v4588_v54 = vpop.permute.xlu2 %342 }
  0xc5   :  { %v4541_v8 = vpop.permute.xlu0 %833  ;;  %1262 = vmatpush.msra.mxu2 %v1221_v7  ;;  %6534 = vst [vmem:[#allocation36_spill] sm:$0xff] %v4588_v54 }
  0xc6   :  { %6528 = vst [vmem:[#allocation30_spill] sm:$0xff] %v4541_v8  ;;  %v504_v19 = vrot.slane %v503_v6, 2 }
  0xc7   :  { %1263 = vmatpush.msra.mxu2 %v1219_v13 }
  0xc8   :  { %v505_v38 = vmax.f32 %v503_v6, %v504_v19 }
  0xc9   :  { %1264 = vmatpush.msra.mxu2 %v1217_v21 }
  0xca   :  { %3815 = vset.pattern.permute.xlu1 %v4422_v1  ;;  %748 = vperm.xlu2 %3816, %v737_v3   ;;  %v506_v61 = vrot.slane %v505_v38, 1 }
  0xcc   :  { %v4550_v14 = vpop.permute.xlu1 %303 }
  0xcd   :  { %6529 = vst [vmem:[#allocation31_spill] sm:$0xff] %v4550_v14  ;;  %v457_v22 = vadd.f32 %v4550_v14, %v4537_v4  ;;  %v4565_v40 = vpop.permute.xlu0 %885 }
  0xce   :  { %6531 = vst [vmem:[#allocation33_spill] sm:$0xff] %v4565_v40 }
  0xcf   :  { %v508_v37 = vmax.f32 %v456_v20, %v457_v22  ;;  %v450_v20 = vadd.f32 %v4504_v42, %v4524_v51  ;;  %v1218_v22 = vld [vmem:[#allocation3 + $0x8] sm:$0xff] }
  0xd0   :  { %1293 = vmatpush.msra.mxu3 %v1218_v22 }
  0xd1   :  { %v509_v59 = vrot.slane %v508_v37, 4 }
  0xd2   :  { %742 = vperm.xlu1 %3815, %v737_v3   ;;  %722 = vperm.xlu2 %3816, %v711_v25   ;;  %v496_v3 = vmax.f32 %v494_v31, %v495_v43  ;;  %v763_v31 = vperm.slane %v4464_v26, 4 }
  0xd3   :  { %v510_v11 = vmax.f32 %v508_v37, %v509_v59  ;;  %v224_v37 = vpop.f32.mrf.mxu1 }
  0xd4   :  { %v4567_v53 = vpop.permute.xlu1 %316  ;;  %v497_v18 = vrot.slane %v496_v3, 2  ;;  %v4592_v56 = vadd.f32 %v224_v37, %v4586_v36 }
  0xd5   :  { %6532 = vst [vmem:[#allocation34_spill] sm:$0xff] %v4567_v53  ;;  %v459_v58 = vadd.f32 %v4567_v53, %v4537_v4 }
  0xd6   :  { %v498_v35 = vmax.f32 %v496_v3, %v497_v18  ;;  %v595_v18 = vrot.slane %v4592_v56, 2  ;;  %v596_v19 = vrot.slane %v4592_v56, 3 }
  0xd7   :  { %v515_v0 = vmax.f32 %v458_v57, %v459_v58  ;;  %v463_v57 = vadd.f32 %v4588_v54, %v4537_v4  ;;  %v485_v58 = vrot.slane %v484_v33, 1 }
  0xd8   :  { %v499_v59 = vrot.slane %v498_v35, 1 }
  0xd9   :  { %v516_v10 = vrot.slane %v515_v0, 4  ;;  %v486_v15 = vmax.f32 %v484_v33, %v485_v58 }
  0xda   :  { %716 = vperm.xlu1 %3815, %v711_v25   ;;  %3818 = vset.pattern.permute.xlu2 %v4422_v1  ;;  %v511_v25 = vrot.slane %v510_v11, 2  ;;  %v500_v17 = vmax.f32 %v498_v35, %v499_v59 }
  0xdb   :  { %v517_v23 = vmax.f32 %v515_v0, %v516_v10  ;;  %v624_v35 = vadd.f32 %v486_v15, %v4592_v56  ;;  %v599_v15 = vrot.slane %v4592_v56, 6 }
  0xdc   :  { %v512_v43 = vmax.f32 %v510_v11, %v511_v25 }
  0xdd   :  { %v4578_v24 = vpop.permute.xlu0 %264  ;;  %v518_v41 = vrot.slane %v517_v23, 2 }
  0xde   :  { %v451_v27 = vadd.f32 %v4578_v24, %v4537_v4  ;;  %v513_v7 = vrot.slane %v512_v43, 1 }
  0xdf   :  { %v519_v2 = vmax.f32 %v517_v23, %v518_v41  ;;  %v597_v23 = vrot.slane %v4592_v56, 4 }
  0xe0   :  { %v487_v39 = vmax.f32 %v450_v20, %v451_v27  ;;  %v507_v20 = vmax.f32 %v505_v38, %v506_v61  ;;  %v514_v37 = vmax.f32 %v512_v43, %v513_v7  ;;  %v626_v38 = vadd.f32 %v595_v18, %v500_v17 }
  0xe1   :  { %v520_v25 = vrot.slane %v519_v2, 1  ;;  %v598_v43 = vrot.slane %v4592_v56, 5  ;;  %v600_v17 = vrot.slane %v4592_v56, 7 }
  0xe2   :  { %v488_v46 = vrot.slane %v487_v39, 4  ;;  %3817 = vset.pattern.permute.xlu1 %v4446_v16  ;;  %768 = vperm.xlu2 %3818, %v763_v31  }
  0xe3   :  { %v521_v61 = vmax.f32 %v519_v2, %v520_v25 }
  0xe4   :  { %v489_v62 = vmax.f32 %v487_v39, %v488_v46  ;;  %v4598_v0 = vpop.permute.xlu1 %336  ;;  %v594_v39 = vrot.slane %v4592_v56, 1 }
  0xe5   :  { %6535 = vst [vmem:[#allocation37_spill] sm:$0xff] %v4598_v0  ;;  %v462_v3 = vadd.f32 %v4598_v0, %v4524_v51  ;;  %v4602_v6 = vpop.permute.xlu0 %329  ;;  %v629_v18 = vadd.f32 %v598_v43, %v521_v61 }
  0xe6   :  { %6536 = vst [vmem:[#allocation38_spill] sm:$0xff] %v4602_v6  ;;  %v490_v10 = vrot.slane %v489_v62, 2  ;;  %v461_v11 = vadd.f32 %v4602_v6, %v4537_v4 }
  0xe7   :  { %v529_v13 = vmax.f32 %v462_v3, %v463_v57  ;;  %v627_v57 = vadd.f32 %v596_v19, %v507_v20  ;;  %v628_v3 = vadd.f32 %v597_v23, %v514_v37 }
  0xe8   :  { %v491_v21 = vmax.f32 %v489_v62, %v490_v10  ;;  %v522_v22 = vmax.f32 %v460_v9, %v461_v11  ;;  %v640_v11 = vmax.f32 %v624_v35, 0.0 }
  0xe9   :  { %v530_v27 = vrot.slane %v529_v13, 4  ;;  %v644_v2 = vmax.f32 %v628_v3, 0.0 }
  0xea   :  { %v492_v41 = vrot.slane %v491_v21, 1  ;;  %v523_v46 = vrot.slane %v522_v22, 4  ;;  %761 = vperm.xlu1 %3817, %v750_v28   ;;  %781 = vperm.xlu2 %3818, %v776_v63   ;;  %v642_v28 = vmax.f32 %v626_v38, 0.0  ;;  %v789_v38 = vperm.slane %v4464_v26, 6 }
  0xeb   :  { %v531_v33 = vmax.f32 %v529_v13, %v530_v27  ;;  %v643_v13 = vmax.f32 %v627_v57, 0.0 }
  0xec   :  { %v493_v58 = vmax.f32 %v491_v21, %v492_v41  ;;  %v524_v59 = vmax.f32 %v522_v22, %v523_v46  ;;  %v675_v22 = vrot.slane %v642_v28, 6  ;;  %v645_v41 = vmax.f32 %v629_v18, 0.0  ;;  %v4631_v43 = vpop.permute.xlu1 %362 }
  0xed   :  { %v532_v62 = vrot.slane %v531_v33, 2  ;;  %v678_v23 = vrot.slane %v643_v13, 5  ;;  %6538 = vst [vmem:[#allocation40_spill] sm:$0xff] %v4631_v43 }
  0xee   :  { %v625_v7 = vadd.f32 %v594_v39, %v493_v58  ;;  %v525_v9 = vrot.slane %v524_v59, 2  ;;  %v815_v39 = vperm.slane %v4470_v29, 0  ;;  %v4628_v58 = vpop.permute.xlu2 %368  ;;  %v684_v61 = vrot.slane %v645_v41, 3 }
  0xef   :  { %v533_v10 = vmax.f32 %v531_v33, %v532_v62  ;;  %v681_v33 = vrot.slane %v644_v2, 4  ;;  %6537 = vst [vmem:[#allocation39_spill] sm:$0xff] %v4628_v58  ;;  %v466_v2 = vadd.f32 %v4631_v43, %v4524_v51 }
  0xf0   :  { %v641_v27 = vmax.f32 %v625_v7, 0.0  ;;  %v526_v32 = vmax.f32 %v524_v59, %v525_v9  ;;  %826 = vperm.xlu0 %3825, %v815_v39  }
  0xf1   :  { %v534_v63 = vrot.slane %v533_v10, 1 }
  0xf2   :  { %v672_v19 = vrot.slane %v641_v27, 7  ;;  %v527_v20 = vrot.slane %v526_v32, 1  ;;  %774 = vperm.xlu1 %3817, %v763_v31   ;;  %3820 = vset.pattern.permute.xlu2 %v4446_v16  ;;  %v6361_v27 = vperm.slane %v4470_v29, 7 }
  0xf3   :  { %v535_v21 = vmax.f32 %v533_v10, %v534_v63 }
  0xf4   :  { %v528_v25 = vmax.f32 %v526_v32, %v527_v20  ;;  %v674_v37 = vsel %vm673_vm6, %v672_v19, %v640_v11  ;;  %v802_v11 = vperm.slane %v4464_v26, 7  ;;  %v841_v26 = vperm.slane %v4470_v29, 2  ;;  %v4664_v20 = vpop.permute.xlu0 %394 }
  0xf5   :  { %v631_v56 = vadd.f32 %v600_v17, %v535_v21  ;;  %v677_v46 = vsel %vm676_vm7, %v675_v22, %v674_v37  ;;  %v467_v19 = vadd.f32 %v4628_v58, %v4537_v4  ;;  %6545 = vst [vmem:[#allocation47_spill] sm:$0xff] %v4664_v20  ;;  %v468_v22 = vadd.f32 %v4510_v45, %v4524_v51 }
  0xf6   :  { %v630_v35 = vadd.f32 %v599_v15, %v528_v25  ;;  %v680_v31 = vsel %vm679_vm8, %v678_v23, %v677_v46  ;;  %v4642_v28 = vpop.permute.xlu2 %349 }
  0xf7   :  { %v647_v57 = vmax.f32 %v631_v56, 0.0  ;;  %v683_v59 = vsel %vm682_vm9, %v681_v33, %v680_v31  ;;  %6539 = vst [vmem:[#allocation41_spill] sm:$0xff] %v4642_v28  ;;  %v543_v25 = vmax.f32 %v466_v2, %v467_v19  ;;  %v464_v37 = vadd.f32 %v4642_v28, %v4524_v51 }
  0xf8   :  { %v646_v32 = vmax.f32 %v630_v35, 0.0  ;;  %v686_v7 = vsel %vm685_vm10, %v684_v61, %v683_v59  ;;  %917 = vperm.xlu0 %3825, %v6361_v27   ;;  %v471_v56 = vadd.f32 %v4664_v20, %v4537_v4 }
  0xf9   :  { %v690_v62 = vrot.slane %v647_v57, 1  ;;  %v544_v57 = vrot.slane %v543_v25, 4 }
  0xfa   :  { %3819 = vset.pattern.permute.xlu1 %v4422_v1  ;;  %v687_v3 = vrot.slane %v646_v32, 2  ;;  %800 = vperm.xlu2 %3820, %v789_v38  }
  0xfc   :  { %v689_v9 = vsel %vm688_vm11, %v687_v3, %v686_v7  ;;  %v4644_v13 = vpop.permute.xlu1 %381 }
  0xfd   :  { %v4637_v10 = vsel %vm691_vm12, %v690_v62, %v689_v9  ;;  %6540 = vst [vmem:[#allocation42_spill] sm:$0xff] %v4644_v13  ;;  %v469_v23 = vadd.f32 %v4644_v13, %v4537_v4  ;;  %v545_v9 = vmax.f32 %v543_v25, %v544_v57 }
  0xfe   :  { %1265 = vmatmul.f32.vlgmr.msra.gmra.mxu2 %v4637_v10  ;;  %1294 = vmatmul.f32.vlgmr.msra.gmra.mxu3 %v4637_v10  ;;  %v4649_v63 = vpop.permute.xlu2 %388 }
  0xff   :  { %6541 = vst [vmem:[#allocation43_spill] sm:$0xff] %v4649_v63  ;;  %v470_v41 = vadd.f32 %v4649_v63, %v4524_v51  ;;  %v546_v27 = vrot.slane %v545_v9, 2 }
 0x101   :  { %v557_v59 = vmax.f32 %v470_v41, %v471_v56  ;;  %v547_v25 = vmax.f32 %v545_v9, %v546_v27  ;;  %v867_v27 = vperm.slane %v4470_v29, 4 }
 0x102   :  { %794 = vperm.xlu1 %3819, %v789_v38   ;;  %813 = vperm.xlu2 %3820, %v802_v11   ;;  %v550_v38 = vmax.f32 %v468_v22, %v469_v23  ;;  %v854_v22 = vperm.slane %v4470_v29, 3 }
 0x104   :  { %v4652_v15 = vpop.permute.xlu1 %355  ;;  %v551_v7 = vrot.slane %v550_v38, 4 }
 0x105   :  { %6542 = vst [vmem:[#allocation44_spill] sm:$0xff] %v4652_v15  ;;  %v465_v21 = vadd.f32 %v4652_v15, %v4537_v4 }
 0x106   :  { %v4655_v17 = vpop.permute.xlu2 %407 }
 0x107   :  { %6543 = vst [vmem:[#allocation45_spill] sm:$0xff] %v4655_v17  ;;  %v473_v46 = vadd.f32 %v4655_v17, %v4537_v4  ;;  %v536_v31 = vmax.f32 %v464_v37, %v465_v21  ;;  %v552_v37 = vmax.f32 %v550_v38, %v551_v7 }
 0x109   :  { %v537_v62 = vrot.slane %v536_v31, 4  ;;  %v553_v41 = vrot.slane %v552_v37, 2 }
 0x10a   :  { %807 = vperm.xlu1 %3819, %v802_v11   ;;  %3822 = vset.pattern.permute.xlu2 %v4422_v1  ;;  %v558_v11 = vrot.slane %v557_v59, 4 }
 0x10b   :  { %v538_v19 = vmax.f32 %v536_v31, %v537_v62  ;;  %v227_v31 = vpop.f32.mrf.mxu1  ;;  %v548_v62 = vrot.slane %v547_v25, 1 }
 0x10c   :  { %v559_v23 = vmax.f32 %v557_v59, %v558_v11 }
 0x10e   :  { %v4684_v35 = vpop.permute.xlu2 %420 }
 0x10f   :  { %6546 = vst [vmem:[#allocation48_spill] sm:$0xff] %v4684_v35  ;;  %v475_v32 = vadd.f32 %v4684_v35, %v4537_v4  ;;  %v539_v35 = vrot.slane %v538_v19, 2 }
 0x111   :  { %v540_v57 = vmax.f32 %v538_v19, %v539_v35  ;;  %v549_v35 = vmax.f32 %v547_v25, %v548_v62 }
 0x112   :  { %3821 = vset.pattern.permute.xlu1 %v4446_v16  ;;  %846 = vperm.xlu2 %3822, %v841_v26  }
 0x114   :  { %v4658_v18 = vpop.permute.xlu1 %401 }
 0x115   :  { %6544 = vst [vmem:[#allocation46_spill] sm:$0xff] %v4658_v18  ;;  %v472_v33 = vadd.f32 %v4658_v18, %v4524_v51 }
 0x117   :  { %v564_v61 = vmax.f32 %v472_v33, %v473_v46  ;;  %v4697_v46 = vpop.permute.xlu2 %440  ;;  %v560_v33 = vrot.slane %v559_v23, 2 }
 0x118   :  { %6548 = vst [vmem:[#allocation50_spill] sm:$0xff] %v4697_v46 }
 0x119   :  { %v565_v2 = vrot.slane %v564_v61, 4  ;;  %v561_v9 = vmax.f32 %v559_v23, %v560_v33 }
 0x11a   :  { %839 = vperm.xlu1 %3821, %v828_v30   ;;  %820 = vperm.xlu2 %3822, %v815_v39  }
 0x11b   :  { %v566_v17 = vmax.f32 %v564_v61, %v565_v2  ;;  %v554_v61 = vmax.f32 %v552_v37, %v553_v41  ;;  %v541_v2 = vrot.slane %v540_v57, 1  ;;  %v562_v37 = vrot.slane %v561_v9, 1 }
 0x11c   :  { %v4686_v30 = vpop.permute.xlu1 %414 }
 0x11d   :  { %6547 = vst [vmem:[#allocation49_spill] sm:$0xff] %v4686_v30  ;;  %v474_v39 = vadd.f32 %v4686_v30, %v4524_v51  ;;  %v555_v13 = vrot.slane %v554_v61, 1 }
 0x11f   :  { %v571_v3 = vmax.f32 %v474_v39, %v475_v32  ;;  %v567_v39 = vrot.slane %v566_v17, 2  ;;  %v556_v25 = vmax.f32 %v554_v61, %v555_v13 }
 0x121   :  { %v572_v21 = vrot.slane %v571_v3, 4  ;;  %v568_v11 = vmax.f32 %v566_v17, %v567_v39  ;;  %v4712_v17 = vpop.permute.xlu2 %729 }
 0x122   :  { %852 = vperm.xlu1 %3821, %v841_v26   ;;  %3824 = vset.pattern.permute.xlu2 %v4446_v16  ;;  %v476_v26 = vadd.f32 %v4518_v49, %v4524_v51  ;;  %6550 = vst [vmem:[#allocation52_spill] sm:$0xff] %v4712_v17 }
 0x123   :  { %v573_v56 = vmax.f32 %v571_v3, %v572_v21  ;;  %v4704_v3 = vadd.f32 %v227_v31, %v4586_v36  ;;  %v569_v41 = vrot.slane %v568_v11, 1  ;;  %v478_v31 = vadd.f32 %v4697_v46, %v4524_v51 }
 0x125   :  { %v574_v32 = vrot.slane %v573_v56, 2  ;;  %v604_v51 = vrot.slane %v4704_v3, 4  ;;  %v570_v58 = vmax.f32 %v568_v11, %v569_v41  ;;  %v606_v13 = vrot.slane %v4704_v3, 6 }
 0x127   :  { %v575_v21 = vmax.f32 %v573_v56, %v574_v32  ;;  %v603_v32 = vrot.slane %v4704_v3, 3 }
 0x129   :  { %v576_v23 = vrot.slane %v575_v21, 1  ;;  %v4723_v41 = vpop.permute.xlu2 %748 }
 0x12a   :  { %3823 = vset.pattern.permute.xlu1 %v4422_v1  ;;  %865 = vperm.xlu2 %3824, %v854_v22   ;;  %6551 = vst [vmem:[#allocation53_spill] sm:$0xff] %v4723_v41 }
 0x12b   :  { %v577_v15 = vmax.f32 %v575_v21, %v576_v23 }
 0x12c   :  { %v4699_v38 = vpop.permute.xlu1 %433 }
 0x12d   :  { %6549 = vst [vmem:[#allocation51_spill] sm:$0xff] %v4699_v38  ;;  %v477_v59 = vadd.f32 %v4699_v38, %v4537_v4  ;;  %v601_v38 = vrot.slane %v4704_v3, 1 }
 0x12f   :  { %v578_v7 = vmax.f32 %v476_v26, %v477_v59  ;;  %v542_v59 = vmax.f32 %v540_v57, %v541_v2  ;;  %v633_v62 = vadd.f32 %v601_v38, %v549_v35  ;;  %v605_v57 = vrot.slane %v4704_v3, 5 }
 0x131   :  { %v579_v20 = vrot.slane %v578_v7, 4  ;;  %v632_v2 = vadd.f32 %v542_v59, %v4704_v3  ;;  %v649_v38 = vmax.f32 %v633_v62, 0.0 }
 0x132   :  { %859 = vperm.xlu1 %3823, %v854_v22   ;;  %878 = vperm.xlu2 %3824, %v867_v27  }
 0x133   :  { %v580_v19 = vmax.f32 %v578_v7, %v579_v20  ;;  %v602_v20 = vrot.slane %v4704_v3, 2  ;;  %v563_v7 = vmax.f32 %v561_v9, %v562_v37  ;;  %v636_v9 = vadd.f32 %v604_v51, %v570_v58 }
 0x134   :  { %v4710_v26 = vpop.permute.xlu1 %446  ;;  %v648_v37 = vmax.f32 %v632_v2, 0.0  ;;  %v4730_v2 = vpop.permute.xlu2 %722 }
 0x135   :  { %v581_v56 = vrot.slane %v580_v19, 2  ;;  %v479_v22 = vadd.f32 %v4710_v26, %v4537_v4  ;;  %v634_v4 = vadd.f32 %v602_v20, %v556_v25  ;;  %v635_v35 = vadd.f32 %v603_v32, %v563_v7  ;;  %6552 = vst [vmem:[#allocation54_spill] sm:$0xff] %v4730_v2 }
 0x137   :  { %v582_v33 = vmax.f32 %v580_v19, %v581_v56  ;;  %v585_v39 = vmax.f32 %v478_v31, %v479_v22  ;;  %v637_v31 = vadd.f32 %v605_v57, %v577_v15  ;;  %v650_v59 = vmax.f32 %v634_v4, 0.0 }
 0x138   :  { %v893_v56 = vperm.slane %v4470_v29, 6  ;;  %v652_v22 = vmax.f32 %v636_v9, 0.0  ;;  %v651_v20 = vmax.f32 %v635_v35, 0.0  ;;  %v6555_v35 = vperm.slane %v4470_v29, 7 }
 0x139   :  { %v583_v54 = vrot.slane %v582_v33, 1  ;;  %v586_v6 = vrot.slane %v585_v39, 4  ;;  %v695_v25 = vrot.slane %v650_v59, 6 }
 0x13a   :  { %872 = vperm.xlu1 %3823, %v867_v27   ;;  %3827 = vset.pattern.permute.xlu2 %v4422_v1  ;;  %v693_v27 = vrot.slane %v649_v38, 7  ;;  %v653_v1 = vmax.f32 %v637_v31, 0.0  ;;  %v697_v7 = vrot.slane %v651_v20, 5  ;;  %v6554_v38 = vperm.slane %v4470_v29, 5  ;;  %v4749_v31 = vpop.f32.mrf.mxu0  ;;  %v4757_v29 = vpop.permute.xlu0 %735 }
 0x13b   :  { %v584_v61 = vmax.f32 %v582_v33, %v583_v54  ;;  %v587_v19 = vmax.f32 %v585_v39, %v586_v6  ;;  %v607_v6 = vrot.slane %v4704_v3, 7  ;;  %v699_v39 = vrot.slane %v652_v22, 4  ;;  %6559 = vst [vmem:[#allocation59_spill] sm:$0xff] %v4757_v29 }
 0x13c   :  { %v694_v58 = vsel %vm673_vm6, %v693_v27, %v648_v37  ;;  %v701_v51 = vrot.slane %v653_v1, 3  ;;  %v921_v20 = vadd.f32 %v4712_v17, %v4749_v31 }
 0x13d   :  { %v588_v11 = vrot.slane %v587_v19, 2  ;;  %v638_v21 = vadd.f32 %v606_v13, %v584_v61  ;;  %v696_v32 = vsel %vm676_vm7, %v695_v25, %v694_v58 }
 0x13e   :  { %v698_v3 = vsel %vm679_vm8, %v697_v7, %v696_v32 }
 0x13f   :  { %v589_v23 = vmax.f32 %v587_v19, %v588_v11  ;;  %v654_v33 = vmax.f32 %v638_v21, 0.0  ;;  %v700_v13 = vsel %vm682_vm9, %v699_v39, %v698_v3  ;;  %v4747_v11 = vpop.permute.xlu2 %768 }
 0x140   :  { %v702_v61 = vsel %vm685_vm10, %v701_v51, %v700_v13  ;;  %6556 = vst [vmem:[#allocation56_spill] sm:$0xff] %v4747_v11  ;;  %v927_v7 = vadd.f32 %v4747_v11, %v4749_v31 }
 0x141   :  { %v590_v54 = vrot.slane %v589_v23, 1  ;;  %v703_v57 = vrot.slane %v654_v33, 2 }
 0x142   :  { %3826 = vset.pattern.permute.xlu1 %v4446_v16  ;;  %898 = vperm.xlu2 %3827, %v893_v56   ;;  %v4779_v32 = vpop.permute.xlu0 %787 }
 0x143   :  { %v591_v15 = vmax.f32 %v589_v23, %v590_v54  ;;  %v704_v9 = vsel %vm688_vm11, %v703_v57, %v702_v61  ;;  %v4755_v23 = vpop.f32.mrf.mxu0  ;;  %6562 = vst [vmem:[#allocation62_spill] sm:$0xff] %v4779_v32 }
 0x144   :  { %v4735_v19 = vpop.permute.xlu1 %742  ;;  %v922_v22 = vadd.f32 %v4757_v29, %v4755_v23  ;;  %v924_v58 = vadd.f32 %v4723_v41, %v4755_v23  ;;  %v920_v33 = vadd.f32 %v4730_v2, %v4755_v23  ;;  %v930_v13 = vadd.f32 %v4779_v32, %v4755_v23 }
 0x145   :  { %v639_v62 = vadd.f32 %v607_v6, %v591_v15  ;;  %6553 = vst [vmem:[#allocation55_spill] sm:$0xff] %v4735_v19  ;;  %v923_v25 = vadd.f32 %v4735_v19, %v4749_v31  ;;  %v925_v15 = vadd.f32 %v4528_v55, %v4749_v31 }
 0x146   :  { %v958_v1 = vmax.f32 %v921_v20, %v922_v22 }
 0x147   :  { %v655_v4 = vmax.f32 %v639_v62, 0.0  ;;  %v4753_v21 = vpop.permute.xlu2 %781  ;;  %v965_v3 = vmax.f32 %v923_v25, %v924_v58 }
 0x148   :  { %6558 = vst [vmem:[#allocation58_spill] sm:$0xff] %v4753_v21  ;;  %v929_v61 = vadd.f32 %v4753_v21, %v4749_v31 }
 0x149   :  { %v705_v16 = vrot.slane %v655_v4, 1  ;;  %v959_v4 = vrot.slane %v958_v1, 4  ;;  %v966_v22 = vrot.slane %v965_v3, 4 }
 0x14a   :  { %891 = vperm.xlu1 %3826, %v6554_v38   ;;  %911 = vperm.xlu2 %3827, %v6555_v35  }
 0x14b   :  { %v4743_v37 = vsel %vm691_vm12, %v705_v16, %v704_v9  ;;  %v960_v35 = vmax.f32 %v958_v1, %v959_v4 }
 0x14c   :  { %1268 = vmatmul.f32.gmra.mxu2 %v4743_v37  ;;  %1297 = vmatmul.f32.gmra.mxu3 %v4743_v37  ;;  %v4751_v59 = vpop.permute.xlu1 %716 }
 0x14d   :  { %6557 = vst [vmem:[#allocation57_spill] sm:$0xff] %v4751_v59  ;;  %v919_v54 = vadd.f32 %v4751_v59, %v4749_v31 }
 0x14f   :  { %v951_v39 = vmax.f32 %v919_v54, %v920_v33  ;;  %v986_v54 = vmax.f32 %v929_v61, %v930_v13 }
 0x151   :  { %v952_v38 = vrot.slane %v951_v39, 4  ;;  %v987_v25 = vrot.slane %v986_v54, 4 }
 0x152   :  { %904 = vperm.xlu1 %3826, %v893_v56  }
 0x154   :  { %v4769_v6 = vpop.permute.xlu2 %800 }
 0x155   :  { %6561 = vst [vmem:[#allocation61_spill] sm:$0xff] %v4769_v6  ;;  %v932_v1 = vadd.f32 %v4769_v6, %v4755_v23 }
 0x15c   :  { %v4759_v27 = vpop.permute.xlu1 %761  ;;  %v4791_v33 = vpop.permute.xlu2 %813 }
 0x15d   :  { %6560 = vst [vmem:[#allocation60_spill] sm:$0xff] %v4759_v27  ;;  %v926_v56 = vadd.f32 %v4759_v27, %v4755_v23  ;;  %v967_v27 = vmax.f32 %v965_v3, %v966_v22 }
 0x15e   :  { %6564 = vst [vmem:[#allocation64_spill] sm:$0xff] %v4791_v33 }
 0x15f   :  { %v972_v51 = vmax.f32 %v925_v15, %v926_v56  ;;  %v953_v56 = vmax.f32 %v951_v39, %v952_v38  ;;  %v968_v2 = vrot.slane %v967_v27, 2 }
 0x161   :  { %v973_v9 = vrot.slane %v972_v51, 4  ;;  %v954_v41 = vrot.slane %v953_v56, 2 }
 0x163   :  { %v974_v15 = vmax.f32 %v972_v51, %v973_v9  ;;  %v955_v4 = vmax.f32 %v953_v56, %v954_v41 }
 0x164   :  { %v4781_v62 = vpop.permute.xlu1 %774 }
 0x165   :  { %6563 = vst [vmem:[#allocation63_spill] sm:$0xff] %v4781_v62  ;;  %v928_v57 = vadd.f32 %v4781_v62, %v4755_v23  ;;  %v961_v62 = vrot.slane %v960_v35, 2  ;;  %v975_v32 = vrot.slane %v974_v15, 2  ;;  %v956_v22 = vrot.slane %v955_v4, 1 }
 0x167   :  { %v979_v16 = vmax.f32 %v927_v7, %v928_v57  ;;  %v962_v29 = vmax.f32 %v960_v35, %v961_v62  ;;  %v230_v7 = vpop.f32.mrf.mxu1  ;;  %v988_v57 = vmax.f32 %v986_v54, %v987_v25  ;;  %v976_v61 = vmax.f32 %v974_v15, %v975_v32 }
 0x168   :  { %v969_v62 = vmax.f32 %v967_v27, %v968_v2  ;;  %v957_v11 = vmax.f32 %v955_v4, %v956_v22  ;;  %v934_v27 = vadd.f32 %v4791_v33, %v4755_v23 }
 0x169   :  { %v980_v20 = vrot.slane %v979_v16, 4  ;;  %v963_v3 = vrot.slane %v962_v29, 1  ;;  %v989_v9 = vrot.slane %v988_v57, 2 }
 0x16a   :  { %v970_v56 = vrot.slane %v969_v62, 1 }
 0x16b   :  { %v981_v58 = vmax.f32 %v979_v16, %v980_v20  ;;  %v4802_v16 = vadd.f32 %v230_v7, %v4586_v36  ;;  %v977_v20 = vrot.slane %v976_v61, 1  ;;  %v964_v41 = vmax.f32 %v962_v29, %v963_v3 }
 0x16c   :  { %v4799_v51 = vpop.permute.xlu2 %846  ;;  %v990_v15 = vmax.f32 %v988_v57, %v989_v9 }
 0x16d   :  { %v982_v21 = vrot.slane %v981_v58, 2  ;;  %6566 = vst [vmem:[#allocation66_spill] sm:$0xff] %v4799_v51  ;;  %v1065_v32 = vrot.slane %v4802_v16, 1  ;;  %v1067_v36 = vrot.slane %v4802_v16, 3  ;;  %v978_v2 = vmax.f32 %v976_v61, %v977_v20 }
 0x16e   :  { %v991_v3 = vrot.slane %v990_v15, 1  ;;  %v1095_v22 = vadd.f32 %v957_v11, %v4802_v16  ;;  %v1070_v19 = vrot.slane %v4802_v16, 6 }
 0x16f   :  { %v983_v38 = vmax.f32 %v981_v58, %v982_v21  ;;  %v971_v58 = vmax.f32 %v969_v62, %v970_v56  ;;  %v1098_v61 = vadd.f32 %v1067_v36, %v978_v2 }
 0x170   :  { %v992_v62 = vmax.f32 %v990_v15, %v991_v3 }
 0x171   :  { %v984_v25 = vrot.slane %v983_v38, 1 }
 0x173   :  { %v985_v57 = vmax.f32 %v983_v38, %v984_v25  ;;  %v1069_v38 = vrot.slane %v4802_v16, 5 }
 0x174   :  { %v4795_v13 = vpop.permute.xlu1 %794 }
 0x175   :  { %6565 = vst [vmem:[#allocation65_spill] sm:$0xff] %v4795_v13  ;;  %v931_v39 = vadd.f32 %v4795_v13, %v4749_v31  ;;  %v1066_v13 = vrot.slane %v4802_v16, 2  ;;  %v1100_v36 = vadd.f32 %v1069_v38, %v992_v62  ;;  %v2619_v62 = vld [vmem:[#allocation8 + $0x3c8] sm:$0xff] }
 0x177   :  { %v993_v35 = vmax.f32 %v931_v39, %v932_v1  ;;  %v1068_v1 = vrot.slane %v4802_v16, 4  ;;  %v1096_v39 = vadd.f32 %v1065_v32, %v964_v41  ;;  %v1097_v55 = vadd.f32 %v1066_v13, %v971_v58 }
 0x178   :  { %v1111_v41 = vmax.f32 %v1095_v22, 0.0  ;;  %v2622_v22 = vld [vmem:[#allocation8 + $0x3e0] sm:$0xff] }
 0x179   :  { %v994_v54 = vrot.slane %v993_v35, 4  ;;  %v1099_v33 = vadd.f32 %v1068_v1, %v985_v57  ;;  %v1113_v32 = vmax.f32 %v1097_v55, 0.0  ;;  %v1071_v1 = vrot.slane %v4802_v16, 7  ;;  %2696 = vmatpush.msrb.mxu2 %v2622_v22  ;;  %v2618_v16 = vld [vmem:[#allocation8 + $0x3c0] sm:$0xff]  ;;  %v2587_v22 = vld [vmem:[#allocation8 + $0x2c8] sm:$0xff] }
 0x17b   :  { %v995_v6 = vmax.f32 %v993_v35, %v994_v54  ;;  %v4814_v35 = vpop.permute.xlu2 %820  ;;  %v1145_v57 = vrot.slane %v1113_v32, 6  ;;  %2697 = vmatpush.msrb.mxu2 %v2618_v16  ;;  %v2615_v32 = vld [vmem:[#allocation8 + $0x3a8] sm:$0xff] }
 0x17c   :  { %v4807_v7 = vpop.permute.xlu1 %807  ;;  %6568 = vst [vmem:[#allocation68_spill] sm:$0xff] %v4814_v35 }
 0x17d   :  { %6567 = vst [vmem:[#allocation67_spill] sm:$0xff] %v4807_v7  ;;  %v996_v21 = vrot.slane %v995_v6, 2  ;;  %v933_v29 = vadd.f32 %v4807_v7, %v4749_v31  ;;  %v1112_v7 = vmax.f32 %v1096_v39, 0.0 }
 0x17f   :  { %v997_v9 = vmax.f32 %v995_v6, %v996_v21  ;;  %v1000_v4 = vmax.f32 %v933_v29, %v934_v27  ;;  %v1114_v6 = vmax.f32 %v1098_v61, 0.0  ;;  %v1115_v21 = vmax.f32 %v1099_v33, 0.0  ;;  %v2623_v61 = vld [vmem:[#allocation8 + $0x3e8] sm:$0xff] }
 0x180   :  { %v1143_v2 = vrot.slane %v1112_v7, 7  ;;  %2716 = vmatpush.msrb.mxu3 %v2623_v61  ;;  %v4346_v61 = vmov 16.0  }
 0x181   :  { %v998_v20 = vrot.slane %v997_v9, 1  ;;  %v1001_v54 = vrot.slane %v1000_v4, 4  ;;  %v1147_v29 = vrot.slane %v1114_v6, 5  ;;  %v1149_v39 = vrot.slane %v1115_v21, 4 }
 0x182   :  { %v1144_v15 = vsel %vm673_vm6, %v1143_v2, %v1111_v41  ;;  %2717 = vmatpush.msrb.mxu3 %v2619_v62  ;;  %v2606_v2 = vld [vmem:[#allocation8 + $0x360] sm:$0xff]  ;;  %3828 = vrcp.f32 %v4346_v61 }
 0x183   :  { %v999_v56 = vmax.f32 %v997_v9, %v998_v20  ;;  %v1002_v17 = vmax.f32 %v1000_v4, %v1001_v54  ;;  %v1116_v4 = vmax.f32 %v1100_v36, 0.0  ;;  %v1146_v55 = vsel %vm676_vm7, %v1145_v57, %v1144_v15  ;;  %v2611_v36 = vld [vmem:[#allocation8 + $0x388] sm:$0xff]  ;;  %v2598_v15 = vld [vmem:[#allocation8 + $0x320] sm:$0xff] }
 0x184   :  { %v4819_v58 = vpop.permute.xlu2 %865  ;;  %2718 = vmatpush.msrb.mxu3 %v2615_v32  ;;  %v2599_v57 = vld [vmem:[#allocation8 + $0x328] sm:$0xff] }
 0x185   :  { %v1003_v25 = vrot.slane %v1002_v17, 2  ;;  %v1101_v27 = vadd.f32 %v1070_v19, %v999_v56  ;;  %6569 = vst [vmem:[#allocation69_spill] sm:$0xff] %v4819_v58  ;;  %v1151_v54 = vrot.slane %v1116_v4, 3 }
 0x186   :  { %2719 = vmatpush.msrb.mxu3 %v2611_v36  ;;  %v939_v36 = vadd.f32 %v4799_v51, %v4749_v31 }
 0x187   :  { %v1004_v11 = vmax.f32 %v1002_v17, %v1003_v25  ;;  %v1117_v3 = vmax.f32 %v1101_v27, 0.0  ;;  %v1148_v17 = vsel %vm679_vm8, %v1147_v29, %v1146_v55  ;;  %v2614_v25 = vld [vmem:[#allocation8 + $0x3a0] sm:$0xff]  ;;  %v2607_v29 = vld [vmem:[#allocation8 + $0x368] sm:$0xff]  ;;  %v4841_v55 = vpop.permute.xlu0 %826 }
 0x188   :  { %v1150_v19 = vsel %vm682_vm9, %v1149_v39, %v1148_v17  ;;  %2698 = vmatpush.msrb.mxu2 %v2614_v25  ;;  %2720 = vmatpush.msrb.mxu3 %v2607_v29  ;;  %6574 = vst [vmem:[#allocation74_spill] sm:$0xff] %v4841_v55  ;;  %v2591_v17 = vld [vmem:[#allocation8 + $0x2e8] sm:$0xff]  ;;  %v936_v16 = vadd.f32 %v4841_v55, %v4755_v23  ;;  %v2578_v29 = vld [vmem:[#allocation8 + $0x280] sm:$0xff] }
 0x189   :  { %v1005_v13 = vrot.slane %v1004_v11, 1  ;;  %v1153_v7 = vrot.slane %v1117_v3, 2  ;;  %v1152_v56 = vsel %vm685_vm10, %v1151_v54, %v1150_v19  ;;  %v2594_v3 = vld [vmem:[#allocation8 + $0x300] sm:$0xff]  ;;  %v1179_v19 = vadd.f32 %v4743_v37, %v4637_v10 }
 0x18a   :  { %v935_v54 = vadd.f32 %v4814_v35, %v4749_v31  ;;  %v942_v25 = vadd.f32 %v4819_v58, %v4755_v23  ;;  %v5006_v35 = vld [vmem:[#allocation8 + $0x20] sm:$0xff] }
 0x18b   :  { %v1006_v9 = vmax.f32 %v1004_v11, %v1005_v13  ;;  %v1154_v6 = vsel %vm688_vm11, %v1153_v7, %v1152_v56  ;;  %v2610_v11 = vld [vmem:[#allocation8 + $0x380] sm:$0xff]  ;;  %v1180_v32 = vrot.slane %v1179_v19, 4  ;;  %6585 = vst [vmem:[#allocation85_spill] sm:$0xff] %v5006_v35 }
 0x18c   :  { %v4827_v41 = vpop.permute.xlu1 %839  ;;  %v4833_v27 = vpop.permute.xlu2 %878  ;;  %2699 = vmatpush.msrb.mxu2 %v2610_v11  ;;  %v2602_v13 = vld [vmem:[#allocation8 + $0x340] sm:$0xff]  ;;  %v1202_v11 = vmax.f32 %v4637_v10, %v4743_v37 }
 0x18d   :  { %v1102_v33 = vadd.f32 %v1071_v1, %v1006_v9  ;;  %6570 = vst [vmem:[#allocation70_spill] sm:$0xff] %v4827_v41  ;;  %v2603_v1 = vld [vmem:[#allocation8 + $0x348] sm:$0xff]  ;;  %v2586_v7 = vld [vmem:[#allocation8 + $0x2c0] sm:$0xff]  ;;  %v1181_v61 = vadd.f32 %v1180_v32, %v1179_v19 }
 0x18e   :  { %6571 = vst [vmem:[#allocation71_spill] sm:$0xff] %v4833_v27  ;;  %2700 = vmatpush.msrb.mxu2 %v2606_v2  ;;  %2721 = vmatpush.msrb.mxu3 %v2603_v1  ;;  %v2595_v9 = vld [vmem:[#allocation8 + $0x308] sm:$0xff]  ;;  %v2582_v56 = vld [vmem:[#allocation8 + $0x2a0] sm:$0xff] }
 0x18f   :  { %v1118_v20 = vmax.f32 %v1102_v33, 0.0  ;;  %v2590_v33 = vld [vmem:[#allocation8 + $0x2e0] sm:$0xff]  ;;  %v4869_v10 = vpop.permute.xlu0 %917  ;;  %v1182_v19 = vrot.slane %v1181_v61, 2 }
 0x190   :  { %2701 = vmatpush.msrb.mxu2 %v2602_v13  ;;  %2722 = vmatpush.msrb.mxu3 %v2599_v57  ;;  %v2579_v13 = vld [vmem:[#allocation8 + $0x288] sm:$0xff]  ;;  %6577 = vst [vmem:[#allocation77_spill] sm:$0xff] %v4869_v10  ;;  %v2574_v37 = vld [vmem:[#allocation8 + $0x260] sm:$0xff] }
 0x191   :  { %v1155_v38 = vrot.slane %v1118_v20, 1  ;;  %v938_v20 = vadd.f32 %v4827_v41, %v4755_v23  ;;  %v4882_v55 = vadd.f32 %v1182_v19, %v1181_v61  ;;  %v1885_v61 = vld [vmem:[#allocation6 + $0xd8] sm:$0xff] }
 0x192   :  { %2702 = vmatpush.msrb.mxu2 %v2598_v15  ;;  %2723 = vmatpush.msrb.mxu3 %v2595_v9  ;;  %v1007_v9 = vmax.f32 %v935_v54, %v936_v16 }
 0x193   :  { %v4831_v21 = vsel %vm691_vm12, %v1155_v38, %v1154_v6  ;;  %v2583_v38 = vld [vmem:[#allocation8 + $0x2a8] sm:$0xff]  ;;  %v937_v6 = vadd.f32 %v4541_v8, %v4749_v31 }
 0x194   :  { %1271 = vmatmul.f32.gmra.mxu2 %v4831_v21  ;;  %1300 = vmatmul.f32.gmra.mxu3 %v4831_v21  ;;  %v4837_v39 = vpop.permute.xlu1 %852  ;;  %v1008_v16 = vrot.slane %v1007_v9, 4  ;;  %v1863_v8 = vld [vmem:[#allocation6 + $0x28] sm:$0xff] }
 0x195   :  { %6572 = vst [vmem:[#allocation72_spill] sm:$0xff] %v4837_v39  ;;  %2703 = vmatpush.msrb.mxu2 %v2594_v3  ;;  %2724 = vmatpush.msrb.mxu3 %v2591_v17  ;;  %v940_v62 = vadd.f32 %v4837_v39, %v4755_v23  ;;  %v1014_v1 = vmax.f32 %v937_v6, %v938_v20  ;;  %v4867_v3 = vpop.eup %3828  ;;  %v2575_v17 = vld [vmem:[#allocation8 + $0x268] sm:$0xff]  ;;  %v1203_v20 = vrot.slane %v1202_v11, 4 }
 0x196   :  { %v1194_v54 = vmul.f32 16.0, %v4867_v3  ;;  %v2559_v39 = vld [vmem:[#allocation8 + $0x1e8] sm:$0xff]  ;;  %vm1198_vm13 = vweird.f32 %v4867_v3 }
 0x197   :  { %2704 = vmatpush.msrb.mxu2 %v2590_v33  ;;  %2725 = vmatpush.msrb.mxu3 %v2587_v22  ;;  %v1021_v33 = vmax.f32 %v939_v36, %v940_v62  ;;  %v1015_v6 = vrot.slane %v1014_v1, 4  ;;  %v2567_v36 = vld [vmem:[#allocation8 + $0x228] sm:$0xff]  ;;  %v1204_v32 = vmax.f32 %v1202_v11, %v1203_v20  ;;  %v1888_v11 = vld [vmem:[#allocation6 + $0xf0] sm:$0xff]  ;;  %v1889_v20 = vld [vmem:[#allocation6 + $0xf8] sm:$0xff] }
 0x198   :  { %1890 = vmatpush.msrb.mxu0 %v1888_v11  ;;  %1919 = vmatpush.msrb.mxu1 %v1889_v20  ;;  %v2547_v11 = vld [vmem:[#allocation8 + $0x188] sm:$0xff]  ;;  %v1882_v20 = vld [vmem:[#allocation6 + $0xc0] sm:$0xff] }
 0x199   :  { %2705 = vmatpush.msrb.mxu2 %v2586_v7  ;;  %2726 = vmatpush.msrb.mxu3 %v2583_v38  ;;  %v2571_v38 = vld [vmem:[#allocation8 + $0x248] sm:$0xff]  ;;  %v1022_v62 = vrot.slane %v1021_v33, 4  ;;  %v1016_v58 = vmax.f32 %v1014_v1, %v1015_v6  ;;  %v2554_v6 = vld [vmem:[#allocation8 + $0x1c0] sm:$0xff] }
 0x19b   :  { %2706 = vmatpush.msrb.mxu2 %v2582_v56  ;;  %2727 = vmatpush.msrb.mxu3 %v2579_v13  ;;  %v2570_v56 = vld [vmem:[#allocation8 + $0x240] sm:$0xff] }
 0x19c   :  { %v4839_v4 = vpop.permute.xlu2 %898 }
 0x19d   :  { %6573 = vst [vmem:[#allocation73_spill] sm:$0xff] %v4839_v4  ;;  %2707 = vmatpush.msrb.mxu2 %v2578_v29  ;;  %2728 = vmatpush.msrb.mxu3 %v2575_v17  ;;  %v950_v29 = vadd.f32 %v4869_v10, %v4755_v23  ;;  %v2562_v17 = vld [vmem:[#allocation8 + $0x200] sm:$0xff] }
 0x19e   :  { %v2558_v10 = vld [vmem:[#allocation8 + $0x1e0] sm:$0xff] }
 0x19f   :  { %2708 = vmatpush.msrb.mxu2 %v2574_v37  ;;  %2729 = vmatpush.msrb.mxu3 %v2571_v38 }
 0x1a1   :  { %2709 = vmatpush.msrb.mxu2 %v2570_v56  ;;  %2730 = vmatpush.msrb.mxu3 %v2567_v36  ;;  %v944_v56 = vadd.f32 %v4833_v27, %v4755_v23  ;;  %v2555_v27 = vld [vmem:[#allocation8 + $0x1c8] sm:$0xff] }
 0x1a4   :  { %v4861_v2 = vpop.permute.xlu1 %859  ;;  %v4865_v57 = vpop.permute.xlu2 %911 }
 0x1a5   :  { %6575 = vst [vmem:[#allocation75_spill] sm:$0xff] %v4861_v2  ;;  %v941_v15 = vadd.f32 %v4861_v2, %v4749_v31  ;;  %v949_v22 = vadd.f32 %v4865_v57, %v4749_v31  ;;  %v1880_v2 = vld [vmem:[#allocation6 + $0xb0] sm:$0xff] }
 0x1a6   :  { %6576 = vst [vmem:[#allocation76_spill] sm:$0xff] %v4865_v57  ;;  %v2563_v57 = vld [vmem:[#allocation8 + $0x208] sm:$0xff] }
 0x1a7   :  { %v1028_v7 = vmax.f32 %v941_v15, %v942_v25  ;;  %v2566_v25 = vld [vmem:[#allocation8 + $0x220] sm:$0xff]  ;;  %v1056_v15 = vmax.f32 %v949_v22, %v950_v29  ;;  %2731 = vmatpush.msrb.mxu3 %v2563_v57  ;;  %v1195_v22 = vsub.f32 1.0, %v1194_v54  ;;  %v1009_v29 = vmax.f32 %v1007_v9, %v1008_v16  ;;  %v1887_v54 = vld [vmem:[#allocation6 + $0xe8] sm:$0xff] }
 0x1a8   :  { %2710 = vmatpush.msrb.mxu2 %v2566_v25  ;;  %v1023_v25 = vmax.f32 %v1021_v33, %v1022_v62  ;;  %v1886_v57 = vld [vmem:[#allocation6 + $0xe0] sm:$0xff]  ;;  %v1017_v9 = vrot.slane %v1016_v58, 2  ;;  %1920 = vmatpush.msrb.mxu1 %v1887_v54  ;;  %v2543_v54 = vld [vmem:[#allocation8 + $0x168] sm:$0xff] }
 0x1a9   :  { %v1029_v13 = vrot.slane %v1028_v7, 4  ;;  %2800 = vmatpush.msra.mxu3 %v2559_v39  ;;  %v1057_v41 = vrot.slane %v1056_v15, 4  ;;  %1891 = vmatpush.msrb.mxu0 %v1886_v57  ;;  %v2550_v39 = vld [vmem:[#allocation8 + $0x1a0] sm:$0xff]  ;;  %v1010_v16 = vrot.slane %v1009_v29, 2 }
 0x1aa   :  { %2711 = vmatpush.msrb.mxu2 %v2562_v17  ;;  %v1205_v17 = vrot.slane %v1204_v32, 2  ;;  %v1024_v62 = vrot.slane %v1023_v25, 2  ;;  %1921 = vmatpush.msrb.mxu1 %v1885_v61  ;;  %v2542_v57 = vld [vmem:[#allocation8 + $0x160] sm:$0xff]  ;;  %v2539_v61 = vld [vmem:[#allocation8 + $0x148] sm:$0xff] }
 0x1ab   :  { %v1030_v36 = vmax.f32 %v1028_v7, %v1029_v13  ;;  %2801 = vmatpush.msra.mxu3 %v2555_v27  ;;  %v1196_v7 = vmul.f32 %v4867_v3, %v1195_v22  ;;  %v1884_v13 = vld [vmem:[#allocation6 + $0xd0] sm:$0xff]  ;;  %v2546_v27 = vld [vmem:[#allocation8 + $0x180] sm:$0xff] }
 0x1ac   :  { %v4876_v37 = vpop.permute.xlu1 %872  ;;  %2780 = vmatpush.msra.mxu2 %v2558_v10  ;;  %v2551_v10 = vld [vmem:[#allocation8 + $0x1a8] sm:$0xff]  ;;  %1892 = vmatpush.msrb.mxu0 %v1884_v13  ;;  %v1206_v22 = vmax.f32 %v1204_v32, %v1205_v17  ;;  %v1025_v13 = vmax.f32 %v1023_v25, %v1024_v62 }
 0x1ad   :  { %6578 = vst [vmem:[#allocation78_spill] sm:$0xff] %v4876_v37  ;;  %v943_v38 = vadd.f32 %v4876_v37, %v4749_v31  ;;  %2802 = vmatpush.msra.mxu3 %v2551_v10  ;;  %v1031_v19 = vrot.slane %v1030_v36, 2  ;;  %v1184_v37 = vrot.slane %v4882_v55, 1 }
 0x1ae   :  { %2781 = vmatpush.msra.mxu2 %v2554_v6  ;;  %v1883_v6 = vld [vmem:[#allocation6 + $0xc8] sm:$0xff]  ;;  %1893 = vmatpush.msrb.mxu0 %v1882_v20  ;;  %v233_v20 = vpop.f32.mrf.mxu1  ;;  %v1207_v25 = vrot.slane %v1206_v22, 1 }
 0x1af   :  { %v1035_v1 = vmax.f32 %v943_v38, %v944_v56  ;;  %v1058_v56 = vmax.f32 %v1056_v15, %v1057_v41  ;;  %2803 = vmatpush.msra.mxu3 %v2547_v11  ;;  %1922 = vmatpush.msrb.mxu1 %v1883_v6  ;;  %v1881_v41 = vld [vmem:[#allocation6 + $0xb8] sm:$0xff]  ;;  %v2538_v15 = vld [vmem:[#allocation8 + $0x140] sm:$0xff]  ;;  %v1879_v11 = vld [vmem:[#allocation6 + $0xa8] sm:$0xff]  ;;  %v1032_v32 = vmax.f32 %v1030_v36, %v1031_v19  ;;  %v1295_v19 = vpop.f32.mrf.mxu3 }
 0x1b0   :  { %2782 = vmatpush.msra.mxu2 %v2550_v39  ;;  %v1018_v39 = vmax.f32 %v1016_v58, %v1017_v9  ;;  %1894 = vmatpush.msrb.mxu0 %v1880_v2  ;;  %v2534_v58 = vld [vmem:[#allocation8 + $0x120] sm:$0xff]  ;;  %v2535_v9 = vld [vmem:[#allocation8 + $0x128] sm:$0xff]  ;;  %v4897_v36 = vld [vmem:[%s6358_s9 + $0x1] ss:$0 sm:$0xff] }
 0x1b1   :  { %v1036_v33 = vrot.slane %v1035_v1, 4  ;;  %2804 = vmatpush.msra.mxu3 %v2543_v54  ;;  %v1059_v17 = vrot.slane %v1058_v56, 2  ;;  %1923 = vmatpush.msrb.mxu1 %v1881_v41  ;;  %v2531_v54 = vld [vmem:[#allocation8 + $0x108] sm:$0xff]  ;;  %v4899_v41 = vpop.f32.mrf.mxu2 }
 0x1b2   :  { %2783 = vmatpush.msra.mxu2 %v2546_v27  ;;  %v1878_v27 = vld [vmem:[#allocation6 + $0xa0] sm:$0xff]  ;;  %v1019_v62 = vrot.slane %v1018_v39, 1 }
 0x1b3   :  { %v1037_v38 = vmax.f32 %v1035_v1, %v1036_v33  ;;  %v1197_v1 = vadd.f32 %v4867_v3, %v1196_v7  ;;  %v1011_v33 = vmax.f32 %v1009_v29, %v1010_v16  ;;  %2805 = vmatpush.msra.mxu3 %v2539_v61  ;;  %v1876_v7 = vld [vmem:[#allocation6 + $0x90] sm:$0xff]  ;;  %v1877_v29 = vld [vmem:[#allocation6 + $0x98] sm:$0xff]  ;;  %v1185_v16 = vadd.f32 %v1184_v37, %v4882_v55  ;;  %v1874_v55 = vld [vmem:[#allocation6 + $0x80] sm:$0xff] }
 0x1b4   :  { %2784 = vmatpush.msra.mxu2 %v2542_v57  ;;  %1895 = vmatpush.msrb.mxu0 %v1878_v27  ;;  %v2530_v57 = vld [vmem:[#allocation8 + $0x100] sm:$0xff]  ;;  %v1875_v37 = vld [vmem:[#allocation6 + $0x88] sm:$0xff]  ;;  %v1060_v61 = vmax.f32 %v1058_v56, %v1059_v17 }
 0x1b5   :  { %v1038_v10 = vrot.slane %v1037_v38, 2  ;;  %1924 = vmatpush.msrb.mxu1 %v1879_v11  ;;  %v4892_v2 = vsel %vm1198_vm13, %v4867_v3, %v1197_v1  ;;  %2806 = vmatpush.msra.mxu3 %v2535_v9  ;;  %v1033_v1 = vrot.slane %v1032_v32, 1  ;;  %v4910_v9 = vmax.f32 %v1206_v22, %v1207_v25  ;;  %v1872_v25 = vld [vmem:[#allocation6 + $0x70] sm:$0xff] }
 0x1b6   :  { %2785 = vmatpush.msra.mxu2 %v2538_v15  ;;  %6579 = vst [vmem:[#allocation79_spill] sm:$0xff] %v4892_v2  ;;  %v3878_v15 = vld [vmem:[%s6358_s9] ss:$0 sm:$0xff]  ;;  %1896 = vmatpush.msrb.mxu0 %v1876_v7  ;;  %v4913_v51 = vmul.f32 %v4892_v2, %v1185_v16  ;;  %v2526_v7 = vld [vmem:[#allocation8 + $0xe0] sm:$0xff] }
 0x1b7   :  { %v1039_v6 = vmax.f32 %v1037_v38, %v1038_v10  ;;  %v1012_v38 = vrot.slane %v1011_v33, 1  ;;  %v1026_v10 = vrot.slane %v1025_v13, 1  ;;  %v4904_v3 = vadd.f32 %v3878_v15, %v233_v20  ;;  %1925 = vmatpush.msrb.mxu1 %v1877_v29  ;;  %2807 = vmatpush.msra.mxu3 %v2531_v54  ;;  %v2527_v29 = vld [vmem:[#allocation8 + $0xe8] sm:$0xff]  ;;  %v1873_v16 = vld [vmem:[#allocation6 + $0x78] sm:$0xff] }
 0x1b8   :  { %2786 = vmatpush.msra.mxu2 %v2534_v58  ;;  %v945_v58 = vadd.f32 %v4565_v40, %v4749_v31  ;;  %v4916_v20 = vadd.f32 %v1295_v19, %v4897_v36  ;;  %v1020_v15 = vmax.f32 %v1018_v39, %v1019_v62  ;;  %1897 = vmatpush.msrb.mxu0 %v1874_v55  ;;  %v1061_v55 = vrot.slane %v1060_v61, 1  ;;  %v1862_v40 = vld [vmem:[#allocation6 + $0x20] sm:$0xff] }
 0x1b9   :  { %v1040_v27 = vrot.slane %v1039_v6, 1  ;;  %1926 = vmatpush.msrb.mxu1 %v1875_v37  ;;  %v1072_v17 = vrot.slane %v4904_v3, 1  ;;  %v1027_v54 = vmax.f32 %v1025_v13, %v1026_v10  ;;  %v1073_v22 = vrot.slane %v4904_v3, 2  ;;  %2808 = vmatpush.msra.mxu3 %v2527_v29  ;;  %v1870_v10 = vld [vmem:[#allocation6 + $0x60] sm:$0xff] }
 0x1ba   :  { %2787 = vmatpush.msra.mxu2 %v2530_v57  ;;  %v1013_v57 = vmax.f32 %v1011_v33, %v1012_v38  ;;  %v4924_v39 = vadd.f32 %v4899_v41, %v4516_v48  ;;  %v1074_v62 = vrot.slane %v4904_v3, 3  ;;  %v1034_v19 = vmax.f32 %v1032_v32, %v1033_v1  ;;  %1898 = vmatpush.msrb.mxu0 %v1872_v25  ;;  %v4929_v33 = vld [vmem:[#allocation8 + $0xc8] sm:$0xff] }
 0x1bb   :  { %1927 = vmatpush.msrb.mxu1 %v1873_v16  ;;  %v1075_v13 = vrot.slane %v4904_v3, 4  ;;  %v1041_v38 = vmax.f32 %v1039_v6, %v1040_v27  ;;  %2809 = vmatpush.msra.mxu3 %v4929_v33  ;;  %v4936_v32 = vadd.f32 %v4899_v41, %v4504_v42  ;;  %v4940_v1 = vadd.f32 %v4899_v41, %v4514_v47  ;;  %v4944_v6 = vld [vmem:[#allocation8 + $0xa0] sm:$0xff]  ;;  %v4946_v27 = vld [vmem:[#allocation8 + $0xa8] sm:$0xff] }
 0x1bc   :  { %v4906_v11 = vpop.permute.xlu1 %891  ;;  %2788 = vmatpush.msra.mxu2 %v2526_v7  ;;  %v1871_v7 = vld [vmem:[#allocation6 + $0x68] sm:$0xff]  ;;  %1899 = vmatpush.msrb.mxu0 %v1870_v10  ;;  %v4950_v29 = vadd.f32 %v4899_v41, %v4531_v60  ;;  %v4954_v25 = vadd.f32 %v4899_v41, %v4507_v44  ;;  %v4957_v16 = vadd.f32 %v1013_v57, %v4904_v3  ;;  %v1078_v42 = vrot.slane %v4904_v3, 7  ;;  %v4970_v57 = vld [vmem:[#allocation8 + $0x80] sm:$0xff] }
 0x1bd   :  { %6580 = vst [vmem:[#allocation80_spill] sm:$0xff] %v4906_v11  ;;  %v946_v56 = vadd.f32 %v4906_v11, %v4755_v23  ;;  %v4927_v11 = vld [vmem:[#allocation8 + $0xc0] sm:$0xff]  ;;  %1928 = vmatpush.msrb.mxu1 %v1871_v7  ;;  %v4959_v47 = vadd.f32 %v1073_v22, %v1027_v54  ;;  %2810 = vmatpush.msra.mxu3 %v4946_v27  ;;  %v4972_v54 = vld [vmem:[#allocation8 + $0x88] sm:$0xff] }
 0x1be   :  { %2789 = vmatpush.msra.mxu2 %v4927_v11  ;;  %v4965_v10 = vadd.f32 %v4899_v41, %v4563_v34  ;;  %v4967_v7 = vadd.f32 %v1074_v62, %v1034_v19  ;;  %v1062_v60 = vmax.f32 %v1060_v61, %v1061_v55  ;;  %v4974_v22 = vadd.f32 %v1075_v13, %v1041_v38  ;;  %v1866_v62 = vld [vmem:[#allocation6 + $0x40] sm:$0xff]  ;;  %v1867_v19 = vld [vmem:[#allocation6 + $0x48] sm:$0xff]  ;;  %v1864_v61 = vld [vmem:[#allocation6 + $0x30] sm:$0xff] }
 0x1bf   :  { %v1042_v37 = vmax.f32 %v945_v58, %v946_v56  ;;  %v4942_v56 = vadd.f32 %v1072_v17, %v1020_v15  ;;  %v1868_v15 = vld [vmem:[#allocation6 + $0x50] sm:$0xff]  ;;  %v1869_v17 = vld [vmem:[#allocation6 + $0x58] sm:$0xff]  ;;  %2811 = vmatpush.msra.mxu3 %v4972_v54  ;;  %v4990_v34 = vld [vmem:[#allocation8 + $0x68] sm:$0xff]  ;;  %v1119_v55 = vmax.f32 %v4957_v16, 0.0 }
 0x1c0   :  { %2790 = vmatpush.msra.mxu2 %v4944_v6  ;;  %1900 = vmatpush.msrb.mxu0 %v1868_v15  ;;  %6582 = vst [vmem:[#allocation82_spill] sm:$0xff] %v4990_v34  ;;  %v1123_v59 = vmax.f32 %v4974_v22, 0.0  ;;  %v1076_v22 = vrot.slane %v4904_v3, 5 }
 0x1c1   :  { %v1043_v58 = vrot.slane %v1042_v37, 4  ;;  %1929 = vmatpush.msrb.mxu1 %v1869_v17  ;;  %v1120_v38 = vmax.f32 %v4942_v56, 0.0  ;;  %v4988_v17 = vld [vmem:[#allocation8 + $0x60] sm:$0xff]  ;;  %2812 = vmatpush.msra.mxu3 %v4990_v34  ;;  %v5002_v56 = vadd.f32 %v4899_v41, %v4573_v12  ;;  %v5011_v12 = vld [vmem:[#allocation8 + $0x28] sm:$0xff]  ;;  %v1861_v34 = vld [vmem:[#allocation6 + $0x18] sm:$0xff] }
 0x1c2   :  { %2791 = vmatpush.msra.mxu2 %v4970_v57  ;;  %1901 = vmatpush.msrb.mxu0 %v1866_v62  ;;  %v1860_v62 = vld [vmem:[#allocation6 + $0x10] sm:$0xff] }
 0x1c3   :  { %v1044_v44 = vmax.f32 %v1042_v37, %v1043_v58  ;;  %v947_v58 = vadd.f32 %v4839_v4, %v4749_v31  ;;  %1930 = vmatpush.msrb.mxu1 %v1867_v19  ;;  %v1121_v37 = vmax.f32 %v4959_v47, 0.0  ;;  %v1865_v31 = vld [vmem:[#allocation6 + $0x38] sm:$0xff]  ;;  %v4996_v4 = vld [vmem:[#allocation8 + $0x40] sm:$0xff]  ;;  %v1122_v19 = vmax.f32 %v4967_v7, 0.0 }
 0x1c4   :  { %v4976_v48 = vpop.permute.xlu1 %904  ;;  %2792 = vmatpush.msra.mxu2 %v4988_v17  ;;  %6583 = vst [vmem:[#allocation83_spill] sm:$0xff] %v4996_v4  ;;  %v1110_v47 = vadd.f32 %v1078_v42, %v1062_v60  ;;  %1902 = vmatpush.msrb.mxu0 %v1864_v61  ;;  %v1859_v42 = vld [vmem:[#allocation6 + $0x8] sm:$0xff]  ;;  %v5039_v60 = vadd.f32 %v4899_v41, %v4510_v45 }
 0x1c5   :  { %6581 = vst [vmem:[#allocation81_spill] sm:$0xff] %v4976_v48  ;;  %v1045_v15 = vrot.slane %v1044_v44, 2  ;;  %v948_v13 = vadd.f32 %v4976_v48, %v4755_v23  ;;  %v4998_v23 = vld [vmem:[#allocation8 + $0x48] sm:$0xff]  ;;  %1931 = vmatpush.msrb.mxu1 %v1865_v31  ;;  %v1159_v31 = vrot.slane %v1121_v37, 6 }
 0x1c6   :  { %6584 = vst [vmem:[#allocation84_spill] sm:$0xff] %v4998_v23  ;;  %2793 = vmatpush.msra.mxu2 %v4996_v4  ;;  %2813 = vmatpush.msra.mxu3 %v4998_v23  ;;  %v5029_v23 = vadd.f32 %v4899_v41, %v4642_v28  ;;  %v1126_v37 = vmax.f32 %v1110_v47, 0.0  ;;  %v5043_v28 = vadd.f32 %v4899_v41, %v4649_v63 }
 0x1c7   :  { %v1046_v16 = vmax.f32 %v1044_v44, %v1045_v15  ;;  %v1049_v48 = vmax.f32 %v947_v58, %v948_v13  ;;  %v5015_v44 = vadd.f32 %v4899_v41, %v4598_v0  ;;  %v1157_v58 = vrot.slane %v1120_v38, 7  ;;  %1903 = vmatpush.msrb.mxu0 %v1862_v40  ;;  %1932 = vmatpush.msrb.mxu1 %v1863_v8  ;;  %v5020_v15 = vld [vmem:[#allocation8] sm:$0xff]  ;;  %v5022_v13 = vld [vmem:[#allocation8 + $0x8] sm:$0xff] }
 0x1c8   :  { %2794 = vmatpush.msra.mxu2 %v5006_v35  ;;  %2814 = vmatpush.msra.mxu3 %v5011_v12  ;;  %v1858_v0 = vld [vmem:[#allocation6] sm:$0xff]  ;;  %v5033_v8 = vadd.f32 %v4899_v41, %v4631_v43  ;;  %v1161_v40 = vrot.slane %v1122_v19, 5  ;;  %v1163_v35 = vrot.slane %v1123_v59, 4  ;;  %v5047_v19 = vadd.f32 %v4899_v41, %v4658_v18 }
 0x1c9   :  { %v1047_v7 = vrot.slane %v1046_v16, 1  ;;  %v1050_v61 = vrot.slane %v1049_v48, 4  ;;  %1904 = vmatpush.msrb.mxu0 %v1860_v62  ;;  %1933 = vmatpush.msrb.mxu1 %v1861_v34  ;;  %v1158_v34 = vsel %vm673_vm6, %v1157_v58, %v1119_v55  ;;  %v5052_v59 = vadd.f32 %v4899_v41, %v4686_v30 }
 0x1ca   :  { %2795 = vmatpush.msra.mxu2 %v5020_v15  ;;  %2815 = vmatpush.msra.mxu3 %v5022_v13  ;;  %v1160_v47 = vsel %vm676_vm7, %v1159_v31, %v1158_v34  ;;  %v1169_v58 = vrot.slane %v1126_v37, 1  ;;  %v6586_v37 = vld [vmem:[#allocation38_spill] sm:$0xff] }
 0x1cb   :  { %v1048_v38 = vmax.f32 %v1046_v16, %v1047_v7  ;;  %v1051_v4 = vmax.f32 %v1049_v48, %v1050_v61  ;;  %1905 = vmatpush.msrb.mxu0 %v1858_v0  ;;  %1934 = vmatpush.msrb.mxu1 %v1859_v42  ;;  %v1077_v16 = vrot.slane %v4904_v3, 6  ;;  %v5058_v7 = vadd.f32 %v4899_v41, %v4518_v49 }
 0x1cc   :  { %v5062_v61 = vadd.f32 %v4899_v41, %v4697_v46  ;;  %v1162_v42 = vsel %vm679_vm8, %v1161_v40, %v1160_v47 }
 0x1cd   :  { %v1052_v48 = vrot.slane %v1051_v4, 2  ;;  %v1108_v62 = vadd.f32 %v1076_v22, %v1048_v38  ;;  %v1164_v38 = vsel %vm682_vm9, %v1163_v35, %v1162_v42 }
 0x1cf   :  { %v1053_v22 = vmax.f32 %v1051_v4, %v1052_v48  ;;  %v5064_v55 = vpop.f32.mrf.mxu2  ;;  %v1124_v0 = vmax.f32 %v1108_v62, 0.0  ;;  %v6587_v62 = vld [vmem:[#allocation36_spill] sm:$0xff] }
 0x1d0   :  { %v1312_v3 = vadd.f32 %v5064_v55, %v4526_v52  ;;  %v1314_v31 = vadd.f32 %v5064_v55, %v4578_v24  ;;  %v1316_v34 = vadd.f32 %v5064_v55, %v4522_v50  ;;  %v1318_v4 = vadd.f32 %v5064_v55, %v4539_v5 }
 0x1d1   :  { %v1054_v41 = vrot.slane %v1053_v22, 1  ;;  %v1165_v46 = vrot.slane %v1124_v0, 3  ;;  %v1320_v40 = vadd.f32 %v5064_v55, %v4550_v14  ;;  %v1322_v35 = vadd.f32 %v5064_v55, %v4567_v53 }
 0x1d2   :  { %v1324_v48 = vadd.f32 %v5064_v55, %v6586_v37  ;;  %v1326_v47 = vadd.f32 %v5064_v55, %v6587_v62  ;;  %v1343_v42 = vmax.f32 %v4924_v39, %v1312_v3  ;;  %v1350_v30 = vmax.f32 %v4936_v32, %v1314_v31 }
 0x1d3   :  { %v1055_v49 = vmax.f32 %v1053_v22, %v1054_v41  ;;  %v1166_v0 = vsel %vm685_vm10, %v1165_v46, %v1164_v38  ;;  %v1357_v18 = vmax.f32 %v4940_v1, %v1316_v34  ;;  %v1364_v45 = vmax.f32 %v4950_v29, %v1318_v4 }
 0x1d4   :  { %v1344_v63 = vrot.slane %v1343_v42, 4  ;;  %v1371_v43 = vmax.f32 %v4954_v25, %v1320_v40  ;;  %v1378_v53 = vmax.f32 %v4965_v10, %v1322_v35  ;;  %v1351_v14 = vrot.slane %v1350_v30, 4 }
 0x1d5   :  { %v1109_v37 = vadd.f32 %v1077_v16, %v1055_v49  ;;  %v1358_v5 = vrot.slane %v1357_v18, 4  ;;  %v1385_v62 = vmax.f32 %v5002_v56, %v1324_v48  ;;  %v1365_v22 = vrot.slane %v1364_v45, 4 }
 0x1d6   :  { %v1345_v39 = vmax.f32 %v1343_v42, %v1344_v63  ;;  %v1372_v3 = vrot.slane %v1371_v43, 4  ;;  %v1379_v46 = vrot.slane %v1378_v53, 4  ;;  %v1352_v32 = vmax.f32 %v1350_v30, %v1351_v14 }
 0x1d7   :  { %v1125_v38 = vmax.f32 %v1109_v37, 0.0  ;;  %v1359_v31 = vmax.f32 %v1357_v18, %v1358_v5  ;;  %v1386_v1 = vrot.slane %v1385_v62, 4  ;;  %v1366_v41 = vmax.f32 %v1364_v45, %v1365_v22 }
 0x1d8   :  { %v1346_v34 = vrot.slane %v1345_v39, 2  ;;  %v1373_v29 = vmax.f32 %v1371_v43, %v1372_v3  ;;  %v1380_v4 = vmax.f32 %v1378_v53, %v1379_v46  ;;  %v1353_v40 = vrot.slane %v1352_v32, 2 }
 0x1d9   :  { %v1167_v25 = vrot.slane %v1125_v38, 2  ;;  %v1360_v10 = vrot.slane %v1359_v31, 2  ;;  %v1387_v49 = vmax.f32 %v1385_v62, %v1386_v1  ;;  %v1367_v35 = vrot.slane %v1366_v41, 2 }
 0x1da   :  { %v1347_v16 = vmax.f32 %v1345_v39, %v1346_v34  ;;  %v1374_v50 = vrot.slane %v1373_v29, 2  ;;  %v1381_v56 = vrot.slane %v1380_v4, 2  ;;  %v1354_v48 = vmax.f32 %v1352_v32, %v1353_v40 }
 0x1db   :  { %v1168_v63 = vsel %vm688_vm11, %v1167_v25, %v1166_v0  ;;  %v1361_v42 = vmax.f32 %v1359_v31, %v1360_v10  ;;  %v1388_v37 = vrot.slane %v1387_v49, 2  ;;  %v1368_v18 = vmax.f32 %v1366_v41, %v1367_v35 }
 0x1dc   :  { %v1170_v5 = vsel %vm691_vm12, %v1169_v58, %v1168_v63  ;;  %v1348_v14 = vrot.slane %v1347_v16, 1  ;;  %v1375_v45 = vmax.f32 %v1373_v29, %v1374_v50  ;;  %v1355_v30 = vrot.slane %v1354_v48, 1 }
 0x1dd   :  { %v1186_v53 = vadd.f32 %v1170_v5, %v4831_v21  ;;  %v1209_v43 = vmax.f32 %v4831_v21, %v1170_v5  ;;  %1274 = vmatmul.f32.gmra.mxu2 %v1170_v5  ;;  %1303 = vmatmul.f32.gmra.mxu3 %v1170_v5  ;;  %v1362_v62 = vrot.slane %v1361_v42, 1  ;;  %v1369_v22 = vrot.slane %v1368_v18, 1 }
 0x1de   :  { %v1349_v39 = vmax.f32 %v1347_v16, %v1348_v14  ;;  %v1376_v3 = vrot.slane %v1375_v45, 1  ;;  %v1382_v0 = vmax.f32 %v1380_v4, %v1381_v56  ;;  %v1356_v32 = vmax.f32 %v1354_v48, %v1355_v30 }
 0x1df   :  { %v1187_v46 = vrot.slane %v1186_v53, 4  ;;  %v1210_v38 = vrot.slane %v1209_v43, 4  ;;  %v1363_v31 = vmax.f32 %v1361_v42, %v1362_v62  ;;  %v1370_v58 = vmax.f32 %v1368_v18, %v1369_v22 }
 0x1e0   :  { %v1377_v1 = vmax.f32 %v1375_v45, %v1376_v3  ;;  %v1383_v34 = vrot.slane %v1382_v0, 1  ;;  %v1389_v50 = vmax.f32 %v1387_v49, %v1388_v37  ;;  %v1392_v21 = vmax.f32 %v5015_v44, %v1326_v47 }
 0x1e1   :  { %v1188_v41 = vadd.f32 %v1187_v46, %v1186_v53  ;;  %v1211_v29 = vmax.f32 %v1209_v43, %v1210_v38  ;;  %v1487_v25 = vadd.f32 %v1349_v39, %v4916_v20  ;;  %v6588_v16 = vrot.slane %v4916_v20, 1  ;;  %v1298_v53 = vpop.f32.mrf.mxu3 }
 0x1e2   :  { %v1384_v40 = vmax.f32 %v1382_v0, %v1383_v34  ;;  %v1390_v10 = vrot.slane %v1389_v50, 1  ;;  %v6589_v4 = vrot.slane %v4916_v20, 2  ;;  %v1393_v42 = vrot.slane %v1392_v21, 4 }
 0x1e3   :  { %v1488_v35 = vadd.f32 %v6588_v16, %v1356_v32  ;;  %v1189_v63 = vrot.slane %v1188_v41, 2  ;;  %v1212_v48 = vrot.slane %v1211_v29, 2  ;;  %v6590_v5 = vrot.slane %v4916_v20, 3  ;;  %v2686_v16 = vld [vmem:[#allocation9 + $0x1e0] sm:$0xff] }
 0x1e4   :  { %v1489_v56 = vadd.f32 %v6589_v4, %v1363_v31  ;;  %v1391_v37 = vmax.f32 %v1389_v50, %v1390_v10  ;;  %v6591_v14 = vrot.slane %v4916_v20, 4  ;;  %v6592_v47 = vrot.slane %v4916_v20, 5 }
 0x1e5   :  { %v1490_v49 = vadd.f32 %v6590_v5, %v1370_v58  ;;  %v1503_v45 = vmax.f32 %v1487_v25, 0.0  ;;  %v1190_v43 = vadd.f32 %v1189_v63, %v1188_v41  ;;  %v1213_v30 = vmax.f32 %v1211_v29, %v1212_v48  ;;  %v6594_v48 = vld [vmem:[#allocation44_spill] sm:$0xff] }
 0x1e6   :  { %v1491_v44 = vadd.f32 %v6591_v14, %v1377_v1  ;;  %v1492_v18 = vadd.f32 %v6592_v47, %v1384_v40  ;;  %v1394_v62 = vmax.f32 %v1392_v21, %v1393_v42  ;;  %v1504_v39 = vmax.f32 %v1488_v35, 0.0  ;;  %v2687_v35 = vld [vmem:[#allocation9 + $0x1e8] sm:$0xff] }
 0x1e7   :  { %v6593_v22 = vrot.slane %v4916_v20, 6  ;;  %v1505_v0 = vmax.f32 %v1489_v56, 0.0  ;;  %v1506_v46 = vmax.f32 %v1490_v49, 0.0  ;;  %v1214_v32 = vrot.slane %v1213_v30, 1 }
 0x1e8   :  { %v1507_v38 = vmax.f32 %v1491_v44, 0.0  ;;  %v1395_v31 = vrot.slane %v1394_v62, 2  ;;  %v1508_v58 = vmax.f32 %v1492_v18, 0.0  ;;  %v1535_v34 = vrot.slane %v1504_v39, 7  ;;  %v2682_v18 = vld [vmem:[#allocation9 + $0x1c0] sm:$0xff] }
 0x1e9   :  { %v1493_v3 = vadd.f32 %v6593_v22, %v1391_v37  ;;  %v5111_v1 = vadd.f32 %v1298_v53, %v4897_v36  ;;  %v1537_v25 = vrot.slane %v1505_v0, 6  ;;  %v1539_v40 = vrot.slane %v1506_v46, 5  ;;  %v6595_v37 = vld [vmem:[#allocation39_spill] sm:$0xff] }
 0x1ea   :  { %v1215_v41 = vmax.f32 %v1213_v30, %v1214_v32  ;;  %v1396_v29 = vmax.f32 %v1394_v62, %v1395_v31  ;;  %v1536_v21 = vsel %vm673_vm6, %v1535_v34, %v1503_v45  ;;  %v1541_v10 = vrot.slane %v1507_v38, 4  ;;  %v2683_v45 = vld [vmem:[#allocation9 + $0x1c8] sm:$0xff]  ;;  %v6596_v30 = vld [vmem:[#allocation42_spill] sm:$0xff]  ;;  %v6597_v22 = vld [vmem:[#allocation47_spill] sm:$0xff] }
 0x1eb   :  { %v1509_v50 = vmax.f32 %v1493_v3, 0.0  ;;  %v1538_v4 = vsel %vm676_vm7, %v1537_v25, %v1536_v21  ;;  %v1543_v56 = vrot.slane %v1508_v58, 3  ;;  %v1191_v63 = vrot.slane %v1190_v43, 1  ;;  %v2678_v38 = vld [vmem:[#allocation9 + $0x1a0] sm:$0xff]  ;;  %v2679_v32 = vld [vmem:[#allocation9 + $0x1a8] sm:$0xff] }
 0x1ec   :  { %v1328_v42 = vadd.f32 %v5064_v55, %v6594_v48  ;;  %v5119_v36 = vsel %vm673_vm6, %v1215_v41, %v4910_v9  ;;  %v1397_v5 = vrot.slane %v1396_v29, 1  ;;  %v1540_v49 = vsel %vm679_vm8, %v1539_v40, %v1538_v4  ;;  %v6599_v34 = vld [vmem:[#allocation48_spill] sm:$0xff]  ;;  %v6601_v41 = vld [vmem:[#allocation51_spill] sm:$0xff] }
 0x1ed   :  { %v1330_v14 = vadd.f32 %v5064_v55, %v6595_v37  ;;  %2712 = vmatmul.f32.vlgmr.msrb.gmra.mxu2 %v5119_v36  ;;  %2732 = vmatmul.f32.vlgmr.msrb.gmra.mxu3 %v5119_v36  ;;  %v1542_v44 = vsel %vm682_vm9, %v1541_v10, %v1540_v49  ;;  %v1545_v47 = vrot.slane %v1509_v50, 2  ;;  %v1192_v53 = vadd.f32 %v1191_v63, %v1190_v43  ;;  %v6598_v43 = vld [vmem:[#allocation45_spill] sm:$0xff] }
 0x1ee   :  { %v1332_v9 = vadd.f32 %v5064_v55, %v6596_v30  ;;  %2860 = vmatpush.msrb.mxu2 %v2686_v16  ;;  %2880 = vmatpush.msrb.mxu3 %v2687_v35  ;;  %v1398_v62 = vmax.f32 %v1396_v29, %v1397_v5  ;;  %v1544_v39 = vsel %vm685_vm10, %v1543_v56, %v1542_v44  ;;  %v1464_v0 = vrot.slane %v5111_v1, 1  ;;  %v2674_v16 = vld [vmem:[#allocation9 + $0x180] sm:$0xff]  ;;  %v2675_v35 = vld [vmem:[#allocation9 + $0x188] sm:$0xff] }
 0x1ef   :  { %v1334_v3 = vadd.f32 %v5064_v55, %v6597_v22  ;;  %v1546_v46 = vsel %vm688_vm11, %v1545_v47, %v1544_v39  ;;  %v1201_v31 = vmul.f32 %v4892_v2, %v1192_v53  ;;  %v1336_v58 = vadd.f32 %v5064_v55, %v6598_v43  ;;  %v2670_v47 = vld [vmem:[#allocation9 + $0x160] sm:$0xff]  ;;  %v2667_v39 = vld [vmem:[#allocation9 + $0x148] sm:$0xff] }
 0x1f0   :  { %v1338_v50 = vadd.f32 %v5064_v55, %v6599_v34  ;;  %v6600_v25 = vrot.slane %v4916_v20, 7  ;;  %2861 = vmatpush.msrb.mxu2 %v2682_v18  ;;  %2881 = vmatpush.msrb.mxu3 %v2683_v45  ;;  %v1340_v29 = vadd.f32 %v5064_v55, %v6601_v41  ;;  %v1342_v21 = vadd.f32 %v5064_v55, %v4710_v26  ;;  %v2671_v18 = vld [vmem:[#allocation9 + $0x168] sm:$0xff] }
 0x1f1   :  { %v1465_v10 = vrot.slane %v5111_v1, 2  ;;  %v5148_v4 = vsel %vm673_vm6, %v1201_v31, %v4913_v51  ;;  %v1399_v56 = vmax.f32 %v5029_v23, %v1328_v42  ;;  %v1406_v20 = vmax.f32 %v5033_v8, %v1330_v14 }
 0x1f2   :  { %v1494_v40 = vadd.f32 %v6600_v25, %v1398_v62  ;;  %v1413_v63 = vmax.f32 %v5039_v60, %v1332_v9  ;;  %2862 = vmatpush.msrb.mxu2 %v2678_v38  ;;  %2882 = vmatpush.msrb.mxu3 %v2679_v32  ;;  %v1420_v49 = vmax.f32 %v5043_v28, %v1334_v3  ;;  %v2666_v62 = vld [vmem:[#allocation9 + $0x140] sm:$0xff]  ;;  %v1466_v32 = vrot.slane %v5111_v1, 3 }
 0x1f3   :  { %v1427_v55 = vmax.f32 %v5047_v19, %v1336_v58  ;;  %v1434_v44 = vmax.f32 %v5052_v59, %v1338_v50  ;;  %v1400_v45 = vrot.slane %v1399_v56, 4  ;;  %v1407_v51 = vrot.slane %v1406_v20, 4 }
 0x1f4   :  { %v1510_v5 = vmax.f32 %v1494_v40, 0.0  ;;  %v1414_v53 = vrot.slane %v1413_v63, 4  ;;  %v1441_v23 = vmax.f32 %v5058_v7, %v1340_v29  ;;  %2863 = vmatpush.msrb.mxu2 %v2674_v16  ;;  %2883 = vmatpush.msrb.mxu3 %v2675_v35  ;;  %v1421_v60 = vrot.slane %v1420_v49, 4  ;;  %v2662_v40 = vld [vmem:[#allocation9 + $0x120] sm:$0xff]  ;;  %v2663_v29 = vld [vmem:[#allocation9 + $0x128] sm:$0xff] }
 0x1f5   :  { %v1428_v8 = vrot.slane %v1427_v55, 4  ;;  %v1435_v14 = vrot.slane %v1434_v44, 4  ;;  %2796 = vmatmul.f32.vlgmr.msra.gmra.mxu2 %v5148_v4  ;;  %2816 = vmatmul.f32.vlgmr.msra.gmra.mxu3 %v5148_v4  ;;  %v1401_v28 = vmax.f32 %v1399_v56, %v1400_v45  ;;  %v1408_v19 = vmax.f32 %v1406_v20, %v1407_v51 }
 0x1f6   :  { %v1547_v42 = vrot.slane %v1510_v5, 1  ;;  %v1415_v59 = vmax.f32 %v1413_v63, %v1414_v53  ;;  %v1442_v9 = vrot.slane %v1441_v23, 4  ;;  %2864 = vmatpush.msrb.mxu2 %v2670_v47  ;;  %2884 = vmatpush.msrb.mxu3 %v2671_v18  ;;  %v1422_v7 = vmax.f32 %v1420_v49, %v1421_v60  ;;  %v2659_v47 = vld [vmem:[#allocation9 + $0x108] sm:$0xff] }
 0x1f7   :  { %v1429_v38 = vmax.f32 %v1427_v55, %v1428_v8  ;;  %v1402_v31 = vrot.slane %v1401_v28, 2  ;;  %v1409_v58 = vrot.slane %v1408_v19, 2  ;;  %v1436_v25 = vmax.f32 %v1434_v44, %v1435_v14  ;;  %v2658_v55 = vld [vmem:[#allocation9 + $0x100] sm:$0xff] }
 0x1f8   :  { %v5160_v3 = vsel %vm691_vm12, %v1547_v42, %v1546_v46  ;;  %v1416_v50 = vrot.slane %v1415_v59, 2  ;;  %v1423_v16 = vrot.slane %v1422_v7, 2  ;;  %v1443_v46 = vmax.f32 %v1441_v23, %v1442_v9  ;;  %2865 = vmatpush.msrb.mxu2 %v2666_v62  ;;  %2885 = vmatpush.msrb.mxu3 %v2667_v39  ;;  %v2654_v8 = vld [vmem:[#allocation9 + $0xe0] sm:$0xff]  ;;  %v2625_v9 = vld [vmem:[#allocation8 + $0x3f8] sm:$0xff] }
 0x1f9   :  { %1906 = vmatmul.f32.vlgmr.msrb.gmra.mxu0 %v5160_v3  ;;  %1935 = vmatmul.f32.vlgmr.msrb.gmra.mxu1 %v5160_v3  ;;  %v1430_v35 = vrot.slane %v1429_v38, 2  ;;  %v1448_v56 = vmax.f32 %v5062_v61, %v1342_v21  ;;  %v1403_v20 = vmax.f32 %v1401_v28, %v1402_v31  ;;  %v1410_v63 = vmax.f32 %v1408_v19, %v1409_v58  ;;  %v2655_v61 = vld [vmem:[#allocation9 + $0xe8] sm:$0xff]  ;;  %v2650_v31 = vld [vmem:[#allocation9 + $0xc0] sm:$0xff]  ;;  %v2620_v58 = vld [vmem:[#allocation8 + $0x3d0] sm:$0xff] }
 0x1fa   :  { %v1417_v5 = vmax.f32 %v1415_v59, %v1416_v50  ;;  %v1437_v49 = vrot.slane %v1436_v25, 2  ;;  %v1424_v18 = vmax.f32 %v1422_v7, %v1423_v16  ;;  %v1444_v51 = vrot.slane %v1443_v46, 2  ;;  %2866 = vmatpush.msrb.mxu2 %v2662_v40  ;;  %2886 = vmatpush.msrb.mxu3 %v2663_v29  ;;  %v2624_v59 = vld [vmem:[#allocation8 + $0x3f0] sm:$0xff]  ;;  %v2621_v50 = vld [vmem:[#allocation8 + $0x3d8] sm:$0xff] }
 0x1fb   :  { %v1431_v45 = vmax.f32 %v1429_v38, %v1430_v35  ;;  %v1449_v53 = vrot.slane %v1448_v56, 4  ;;  %v1404_v44 = vrot.slane %v1403_v20, 1  ;;  %v1411_v42 = vrot.slane %v1410_v63, 1  ;;  %2736 = vmatpush.msra.mxu0 %v2624_v59  ;;  %2756 = vmatpush.msra.mxu1 %v2625_v9  ;;  %v2651_v35 = vld [vmem:[#allocation9 + $0xc8] sm:$0xff] }
 0x1fc   :  { %v1418_v60 = vrot.slane %v1417_v5, 1  ;;  %v1438_v23 = vmax.f32 %v1436_v25, %v1437_v49  ;;  %v1425_v21 = vrot.slane %v1424_v18, 1  ;;  %v1445_v28 = vmax.f32 %v1443_v46, %v1444_v51  ;;  %2867 = vmatpush.msrb.mxu2 %v2658_v55  ;;  %2887 = vmatpush.msrb.mxu3 %v2659_v47  ;;  %v2616_v49 = vld [vmem:[#allocation8 + $0x3b0] sm:$0xff]  ;;  %v2647_v51 = vld [vmem:[#allocation9 + $0xa8] sm:$0xff] }
 0x1fd   :  { %v1432_v14 = vrot.slane %v1431_v45, 1  ;;  %v1450_v19 = vmax.f32 %v1448_v56, %v1449_v53  ;;  %v1405_v62 = vmax.f32 %v1403_v20, %v1404_v44  ;;  %v1412_v39 = vmax.f32 %v1410_v63, %v1411_v42  ;;  %2737 = vmatpush.msra.mxu0 %v2620_v58  ;;  %2757 = vmatpush.msra.mxu1 %v2621_v50  ;;  %v2617_v53 = vld [vmem:[#allocation8 + $0x3b8] sm:$0xff]  ;;  %v2639_v50 = vld [vmem:[#allocation9 + $0x68] sm:$0xff] }
 0x1fe   :  { %v1419_v7 = vmax.f32 %v1417_v5, %v1418_v60  ;;  %v1439_v38 = vrot.slane %v1438_v23, 1  ;;  %v1426_v25 = vmax.f32 %v1424_v18, %v1425_v21  ;;  %v1446_v29 = vrot.slane %v1445_v28, 1  ;;  %2868 = vmatpush.msrb.mxu2 %v2654_v8  ;;  %2888 = vmatpush.msrb.mxu3 %v2655_v61  ;;  %v2646_v5 = vld [vmem:[#allocation9 + $0xa0] sm:$0xff]  ;;  %v2612_v61 = vld [vmem:[#allocation8 + $0x390] sm:$0xff] }
 0x1ff   :  { %v1433_v40 = vmax.f32 %v1431_v45, %v1432_v14  ;;  %v1451_v16 = vrot.slane %v1450_v19, 2  ;;  %v1467_v56 = vrot.slane %v5111_v1, 4  ;;  %v1468_v20 = vrot.slane %v5111_v1, 5  ;;  %v2642_v8 = vld [vmem:[#allocation9 + $0x80] sm:$0xff]  ;;  %2738 = vmatpush.msra.mxu0 %v2616_v49  ;;  %2758 = vmatpush.msra.mxu1 %v2617_v53  ;;  %v2631_v53 = vld [vmem:[#allocation9 + $0x28] sm:$0xff] }
 0x200   :  { %v1440_v46 = vmax.f32 %v1438_v23, %v1439_v38  ;;  %v1469_v63 = vrot.slane %v5111_v1, 6  ;;  %v1447_v55 = vmax.f32 %v1445_v28, %v1446_v29  ;;  %v1495_v18 = vadd.f32 %v1405_v62, %v5111_v1  ;;  %2869 = vmatpush.msrb.mxu2 %v2650_v31  ;;  %2889 = vmatpush.msrb.mxu3 %v2651_v35 }
 0x201   :  { %v1452_v47 = vmax.f32 %v1450_v19, %v1451_v16  ;;  %v1496_v45 = vadd.f32 %v1464_v0, %v1412_v39  ;;  %v1497_v44 = vadd.f32 %v1465_v10, %v1419_v7  ;;  %v1498_v42 = vadd.f32 %v1466_v32, %v1426_v25  ;;  %v2643_v19 = vld [vmem:[#allocation9 + $0x88] sm:$0xff]  ;;  %v2613_v0 = vld [vmem:[#allocation8 + $0x398] sm:$0xff]  ;;  %v2638_v39 = vld [vmem:[#allocation9 + $0x60] sm:$0xff]  ;;  %2739 = vmatpush.msra.mxu0 %v2612_v61 }
 0x202   :  { %v1499_v60 = vadd.f32 %v1467_v56, %v1433_v40  ;;  %v1500_v23 = vadd.f32 %v1468_v20, %v1440_v46  ;;  %v1501_v14 = vadd.f32 %v1469_v63, %v1447_v55  ;;  %2870 = vmatpush.msrb.mxu2 %v2646_v5  ;;  %v1470_v59 = vrot.slane %v5111_v1, 7  ;;  %2890 = vmatpush.msrb.mxu3 %v2647_v51  ;;  %v2608_v32 = vld [vmem:[#allocation8 + $0x370] sm:$0xff]  ;;  %v2609_v25 = vld [vmem:[#allocation8 + $0x378] sm:$0xff]  ;;  %v2634_v16 = vld [vmem:[#allocation9 + $0x40] sm:$0xff] }
 0x203   :  { %v1453_v21 = vrot.slane %v1452_v47, 1  ;;  %v1512_v28 = vmax.f32 %v1496_v45, 0.0  ;;  %v1513_v9 = vmax.f32 %v1497_v44, 0.0  ;;  %v1514_v62 = vmax.f32 %v1498_v42, 0.0  ;;  %2759 = vmatpush.msra.mxu1 %v2613_v0  ;;  %v2604_v1 = vld [vmem:[#allocation8 + $0x350] sm:$0xff]  ;;  %v2635_v20 = vld [vmem:[#allocation9 + $0x48] sm:$0xff]  ;;  %2740 = vmatpush.msra.mxu0 %v2608_v32 }
 0x204   :  { %v1515_v10 = vmax.f32 %v1499_v60, 0.0  ;;  %v1511_v38 = vmax.f32 %v1495_v18, 0.0  ;;  %v1516_v31 = vmax.f32 %v1500_v23, 0.0  ;;  %2871 = vmatpush.msrb.mxu2 %v2642_v8  ;;  %v1517_v40 = vmax.f32 %v1501_v14, 0.0  ;;  %2891 = vmatpush.msrb.mxu3 %v2643_v19  ;;  %v2605_v63 = vld [vmem:[#allocation8 + $0x358] sm:$0xff]  ;;  %v2630_v55 = vld [vmem:[#allocation9 + $0x20] sm:$0xff] }
 0x205   :  { %v1454_v7 = vmax.f32 %v1452_v47, %v1453_v21  ;;  %v1549_v58 = vrot.slane %v1512_v28, 7  ;;  %v1551_v29 = vrot.slane %v1513_v9, 6  ;;  %v1553_v56 = vrot.slane %v1514_v62, 5  ;;  %2760 = vmatpush.msra.mxu1 %v2609_v25  ;;  %v2600_v47 = vld [vmem:[#allocation8 + $0x330] sm:$0xff]  ;;  %2741 = vmatpush.msra.mxu0 %v2604_v1  ;;  %v2601_v44 = vld [vmem:[#allocation8 + $0x338] sm:$0xff]  ;;  %v2626_v23 = vld [vmem:[#allocation9] sm:$0xff] }
 0x206   :  { %2872 = vmatpush.msrb.mxu2 %v2638_v39  ;;  %v1555_v49 = vrot.slane %v1515_v10, 4  ;;  %2892 = vmatpush.msrb.mxu3 %v2639_v50  ;;  %v1557_v51 = vrot.slane %v1516_v31, 3  ;;  %v1559_v60 = vrot.slane %v1517_v40, 2  ;;  %v2596_v8 = vld [vmem:[#allocation8 + $0x310] sm:$0xff]  ;;  %v2627_v28 = vld [vmem:[#allocation9 + $0x8] sm:$0xff]  ;;  %v2597_v9 = vld [vmem:[#allocation8 + $0x318] sm:$0xff] }
 0x207   :  { %v1502_v35 = vadd.f32 %v1470_v59, %v1454_v7  ;;  %v1550_v46 = vsel %vm673_vm6, %v1549_v58, %v1511_v38  ;;  %2761 = vmatpush.msra.mxu1 %v2605_v63  ;;  %2742 = vmatpush.msra.mxu0 %v2600_v47  ;;  %v6468_v62 = vmov 0.0   ;;  %v3879_v10 = vld [vmem:[#allocation8 + $0x3e0] sm:$0xff]  ;;  %v3880_v39 = vld [vmem:[#allocation8 + $0x3e8] sm:$0xff] }
 0x208   :  { %v1552_v5 = vsel %vm676_vm7, %v1551_v29, %v1550_v46  ;;  %2873 = vmatpush.msrb.mxu2 %v2634_v16  ;;  %2893 = vmatpush.msrb.mxu3 %v2635_v20  ;;  %v3881_v32 = vld [vmem:[#allocation8 + $0x3c0] sm:$0xff]  ;;  %v3882_v7 = vld [vmem:[#allocation8 + $0x3c8] sm:$0xff] }
 0x209   :  { %v1518_v18 = vmax.f32 %v1502_v35, 0.0  ;;  %v1554_v45 = vsel %vm679_vm8, %v1553_v56, %v1552_v5  ;;  %2762 = vmatpush.msra.mxu1 %v2601_v44  ;;  %2743 = vmatpush.msra.mxu0 %v2596_v8  ;;  %v3884_v38 = vld [vmem:[#allocation8 + $0x3a8] sm:$0xff]  ;;  %v3885_v31 = vld [vmem:[#allocation8 + $0x380] sm:$0xff] }
 0x20a   :  { %v1556_v42 = vsel %vm682_vm9, %v1555_v49, %v1554_v45  ;;  %2874 = vmatpush.msrb.mxu2 %v2630_v55  ;;  %2894 = vmatpush.msrb.mxu3 %v2631_v53  ;;  %v3886_v58 = vld [vmem:[#allocation8 + $0x388] sm:$0xff]  ;;  %v3887_v50 = vld [vmem:[#allocation8 + $0x360] sm:$0xff] }
 0x20b   :  { %v1558_v61 = vsel %vm685_vm10, %v1557_v51, %v1556_v42  ;;  %v1561_v21 = vrot.slane %v1518_v18, 1  ;;  %2763 = vmatpush.msra.mxu1 %v2597_v9  ;;  %v3888_v25 = vld [vmem:[#allocation8 + $0x368] sm:$0xff]  ;;  %v3889_v40 = vld [vmem:[#allocation8 + $0x340] sm:$0xff] }
 0x20c   :  { %v1560_v14 = vsel %vm688_vm11, %v1559_v60, %v1558_v61  ;;  %2875 = vmatpush.msrb.mxu2 %v2626_v23  ;;  %2895 = vmatpush.msrb.mxu3 %v2627_v28  ;;  %v3890_v29 = vld [vmem:[#allocation8 + $0x348] sm:$0xff]  ;;  %v3891_v16 = vld [vmem:[#allocation8 + $0x320] sm:$0xff] }
 0x20d   :  { %v1562_v19 = vsel %vm691_vm12, %v1561_v21, %v1560_v14  ;;  %2876 = vmatmul.f32.vlgmr.msrb.gmra.mxu2 %v6468_v62  ;;  %2896 = vmatmul.f32.vlgmr.msrb.gmra.mxu3 %v6468_v62  ;;  %v3892_v1 = vld [vmem:[#allocation8 + $0x328] sm:$0xff]  ;;  %v3893_v35 = vld [vmem:[#allocation8 + $0x300] sm:$0xff] }
 0x20e   :  { %v5185_v0 = vadd.f32 %v1562_v19, %v5160_v3  ;;  %v5188_v59 = vmax.f32 %v5160_v3, %v1562_v19  ;;  %1909 = vmatmul.f32.gmra.mxu0 %v1562_v19  ;;  %1938 = vmatmul.f32.gmra.mxu1 %v1562_v19  ;;  %v3883_v3 = vld [vmem:[#allocation8 + $0x3a0] sm:$0xff]  ;;  %v3894_v46 = vld [vmem:[#allocation8 + $0x308] sm:$0xff] }
 0x20f   :  { %3024 = vmatpush.msra.mxu2 %v3879_v10  ;;  %3044 = vmatpush.msra.mxu3 %v3880_v39  ;;  %v3895_v56 = vld [vmem:[#allocation8 + $0x2e0] sm:$0xff]  ;;  %v3896_v20 = vld [vmem:[#allocation8 + $0x2e8] sm:$0xff] }
 0x210   :  { %v3897_v63 = vld [vmem:[#allocation8 + $0x2c0] sm:$0xff]  ;;  %v3898_v5 = vld [vmem:[#allocation8 + $0x2c8] sm:$0xff] }
 0x211   :  { %3025 = vmatpush.msra.mxu2 %v3881_v32  ;;  %3045 = vmatpush.msra.mxu3 %v3882_v7  ;;  %v3899_v49 = vld [vmem:[#allocation8 + $0x2a0] sm:$0xff]  ;;  %v3900_v55 = vld [vmem:[#allocation8 + $0x2a8] sm:$0xff] }
 0x212   :  { %v3901_v47 = vld [vmem:[#allocation8 + $0x280] sm:$0xff]  ;;  %v3902_v18 = vld [vmem:[#allocation8 + $0x288] sm:$0xff] }
 0x213   :  { %3026 = vmatpush.msra.mxu2 %v3883_v3  ;;  %3046 = vmatpush.msra.mxu3 %v3884_v38  ;;  %v3903_v45 = vld [vmem:[#allocation8 + $0x260] sm:$0xff]  ;;  %v3904_v51 = vld [vmem:[#allocation8 + $0x268] sm:$0xff] }
 0x214   :  { %v3905_v53 = vld [vmem:[#allocation8 + $0x240] sm:$0xff]  ;;  %v3906_v44 = vld [vmem:[#allocation8 + $0x248] sm:$0xff] }
 0x215   :  { %3027 = vmatpush.msra.mxu2 %v3885_v31  ;;  %3047 = vmatpush.msra.mxu3 %v3886_v58  ;;  %v3907_v42 = vld [vmem:[#allocation8 + $0x220] sm:$0xff]  ;;  %v3908_v60 = vld [vmem:[#allocation8 + $0x228] sm:$0xff] }
 0x216   :  { %v3909_v23 = vld [vmem:[#allocation8 + $0x200] sm:$0xff]  ;;  %v3910_v8 = vld [vmem:[#allocation8 + $0x208] sm:$0xff] }
 0x217   :  { %3028 = vmatpush.msra.mxu2 %v3887_v50  ;;  %3048 = vmatpush.msra.mxu3 %v3888_v25  ;;  %v3911_v61 = vld [vmem:[#allocation8 + $0x1e0] sm:$0xff]  ;;  %v3912_v21 = vld [vmem:[#allocation8 + $0x1e8] sm:$0xff] }
 0x218   :  { %v3913_v14 = vld [vmem:[#allocation8 + $0x1c0] sm:$0xff]  ;;  %v3914_v28 = vld [vmem:[#allocation8 + $0x1c8] sm:$0xff] }
 0x219   :  { %3029 = vmatpush.msra.mxu2 %v3889_v40  ;;  %3049 = vmatpush.msra.mxu3 %v3890_v29  ;;  %v3915_v19 = vld [vmem:[#allocation8 + $0x1a0] sm:$0xff]  ;;  %v3916_v9 = vld [vmem:[#allocation8 + $0x1a8] sm:$0xff] }
 0x21a   :  { %v3917_v10 = vld [vmem:[#allocation8 + $0x180] sm:$0xff]  ;;  %v3918_v39 = vld [vmem:[#allocation8 + $0x188] sm:$0xff] }
 0x21b   :  { %3030 = vmatpush.msra.mxu2 %v3891_v16  ;;  %3050 = vmatpush.msra.mxu3 %v3892_v1  ;;  %v3919_v32 = vld [vmem:[#allocation8 + $0x160] sm:$0xff]  ;;  %v3920_v7 = vld [vmem:[#allocation8 + $0x168] sm:$0xff]  ;;  %v2592_v16 = vld [vmem:[#allocation8 + $0x2f0] sm:$0xff] }
 0x21c   :  { %v3921_v3 = vld [vmem:[#allocation8 + $0x140] sm:$0xff]  ;;  %v3922_v38 = vld [vmem:[#allocation8 + $0x148] sm:$0xff]  ;;  %v2593_v1 = vld [vmem:[#allocation8 + $0x2f8] sm:$0xff]  ;;  %2744 = vmatpush.msra.mxu0 %v2592_v16 }
 0x21d   :  { %3031 = vmatpush.msra.mxu2 %v3893_v35  ;;  %3051 = vmatpush.msra.mxu3 %v3894_v46  ;;  %v3923_v31 = vld [vmem:[#allocation8 + $0x120] sm:$0xff]  ;;  %v3924_v58 = vld [vmem:[#allocation8 + $0x128] sm:$0xff]  ;;  %v2588_v35 = vld [vmem:[#allocation8 + $0x2d0] sm:$0xff] }
 0x21e   :  { %v3925_v50 = vld [vmem:[#allocation8 + $0x100] sm:$0xff]  ;;  %v3926_v25 = vld [vmem:[#allocation8 + $0x108] sm:$0xff]  ;;  %2764 = vmatpush.msra.mxu1 %v2593_v1  ;;  %v2589_v46 = vld [vmem:[#allocation8 + $0x2d8] sm:$0xff]  ;;  %2745 = vmatpush.msra.mxu0 %v2588_v35 }
 0x21f   :  { %3032 = vmatpush.msra.mxu2 %v3895_v56  ;;  %3052 = vmatpush.msra.mxu3 %v3896_v20  ;;  %v3927_v40 = vld [vmem:[#allocation8 + $0xe0] sm:$0xff]  ;;  %v3928_v29 = vld [vmem:[#allocation8 + $0xe8] sm:$0xff]  ;;  %v2584_v56 = vld [vmem:[#allocation8 + $0x2b0] sm:$0xff] }
 0x220   :  { %v2585_v20 = vld [vmem:[#allocation8 + $0x2b8] sm:$0xff]  ;;  %2765 = vmatpush.msra.mxu1 %v2589_v46  ;;  %2746 = vmatpush.msra.mxu0 %v2584_v56 }
 0x221   :  { %3033 = vmatpush.msra.mxu2 %v3897_v63  ;;  %3053 = vmatpush.msra.mxu3 %v3898_v5  ;;  %v2580_v63 = vld [vmem:[#allocation8 + $0x290] sm:$0xff]  ;;  %v6615_v56 = vld [vmem:[#allocation59_spill] sm:$0xff] }
 0x222   :  { %2766 = vmatpush.msra.mxu1 %v2585_v20  ;;  %v6602_v5 = vld [vmem:[#allocation82_spill] sm:$0xff]  ;;  %2747 = vmatpush.msra.mxu0 %v2580_v63  ;;  %v6616_v63 = vld [vmem:[#allocation53_spill] sm:$0xff] }
 0x223   :  { %3034 = vmatpush.msra.mxu2 %v3899_v49  ;;  %3054 = vmatpush.msra.mxu3 %v3900_v55  ;;  %v6603_v49 = vld [vmem:[#allocation83_spill] sm:$0xff]  ;;  %v2568_v55 = vld [vmem:[#allocation8 + $0x230] sm:$0xff] }
 0x224   :  { %v6614_v35 = vld [vmem:[#allocation54_spill] sm:$0xff] }
 0x225   :  { %3035 = vmatpush.msra.mxu2 %v3901_v47  ;;  %3055 = vmatpush.msra.mxu3 %v3902_v18  ;;  %v2569_v47 = vld [vmem:[#allocation8 + $0x238] sm:$0xff]  ;;  %v2564_v18 = vld [vmem:[#allocation8 + $0x210] sm:$0xff] }
 0x227   :  { %3036 = vmatpush.msra.mxu2 %v3903_v45  ;;  %3056 = vmatpush.msra.mxu3 %v3904_v51  ;;  %v2565_v45 = vld [vmem:[#allocation8 + $0x218] sm:$0xff]  ;;  %v2560_v51 = vld [vmem:[#allocation8 + $0x1f0] sm:$0xff] }
 0x229   :  { %3037 = vmatpush.msra.mxu2 %v3905_v53  ;;  %3057 = vmatpush.msra.mxu3 %v3906_v44  ;;  %v2561_v53 = vld [vmem:[#allocation8 + $0x1f8] sm:$0xff]  ;;  %v2556_v44 = vld [vmem:[#allocation8 + $0x1d0] sm:$0xff] }
 0x22b   :  { %3038 = vmatpush.msra.mxu2 %v3907_v42  ;;  %3058 = vmatpush.msra.mxu3 %v3908_v60  ;;  %v5211_v42 = vld [vmem:[%s6358_s9 + $0x1] ss:$0 sm:$0xff] }
 0x22d   :  { %3039 = vmatpush.msra.mxu2 %v3909_v23  ;;  %3059 = vmatpush.msra.mxu3 %v3910_v8 }
 0x22f   :  { %3108 = vmatpush.msrb.mxu2 %v3911_v61  ;;  %3128 = vmatpush.msrb.mxu3 %v3912_v21  ;;  %v6606_v61 = vld [vmem:[#allocation57_spill] sm:$0xff] }
 0x231   :  { %3109 = vmatpush.msrb.mxu2 %v3913_v14  ;;  %3129 = vmatpush.msrb.mxu3 %v3914_v28  ;;  %v6607_v14 = vld [vmem:[#allocation52_spill] sm:$0xff] }
 0x233   :  { %3110 = vmatpush.msrb.mxu2 %v3915_v19  ;;  %3130 = vmatpush.msrb.mxu3 %v3916_v9  ;;  %v6608_v19 = vld [vmem:[#allocation55_spill] sm:$0xff] }
 0x235   :  { %3111 = vmatpush.msrb.mxu2 %v3917_v10  ;;  %3131 = vmatpush.msrb.mxu3 %v3918_v39  ;;  %v6609_v10 = vld [vmem:[#allocation27_spill] sm:$0xff] }
 0x237   :  { %3112 = vmatpush.msrb.mxu2 %v3919_v32  ;;  %3132 = vmatpush.msrb.mxu3 %v3920_v7  ;;  %v6610_v32 = vld [vmem:[#allocation56_spill] sm:$0xff] }
 0x239   :  { %3113 = vmatpush.msrb.mxu2 %v3921_v3  ;;  %3133 = vmatpush.msrb.mxu3 %v3922_v38  ;;  %v6611_v3 = vld [vmem:[#allocation58_spill] sm:$0xff] }
 0x23b   :  { %3114 = vmatpush.msrb.mxu2 %v3923_v31  ;;  %3134 = vmatpush.msrb.mxu3 %v3924_v58  ;;  %v6612_v31 = vld [vmem:[#allocation65_spill] sm:$0xff] }
 0x23d   :  { %3115 = vmatpush.msrb.mxu2 %v3925_v50  ;;  %3135 = vmatpush.msrb.mxu3 %v3926_v25  ;;  %v6613_v50 = vld [vmem:[#allocation67_spill] sm:$0xff] }
 0x23f   :  { %3116 = vmatpush.msrb.mxu2 %v3927_v40  ;;  %3136 = vmatpush.msrb.mxu3 %v3928_v29 }
 0x241   :  { %3117 = vmatpush.msrb.mxu2 %v4927_v11  ;;  %3137 = vmatpush.msrb.mxu3 %v4929_v33  ;;  %v2581_v11 = vld [vmem:[#allocation8 + $0x298] sm:$0xff]  ;;  %v2576_v33 = vld [vmem:[#allocation8 + $0x270] sm:$0xff] }
 0x242   :  { %2767 = vmatpush.msra.mxu1 %v2581_v11  ;;  %2748 = vmatpush.msra.mxu0 %v2576_v33  ;;  %v6617_v33 = vld [vmem:[#allocation60_spill] sm:$0xff] }
 0x243   :  { %3118 = vmatpush.msrb.mxu2 %v4944_v6  ;;  %3138 = vmatpush.msrb.mxu3 %v4946_v27  ;;  %v2577_v6 = vld [vmem:[#allocation8 + $0x278] sm:$0xff]  ;;  %v6604_v27 = vld [vmem:[#allocation84_spill] sm:$0xff] }
 0x244   :  { %2768 = vmatpush.msra.mxu1 %v2577_v6 }
 0x245   :  { %3119 = vmatpush.msrb.mxu2 %v4970_v57  ;;  %3139 = vmatpush.msrb.mxu3 %v4972_v54  ;;  %v6605_v57 = vld [vmem:[#allocation85_spill] sm:$0xff] }
 0x246   :  { %v2572_v54 = vld [vmem:[#allocation8 + $0x250] sm:$0xff] }
 0x247   :  { %3120 = vmatpush.msrb.mxu2 %v4988_v17  ;;  %3140 = vmatpush.msrb.mxu3 %v6602_v5  ;;  %v2573_v17 = vld [vmem:[#allocation8 + $0x258] sm:$0xff] }
 0x248   :  { %2749 = vmatpush.msra.mxu0 %v2572_v54  ;;  %2769 = vmatpush.msra.mxu1 %v2573_v17  ;;  %v6618_v5 = vld [vmem:[#allocation63_spill] sm:$0xff]  ;;  %v6620_v54 = vld [vmem:[#allocation61_spill] sm:$0xff] }
 0x249   :  { %3121 = vmatpush.msrb.mxu2 %v6603_v49  ;;  %3141 = vmatpush.msrb.mxu3 %v6604_v27  ;;  %v6619_v27 = vld [vmem:[#allocation62_spill] sm:$0xff] }
 0x24a   :  { %2750 = vmatpush.msra.mxu0 %v2568_v55  ;;  %2770 = vmatpush.msra.mxu1 %v2569_v47  ;;  %v6621_v55 = vld [vmem:[#allocation64_spill] sm:$0xff] }
 0x24b   :  { %3122 = vmatpush.msrb.mxu2 %v6605_v57  ;;  %3142 = vmatpush.msrb.mxu3 %v5011_v12  ;;  %v2557_v12 = vld [vmem:[#allocation8 + $0x1d8] sm:$0xff] }
 0x24c   :  { %2751 = vmatpush.msra.mxu0 %v2564_v18  ;;  %2771 = vmatpush.msra.mxu1 %v2565_v45 }
 0x24d   :  { %3123 = vmatpush.msrb.mxu2 %v5020_v15  ;;  %3143 = vmatpush.msrb.mxu3 %v5022_v13  ;;  %v5206_v15 = vpop.f32.mrf.mxu2  ;;  %v1301_v13 = vpop.f32.mrf.mxu3 }
 0x24e   :  { %2820 = vmatpush.msrb.mxu0 %v2560_v51  ;;  %2840 = vmatpush.msrb.mxu1 %v2561_v53  ;;  %v5214_v60 = vadd.f32 %v5211_v42, %v1301_v13  ;;  %v1567_v21 = vadd.f32 %v5206_v15, %v6606_v61  ;;  %v1569_v28 = vadd.f32 %v5206_v15, %v6607_v14 }
 0x24f   :  { %v1571_v9 = vadd.f32 %v5206_v15, %v6608_v19  ;;  %v1573_v39 = vadd.f32 %v5206_v15, %v6609_v10  ;;  %v1575_v7 = vadd.f32 %v5206_v15, %v6610_v32  ;;  %v1577_v38 = vadd.f32 %v5206_v15, %v6611_v3  ;;  %v3931_v3 = vld [vmem:[#allocation9 + $0x1e8] sm:$0xff]  ;;  %v5534_v32 = vld [vmem:[#allocation9 + $0xd0] sm:$0xff]  ;;  %v5536_v10 = vld [vmem:[#allocation9 + $0xd8] sm:$0xff] }
 0x250   :  { %2821 = vmatpush.msrb.mxu0 %v2556_v44  ;;  %2841 = vmatpush.msrb.mxu1 %v2557_v12  ;;  %v1579_v58 = vadd.f32 %v5206_v15, %v6612_v31  ;;  %v1581_v25 = vadd.f32 %v5206_v15, %v6613_v50  ;;  %v6628_v31 = vrot.slane %v5214_v60, 2 }
 0x260   :  { %v5217_v8 = vpop.f32.mrf.mxu2 }
 0x261   :  { %v1568_v46 = vadd.f32 %v5217_v8, %v6614_v35  ;;  %v1570_v20 = vadd.f32 %v5217_v8, %v6615_v56  ;;  %v1572_v11 = vadd.f32 %v5217_v8, %v6616_v63  ;;  %v1574_v6 = vadd.f32 %v5217_v8, %v6617_v33  ;;  %v2548_v63 = vld [vmem:[#allocation8 + $0x190] sm:$0xff] }
 0x262   :  { %v1576_v49 = vadd.f32 %v5217_v8, %v6618_v5  ;;  %v1578_v57 = vadd.f32 %v5217_v8, %v6619_v27  ;;  %v1580_v17 = vadd.f32 %v5217_v8, %v6620_v54  ;;  %v1582_v47 = vadd.f32 %v5217_v8, %v6621_v55  ;;  %v2552_v54 = vld [vmem:[#allocation8 + $0x1b0] sm:$0xff]  ;;  %v2553_v5 = vld [vmem:[#allocation8 + $0x1b8] sm:$0xff] }
 0x263   :  { %v1599_v18 = vmax.f32 %v1567_v21, %v1568_v46  ;;  %v1606_v45 = vmax.f32 %v1569_v28, %v1570_v20  ;;  %v1613_v51 = vmax.f32 %v1571_v9, %v1572_v11  ;;  %v1620_v53 = vmax.f32 %v1573_v39, %v1574_v6  ;;  %2822 = vmatpush.msrb.mxu0 %v2552_v54 }
 0x264   :  { %v1627_v44 = vmax.f32 %v1575_v7, %v1576_v49  ;;  %v1634_v12 = vmax.f32 %v1577_v38, %v1578_v57  ;;  %v1641_v13 = vmax.f32 %v1579_v58, %v1580_v17  ;;  %v1648_v62 = vmax.f32 %v1581_v25, %v1582_v47  ;;  %v6622_v49 = vld [vmem:[#allocation68_spill] sm:$0xff]  ;;  %v6623_v17 = vld [vmem:[#allocation30_spill] sm:$0xff]  ;;  %2842 = vmatpush.msrb.mxu1 %v2553_v5 }
 0x265   :  { %v1600_v23 = vrot.slane %v1599_v18, 4  ;;  %v1607_v1 = vrot.slane %v1606_v45, 4  ;;  %v1614_v16 = vrot.slane %v1613_v51, 4  ;;  %v1621_v29 = vrot.slane %v1620_v53, 4  ;;  %2823 = vmatpush.msrb.mxu0 %v2548_v63 }
 0x266   :  { %v1628_v40 = vrot.slane %v1627_v44, 4  ;;  %v1635_v27 = vrot.slane %v1634_v12, 4  ;;  %v1642_v7 = vrot.slane %v1641_v13, 4  ;;  %v1649_v38 = vrot.slane %v1648_v62, 4 }
 0x267   :  { %v1601_v33 = vmax.f32 %v1599_v18, %v1600_v23  ;;  %v1608_v55 = vmax.f32 %v1606_v45, %v1607_v1  ;;  %v1615_v21 = vmax.f32 %v1613_v51, %v1614_v16  ;;  %v1622_v28 = vmax.f32 %v1620_v53, %v1621_v29 }
 0x268   :  { %v1629_v9 = vmax.f32 %v1627_v44, %v1628_v40  ;;  %v1636_v39 = vmax.f32 %v1634_v12, %v1635_v27  ;;  %v5259_v57 = vadd.f32 %v5206_v15, %v6622_v49  ;;  %v5263_v23 = vadd.f32 %v5206_v15, %v6623_v17  ;;  %v6624_v17 = vld [vmem:[#allocation66_spill] sm:$0xff] }
 0x269   :  { %v1602_v58 = vrot.slane %v1601_v33, 2  ;;  %v1609_v25 = vrot.slane %v1608_v55, 2  ;;  %v1616_v46 = vrot.slane %v1615_v21, 2  ;;  %v1623_v20 = vrot.slane %v1622_v28, 2 }
 0x26a   :  { %v1630_v11 = vrot.slane %v1629_v9, 2  ;;  %v1637_v6 = vrot.slane %v1636_v39, 2  ;;  %v1643_v18 = vmax.f32 %v1641_v13, %v1642_v7  ;;  %v1650_v45 = vmax.f32 %v1648_v62, %v1649_v38  ;;  %v6625_v62 = vld [vmem:[#allocation75_spill] sm:$0xff]  ;;  %v2544_v7 = vld [vmem:[#allocation8 + $0x170] sm:$0xff] }
 0x26b   :  { %v1603_v16 = vmax.f32 %v1601_v33, %v1602_v58  ;;  %v1610_v29 = vmax.f32 %v1608_v55, %v1609_v25  ;;  %v1617_v40 = vmax.f32 %v1615_v21, %v1616_v46  ;;  %v1624_v1 = vmax.f32 %v1622_v28, %v1623_v20  ;;  %v2549_v55 = vld [vmem:[#allocation8 + $0x198] sm:$0xff]  ;;  %2824 = vmatpush.msrb.mxu0 %v2544_v7 }
 0x26c   :  { %v1631_v27 = vmax.f32 %v1629_v9, %v1630_v11  ;;  %v1638_v47 = vmax.f32 %v1636_v39, %v1637_v6  ;;  %v1644_v50 = vrot.slane %v1643_v18, 2  ;;  %v5267_v33 = vadd.f32 %v5206_v15, %v6624_v17  ;;  %v6626_v9 = vld [vmem:[#allocation78_spill] sm:$0xff]  ;;  %2843 = vmatpush.msrb.mxu1 %v2549_v55  ;;  %v6632_v55 = vld [vmem:[#allocation33_spill] sm:$0xff] }
 0x26d   :  { %v1604_v51 = vrot.slane %v1603_v16, 1  ;;  %v1611_v53 = vrot.slane %v1610_v29, 1  ;;  %v1618_v44 = vrot.slane %v1617_v40, 1  ;;  %v1625_v12 = vrot.slane %v1624_v1, 1  ;;  %v2545_v38 = vld [vmem:[#allocation8 + $0x178] sm:$0xff] }
 0x26e   :  { %v1632_v56 = vrot.slane %v1631_v27, 1  ;;  %v1639_v35 = vrot.slane %v1638_v47, 1  ;;  %v1651_v13 = vrot.slane %v1650_v45, 2  ;;  %v5271_v28 = vadd.f32 %v5206_v15, %v6625_v62  ;;  %2844 = vmatpush.msrb.mxu1 %v2545_v38  ;;  %v6633_v38 = vld [vmem:[#allocation74_spill] sm:$0xff] }
 0x26f   :  { %v1605_v21 = vmax.f32 %v1603_v16, %v1604_v51  ;;  %v5275_v39 = vadd.f32 %v5206_v15, %v6626_v9  ;;  %v1612_v58 = vmax.f32 %v1610_v29, %v1611_v53  ;;  %v1619_v25 = vmax.f32 %v1617_v40, %v1618_v44  ;;  %v2540_v16 = vld [vmem:[#allocation8 + $0x150] sm:$0xff]  ;;  %v2541_v51 = vld [vmem:[#allocation8 + $0x158] sm:$0xff] }
 0x270   :  { %v1626_v46 = vmax.f32 %v1624_v1, %v1625_v12  ;;  %v1633_v20 = vmax.f32 %v1631_v27, %v1632_v56  ;;  %v1640_v5 = vmax.f32 %v1638_v47, %v1639_v35  ;;  %v1645_v54 = vmax.f32 %v1643_v18, %v1644_v50  ;;  %v2536_v18 = vld [vmem:[#allocation8 + $0x130] sm:$0xff]  ;;  %2825 = vmatpush.msrb.mxu0 %v2540_v16 }
 0x271   :  { %v1652_v11 = vmax.f32 %v1650_v45, %v1651_v13  ;;  %v1719_v6 = vrot.slane %v5214_v60, 7  ;;  %v1743_v62 = vadd.f32 %v1605_v21, %v5214_v60  ;;  %v6627_v9 = vrot.slane %v5214_v60, 1  ;;  %v2537_v45 = vld [vmem:[#allocation8 + $0x138] sm:$0xff]  ;;  %2845 = vmatpush.msrb.mxu1 %v2541_v51 }
 0x272   :  { %v1745_v29 = vadd.f32 %v6628_v31, %v1619_v25  ;;  %v6629_v40 = vrot.slane %v5214_v60, 3  ;;  %v1646_v35 = vrot.slane %v1645_v54, 1  ;;  %v6630_v63 = vrot.slane %v5214_v60, 4  ;;  %v2532_v25 = vld [vmem:[#allocation8 + $0x110] sm:$0xff]  ;;  %2826 = vmatpush.msrb.mxu0 %v2536_v18 }
 0x273   :  { %v1744_v17 = vadd.f32 %v6627_v9, %v1612_v58  ;;  %v1653_v50 = vrot.slane %v1652_v11, 1  ;;  %v6631_v27 = vrot.slane %v5214_v60, 5  ;;  %v1593_v31 = vadd.f32 %v5206_v15, %v6632_v55  ;;  %2846 = vmatpush.msrb.mxu1 %v2537_v45  ;;  %v6635_v51 = vld [vmem:[#allocation70_spill] sm:$0xff] }
 0x274   :  { %v1746_v56 = vadd.f32 %v6629_v40, %v1626_v46  ;;  %v1747_v1 = vadd.f32 %v6630_v63, %v1633_v20  ;;  %v1761_v44 = vmax.f32 %v1745_v29, 0.0  ;;  %v1647_v13 = vmax.f32 %v1645_v54, %v1646_v35  ;;  %v2533_v46 = vld [vmem:[#allocation8 + $0x118] sm:$0xff]  ;;  %2827 = vmatpush.msrb.mxu0 %v2532_v25 }
 0x275   :  { %v1748_v47 = vadd.f32 %v6631_v27, %v1640_v5  ;;  %v1760_v53 = vmax.f32 %v1744_v17, 0.0  ;;  %v1654_v9 = vmax.f32 %v1652_v11, %v1653_v50  ;;  %v1584_v58 = vadd.f32 %v5217_v8, %v6633_v38  ;;  %v2528_v50 = vld [vmem:[#allocation8 + $0xf0] sm:$0xff]  ;;  %v6636_v27 = vld [vmem:[#allocation72_spill] sm:$0xff]  ;;  %2847 = vmatpush.msrb.mxu1 %v2533_v46  ;;  %v5489_v55 = vld [vmem:[#allocation9 + $0x138] sm:$0xff] }
 0x276   :  { %v1762_v12 = vmax.f32 %v1746_v56, 0.0  ;;  %v5291_v21 = vpop.f32.mrf.mxu0  ;;  %v1763_v7 = vmax.f32 %v1747_v1, 0.0  ;;  %v1759_v20 = vmax.f32 %v1743_v62, 0.0  ;;  %v1793_v29 = vrot.slane %v1761_v44, 6  ;;  %v2529_v1 = vld [vmem:[#allocation8 + $0xf8] sm:$0xff]  ;;  %2828 = vmatpush.msrb.mxu0 %v2528_v50 }
 0x277   :  { %v1764_v5 = vmax.f32 %v1748_v47, 0.0  ;;  %v1791_v17 = vrot.slane %v1760_v53, 7  ;;  %v6634_v40 = vrot.slane %v5214_v60, 6  ;;  %v1750_v63 = vadd.f32 %v1719_v6, %v1654_v9  ;;  %v6637_v47 = vld [vmem:[#allocation69_spill] sm:$0xff]  ;;  %v6638_v53 = vld [vmem:[#allocation71_spill] sm:$0xff]  ;;  %2848 = vmatpush.msrb.mxu1 %v2529_v1 }
 0x278   :  { %v1795_v16 = vrot.slane %v1762_v12, 5  ;;  %v1586_v54 = vadd.f32 %v5217_v8, %v6635_v51  ;;  %v1797_v35 = vrot.slane %v1763_v7, 4  ;;  %v1588_v62 = vadd.f32 %v5217_v8, %v6636_v27  ;;  %v2524_v9 = vld [vmem:[#allocation8 + $0xd0] sm:$0xff]  ;;  %v2525_v7 = vld [vmem:[#allocation8 + $0xd8] sm:$0xff] }
 0x279   :  { %v1749_v56 = vadd.f32 %v6634_v40, %v1647_v13  ;;  %v1792_v11 = vsel %vm673_vm6, %v1791_v17, %v1759_v20  ;;  %v1590_v18 = vadd.f32 %v5217_v8, %v6637_v47  ;;  %v1766_v45 = vmax.f32 %v1750_v63, 0.0  ;;  %v6639_v20 = vld [vmem:[#allocation80_spill] sm:$0xff]  ;;  %2829 = vmatpush.msrb.mxu0 %v2524_v9  ;;  %2849 = vmatpush.msrb.mxu1 %v2525_v7  ;;  %v6641_v7 = vld [vmem:[#allocation41_spill] sm:$0xff] }
 0x27a   :  { %v1794_v6 = vsel %vm676_vm7, %v1793_v29, %v1792_v11  ;;  %v1592_v44 = vadd.f32 %v5217_v8, %v6638_v53  ;;  %v1799_v13 = vrot.slane %v1764_v5, 3  ;;  %v1594_v17 = vadd.f32 %v5217_v8, %v6639_v20  ;;  %v1304_v20 = vpop.f32.mrf.mxu3 }
 0x27b   :  { %v1765_v60 = vmax.f32 %v1749_v56, 0.0  ;;  %v1796_v12 = vsel %vm679_vm8, %v1795_v16, %v1794_v6  ;;  %v1655_v40 = vmax.f32 %v5259_v57, %v1584_v58  ;;  %v1803_v56 = vrot.slane %v1766_v45, 1  ;;  %v2520_v58 = vld [vmem:[#allocation8 + $0xb0] sm:$0xff]  ;;  %v2517_v45 = vld [vmem:[#allocation8 + $0x98] sm:$0xff] }
 0x27c   :  { %v1798_v25 = vsel %vm682_vm9, %v1797_v35, %v1796_v12  ;;  %v1662_v29 = vmax.f32 %v5263_v23, %v1586_v54  ;;  %v1669_v5 = vmax.f32 %v5267_v33, %v1588_v62  ;;  %v1676_v16 = vmax.f32 %v5271_v28, %v1590_v18  ;;  %v2521_v35 = vld [vmem:[#allocation8 + $0xb8] sm:$0xff]  ;;  %v6640_v54 = vld [vmem:[#allocation81_spill] sm:$0xff]  ;;  %2830 = vmatpush.msrb.mxu0 %v2520_v58 }
 0x27d   :  { %v1801_v46 = vrot.slane %v1765_v60, 2  ;;  %v1800_v63 = vsel %vm685_vm10, %v1799_v13, %v1798_v25  ;;  %v1656_v11 = vrot.slane %v1655_v40, 4  ;;  %v1683_v1 = vmax.f32 %v5275_v39, %v1592_v44  ;;  %v2516_v60 = vld [vmem:[#allocation8 + $0x90] sm:$0xff]  ;;  %2850 = vmatpush.msrb.mxu1 %v2521_v35 }
 0x27e   :  { %v1663_v50 = vrot.slane %v1662_v29, 4  ;;  %v1596_v33 = vadd.f32 %v5217_v8, %v6640_v54  ;;  %v1690_v28 = vmax.f32 %v1593_v31, %v1594_v17  ;;  %v1670_v13 = vrot.slane %v1669_v5, 4  ;;  %v6642_v31 = vld [vmem:[#allocation73_spill] sm:$0xff]  ;;  %2831 = vmatpush.msrb.mxu0 %v2516_v60  ;;  %v2513_v60 = vld [vmem:[#allocation8 + $0x78] sm:$0xff] }
 0x27f   :  { %v1802_v57 = vsel %vm688_vm11, %v1801_v46, %v1800_v63  ;;  %v1657_v62 = vmax.f32 %v1655_v40, %v1656_v11  ;;  %v1677_v9 = vrot.slane %v1676_v16, 4  ;;  %v1684_v39 = vrot.slane %v1683_v1, 4  ;;  %2851 = vmatpush.msrb.mxu1 %v2517_v45  ;;  %v6643_v6 = vld [vmem:[#allocation77_spill] sm:$0xff] }
 0x280   :  { %v5320_v23 = vsel %vm691_vm12, %v1803_v56, %v1802_v57  ;;  %v1664_v12 = vmax.f32 %v1662_v29, %v1663_v50  ;;  %v5329_v44 = vadd.f32 %v5211_v42, %v1304_v20  ;;  %v1968_v25 = vadd.f32 %v5291_v21, %v6641_v7  ;;  %v2508_v45 = vld [vmem:[#allocation8 + $0x50] sm:$0xff] }
 0x281   :  { %1912 = vmatmul.f32.gmra.mxu0 %v5320_v23  ;;  %1941 = vmatmul.f32.gmra.mxu1 %v5320_v23  ;;  %v1595_v17 = vadd.f32 %v5206_v15, %v6642_v31  ;;  %v1658_v40 = vrot.slane %v1657_v62, 2  ;;  %v1671_v56 = vmax.f32 %v1669_v5, %v1670_v13  ;;  %v1678_v63 = vmax.f32 %v1676_v16, %v1677_v9  ;;  %v5487_v31 = vld [vmem:[#allocation9 + $0x130] sm:$0xff] }
 0x282   :  { %v1665_v46 = vrot.slane %v1664_v12, 2  ;;  %v1685_v11 = vmax.f32 %v1683_v1, %v1684_v39  ;;  %v1691_v20 = vrot.slane %v1690_v28, 4  ;;  %v1598_v54 = vadd.f32 %v5217_v8, %v6643_v6  ;;  %2852 = vmatpush.msrb.mxu1 %v2513_v60 }
 0x283   :  { %v1659_v42 = vmax.f32 %v1657_v62, %v1658_v40  ;;  %v1697_v57 = vmax.f32 %v1595_v17, %v1596_v33  ;;  %v1672_v7 = vrot.slane %v1671_v56, 2  ;;  %v1679_v58 = vrot.slane %v1678_v63, 2 }
 0x284   :  { %v1666_v50 = vmax.f32 %v1664_v12, %v1665_v46  ;;  %v1686_v35 = vrot.slane %v1685_v11, 2  ;;  %v1692_v47 = vmax.f32 %v1690_v28, %v1691_v20  ;;  %v6644_v33 = vrot.slane %v5185_v0, 4  ;;  %v6645_v12 = vld [vmem:[#allocation76_spill] sm:$0xff]  ;;  %v2509_v28 = vld [vmem:[#allocation8 + $0x58] sm:$0xff] }
 0x285   :  { %v1660_v53 = vrot.slane %v1659_v42, 1  ;;  %v1698_v5 = vrot.slane %v1697_v57, 4  ;;  %v1673_v1 = vmax.f32 %v1671_v56, %v1672_v7  ;;  %v1680_v13 = vmax.f32 %v1678_v63, %v1679_v58  ;;  %v2505_v20 = vld [vmem:[#allocation8 + $0x38] sm:$0xff]  ;;  %2853 = vmatpush.msrb.mxu1 %v2509_v28 }
 0x286   :  { %v1667_v16 = vrot.slane %v1666_v50, 1  ;;  %v1687_v9 = vmax.f32 %v1685_v11, %v1686_v35  ;;  %v5342_v62 = vadd.f32 %v6644_v33, %v5185_v0  ;;  %v1597_v39 = vadd.f32 %v5206_v15, %v6645_v12  ;;  %v2504_v11 = vld [vmem:[#allocation8 + $0x30] sm:$0xff] }
 0x287   :  { %v1693_v17 = vrot.slane %v1692_v47, 2  ;;  %v1699_v8 = vmax.f32 %v1697_v57, %v1698_v5  ;;  %v1674_v46 = vrot.slane %v1673_v1, 1  ;;  %v1681_v56 = vrot.slane %v1680_v13, 1  ;;  %2854 = vmatpush.msrb.mxu1 %v2505_v20 }
 0x288   :  { %v1688_v63 = vrot.slane %v1687_v9, 1  ;;  %v6646_v7 = vrot.slane %v5188_v59, 4  ;;  %v1704_v33 = vmax.f32 %v1597_v39, %v1598_v54  ;;  %v1661_v15 = vmax.f32 %v1659_v42, %v1660_v53 }
 0x289   :  { %v1694_v0 = vmax.f32 %v1692_v47, %v1693_v17  ;;  %v1700_v35 = vrot.slane %v1699_v8, 2  ;;  %v1668_v57 = vmax.f32 %v1666_v50, %v1667_v16  ;;  %v1675_v5 = vmax.f32 %v1673_v1, %v1674_v46 }
 0x28a   :  { %v5349_v58 = vmax.f32 %v5188_v59, %v6646_v7  ;;  %v1682_v60 = vmax.f32 %v1680_v13, %v1681_v56  ;;  %v1705_v51 = vrot.slane %v1704_v33, 4  ;;  %v1689_v7 = vmax.f32 %v1687_v9, %v1688_v63 }
 0x28b   :  { %v5324_v18 = vpop.f32.mrf.mxu0  ;;  %v1695_v6 = vrot.slane %v1694_v0, 1  ;;  %v1701_v27 = vmax.f32 %v1699_v8, %v1700_v35  ;;  %v1721_v47 = vrot.slane %v5329_v44, 2  ;;  %v1722_v54 = vrot.slane %v5329_v44, 3 }
 0x28c   :  { %v1969_v29 = vadd.f32 %v5324_v18, %v6594_v48  ;;  %v2512_v48 = vld [vmem:[#allocation8 + $0x70] sm:$0xff]  ;;  %v1706_v42 = vmax.f32 %v1704_v33, %v1705_v51  ;;  %v1723_v50 = vrot.slane %v5329_v44, 4  ;;  %v1724_v16 = vrot.slane %v5329_v44, 5 }
 0x28d   :  { %2832 = vmatpush.msrb.mxu0 %v2512_v48  ;;  %v2501_v48 = vld [vmem:[#allocation8 + $0x18] sm:$0xff]  ;;  %v1702_v53 = vrot.slane %v1701_v27, 1  ;;  %v1751_v1 = vadd.f32 %v1661_v15, %v5329_v44  ;;  %v1753_v39 = vadd.f32 %v1721_v47, %v1675_v5  ;;  %v1725_v9 = vrot.slane %v5329_v44, 6 }
 0x28e   :  { %v2040_v40 = vmax.f32 %v1968_v25, %v1969_v29  ;;  %v1720_v25 = vrot.slane %v5329_v44, 1  ;;  %v2500_v29 = vld [vmem:[#allocation8 + $0x10] sm:$0xff]  ;;  %2855 = vmatpush.msrb.mxu1 %v2501_v48  ;;  %v1707_v8 = vrot.slane %v1706_v42, 2  ;;  %v1754_v28 = vadd.f32 %v1722_v54, %v1682_v60 }
 0x28f   :  { %2833 = vmatpush.msrb.mxu0 %v2508_v45  ;;  %v1696_v45 = vmax.f32 %v1694_v0, %v1695_v6  ;;  %v1703_v17 = vmax.f32 %v1701_v27, %v1702_v53  ;;  %v1755_v56 = vadd.f32 %v1723_v50, %v1689_v7  ;;  %v1769_v20 = vmax.f32 %v1753_v39, 0.0  ;;  %v1936_v53 = vpop.f32.mrf.mxu1 }
 0x290   :  { %v2041_v59 = vrot.slane %v2040_v40, 4  ;;  %v1752_v13 = vadd.f32 %v1720_v25, %v1668_v57  ;;  %v1708_v51 = vmax.f32 %v1706_v42, %v1707_v8  ;;  %v1770_v0 = vmax.f32 %v1754_v28, 0.0 }
 0x291   :  { %2834 = vmatpush.msrb.mxu0 %v2504_v11  ;;  %v1756_v6 = vadd.f32 %v1724_v16, %v1696_v45  ;;  %v1757_v11 = vadd.f32 %v1725_v9, %v1703_v17  ;;  %v1767_v35 = vmax.f32 %v1751_v1, 0.0  ;;  %v1771_v33 = vmax.f32 %v1755_v56, 0.0 }
 0x292   :  { %v2042_v46 = vmax.f32 %v2040_v40, %v2041_v59  ;;  %v1768_v63 = vmax.f32 %v1752_v13, 0.0  ;;  %v1830_v15 = vrot.slane %v5342_v62, 2  ;;  %v1846_v27 = vrot.slane %v5349_v58, 2 }
 0x293   :  { %2835 = vmatpush.msrb.mxu0 %v2500_v29  ;;  %v1772_v29 = vmax.f32 %v1756_v6, 0.0  ;;  %v1709_v57 = vrot.slane %v1708_v51, 1  ;;  %v1807_v5 = vrot.slane %v1769_v20, 6  ;;  %v1773_v60 = vmax.f32 %v1757_v11, 0.0 }
 0x294   :  { %v1805_v48 = vrot.slane %v1768_v63, 7  ;;  %v2043_v25 = vrot.slane %v2042_v46, 2  ;;  %v1809_v59 = vrot.slane %v1770_v0, 5  ;;  %v1726_v47 = vrot.slane %v5329_v44, 7 }
 0x295   :  { %v1710_v7 = vmax.f32 %v1708_v51, %v1709_v57  ;;  %v1811_v45 = vrot.slane %v1771_v33, 4  ;;  %v1813_v50 = vrot.slane %v1772_v29, 3  ;;  %v1831_v16 = vadd.f32 %v1830_v15, %v5342_v62  ;;  %v6647_v15 = vld [vmem:[#allocation26_spill] sm:$0xff] }
 0x296   :  { %v1806_v40 = vsel %vm673_vm6, %v1805_v48, %v1767_v35  ;;  %v1815_v17 = vrot.slane %v1773_v60, 2  ;;  %v2044_v8 = vmax.f32 %v2042_v46, %v2043_v25  ;;  %v1847_v28 = vmax.f32 %v5349_v58, %v1846_v27  ;;  %v1857_v58 = vld [vmem:[%s6358_s9 + $0x2] ss:$0 sm:$0xff] }
 0x297   :  { %v1808_v54 = vsel %vm676_vm7, %v1807_v5, %v1806_v40  ;;  %v1758_v1 = vadd.f32 %v1726_v47, %v1710_v7  ;;  %v1832_v6 = vrot.slane %v1831_v16, 1  ;;  %v1953_v46 = vadd.f32 %v5324_v18, %v4526_v52  ;;  %v1939_v35 = vpop.f32.mrf.mxu1  ;;  %v6648_v5 = vld [vmem:[#allocation24_spill] sm:$0xff]  ;;  %v6650_v7 = vld [vmem:[#allocation23_spill] sm:$0xff] }
 0x298   :  { %v1810_v42 = vsel %vm679_vm8, %v1809_v59, %v1808_v54  ;;  %v2045_v63 = vrot.slane %v2044_v8, 1  ;;  %v1848_v11 = vrot.slane %v1847_v28, 1  ;;  %v1955_v48 = vadd.f32 %v5324_v18, %v4578_v24  ;;  %v6649_v40 = vld [vmem:[#allocation20_spill] sm:$0xff] }
 0x299   :  { %v1812_v13 = vsel %vm682_vm9, %v1811_v45, %v1810_v42  ;;  %v1774_v9 = vmax.f32 %v1758_v1, 0.0  ;;  %v1833_v0 = vadd.f32 %v1832_v6, %v1831_v16  ;;  %v1957_v27 = vadd.f32 %v5324_v18, %v6647_v15  ;;  %v5394_v1 = vld [vmem:[#allocation9 + $0x1f0] sm:$0xff]  ;;  %v5421_v15 = vld [vmem:[#allocation9 + $0x1b8] sm:$0xff] }
 0x29a   :  { %v1814_v39 = vsel %vm685_vm10, %v1813_v50, %v1812_v13  ;;  %v1849_v57 = vmax.f32 %v1847_v28, %v1848_v11  ;;  %v1952_v25 = vadd.f32 %v5291_v21, %v6648_v5  ;;  %v1954_v59 = vadd.f32 %v5291_v21, %v6649_v40  ;;  %v5396_v13 = vld [vmem:[#allocation9 + $0x1f8] sm:$0xff] }
 0x29b   :  { %v1816_v44 = vsel %vm688_vm11, %v1815_v17, %v1814_v39  ;;  %v1817_v56 = vrot.slane %v1774_v9, 1  ;;  %v1956_v47 = vadd.f32 %v5291_v21, %v6650_v7  ;;  %v5387_v54 = vadd.f32 %v1936_v53, %v1857_v58  ;;  %v6651_v9 = vld [vmem:[#allocation29_spill] sm:$0xff]  ;;  %v6652_v28 = vld [vmem:[#allocation31_spill] sm:$0xff] }
 0x29c   :  { %v5389_v45 = vadd.f32 %v1939_v35, %v1857_v58  ;;  %v5392_v24 = vmul.f32 %v1833_v0, %v4892_v2  ;;  %v1984_v42 = vmax.f32 %v1952_v25, %v1953_v46  ;;  %v1991_v39 = vmax.f32 %v1954_v59, %v1955_v48  ;;  %v5409_v11 = vld [vmem:[#allocation9 + $0x1d8] sm:$0xff]  ;;  %v6653_v0 = vld [vmem:[#allocation28_spill] sm:$0xff]  ;;  %v6654_v58 = vld [vmem:[#allocation21_spill] sm:$0xff] }
 0x29d   :  { %v1818_v51 = vsel %vm691_vm12, %v1817_v56, %v1816_v44  ;;  %v1998_v17 = vmax.f32 %v1956_v47, %v1957_v27  ;;  %v1959_v53 = vadd.f32 %v5324_v18, %v6651_v9  ;;  %v1961_v44 = vadd.f32 %v5324_v18, %v6652_v28  ;;  %v5419_v48 = vld [vmem:[#allocation9 + $0x1b0] sm:$0xff] }
 0x29e   :  { %v1834_v62 = vadd.f32 %v1818_v51, %v5320_v23  ;;  %v1850_v20 = vmax.f32 %v5320_v23, %v1818_v51  ;;  %1915 = vmatmul.f32.gmra.mxu0 %v1818_v51  ;;  %1944 = vmatmul.f32.gmra.mxu1 %v1818_v51  ;;  %v2046_v23 = vmax.f32 %v2044_v8, %v2045_v63  ;;  %v1985_v56 = vrot.slane %v1984_v42, 4  ;;  %v5407_v51 = vld [vmem:[#allocation9 + $0x1d0] sm:$0xff] }
 0x29f   :  { %v1958_v46 = vadd.f32 %v5291_v21, %v6653_v0  ;;  %v1960_v35 = vadd.f32 %v5291_v21, %v6654_v58  ;;  %v6659_v58 = vld [vmem:[#allocation37_spill] sm:$0xff]  ;;  %v5477_v0 = vadd.f32 %v5324_v18, %v6597_v22  ;;  %v3930_v22 = vld [vmem:[#allocation9 + $0x1e0] sm:$0xff]  ;;  %v5548_v38 = vadd.f32 %v5324_v18, %v4710_v26 }
 0x2a0   :  { %v1835_v33 = vrot.slane %v1834_v62, 4  ;;  %v1851_v29 = vrot.slane %v1850_v20, 4  ;;  %v5399_v8 = vadd.f32 %v2046_v23, %v5389_v45  ;;  %v6656_v23 = vld [vmem:[#allocation34_spill] sm:$0xff]  ;;  %v1986_v25 = vmax.f32 %v1984_v42, %v1985_v56 }
 0x2a1   :  { %v1963_v5 = vadd.f32 %v5324_v18, %v6656_v23  ;;  %v2005_v7 = vmax.f32 %v1958_v46, %v1959_v53  ;;  %v2012_v28 = vmax.f32 %v1960_v35, %v1961_v44  ;;  %v5435_v42 = vld [vmem:[#allocation9 + $0x190] sm:$0xff]  ;;  %v5437_v56 = vld [vmem:[#allocation9 + $0x198] sm:$0xff]  ;;  %v6660_v53 = vld [vmem:[#allocation36_spill] sm:$0xff]  ;;  %v1971_v46 = vadd.f32 %v5324_v18, %v6595_v37 }
 0x2a2   :  { %v1836_v60 = vadd.f32 %v1835_v33, %v1834_v62  ;;  %v1852_v52 = vmax.f32 %v1850_v20, %v1851_v29  ;;  %v1992_v62 = vrot.slane %v1991_v39, 4  ;;  %v1999_v20 = vrot.slane %v1998_v17, 4  ;;  %v6655_v33 = vld [vmem:[#allocation32_spill] sm:$0xff]  ;;  %v6662_v23 = vld [vmem:[#allocation22_spill] sm:$0xff]  ;;  %v6663_v37 = vld [vmem:[#allocation43_spill] sm:$0xff] }
 0x2a3   :  { %v1962_v29 = vadd.f32 %v5291_v21, %v6655_v33  ;;  %v1987_v35 = vrot.slane %v1986_v25, 2  ;;  %v5452_v33 = vld [vmem:[#allocation9 + $0x170] sm:$0xff] }
 0x2a4   :  { %v1837_v50 = vrot.slane %v1836_v60, 2  ;;  %v1853_v16 = vrot.slane %v1852_v52, 2  ;;  %v1993_v59 = vmax.f32 %v1991_v39, %v1992_v62  ;;  %v2000_v9 = vmax.f32 %v1998_v17, %v1999_v20  ;;  %v6661_v62 = vld [vmem:[#allocation40_spill] sm:$0xff] }
 0x2a5   :  { %v1966_v39 = vadd.f32 %v5291_v21, %v6659_v58  ;;  %v1970_v17 = vadd.f32 %v5291_v21, %v6661_v62  ;;  %v2013_v58 = vrot.slane %v2012_v28, 4 }
 0x2a6   :  { %v1838_v6 = vadd.f32 %v1837_v50, %v1836_v60  ;;  %v1854_v63 = vmax.f32 %v1852_v52, %v1853_v16  ;;  %2752 = vmatmul.f32.vlgmr.msra.gmra.mxu0 %v5119_v36  ;;  %2772 = vmatmul.f32.vlgmr.msra.gmra.mxu1 %v5119_v36  ;;  %v6657_v52 = vld [vmem:[#allocation35_spill] sm:$0xff]  ;;  %v6658_v50 = vld [vmem:[#allocation38_spill] sm:$0xff] }
 0x2a7   :  { %2900 = vmatpush.msra.mxu0 %v5394_v1  ;;  %2920 = vmatpush.msra.mxu1 %v5396_v13  ;;  %v1964_v40 = vadd.f32 %v5291_v21, %v6657_v52  ;;  %v1965_v16 = vadd.f32 %v5324_v18, %v6658_v50  ;;  %v5458_v52 = vadd.f32 %v5291_v21, %v6662_v23  ;;  %v2001_v50 = vrot.slane %v2000_v9, 2  ;;  %v5473_v23 = vld [vmem:[#allocation9 + $0x158] sm:$0xff] }
 0x2a8   :  { %v1855_v36 = vrot.slane %v1854_v63, 1  ;;  %v1839_v27 = vrot.slane %v1838_v6, 1  ;;  %v6664_v60 = vld [vmem:[#allocation46_spill] sm:$0xff]  ;;  %v2014_v62 = vmax.f32 %v2012_v28, %v2013_v58 }
 0x2a9   :  { %2901 = vmatpush.msra.mxu0 %v5407_v51  ;;  %2921 = vmatpush.msra.mxu1 %v5409_v11 }
 0x2aa   :  { %v1856_v47 = vmax.f32 %v1854_v63, %v1855_v36  ;;  %v1967_v63 = vadd.f32 %v5324_v18, %v6660_v53  ;;  %v1840_v20 = vadd.f32 %v1839_v27, %v1838_v6  ;;  %v5454_v36 = vld [vmem:[#allocation9 + $0x178] sm:$0xff]  ;;  %v1994_v6 = vrot.slane %v1993_v59, 2 }
 0x2ab   :  { %2902 = vmatpush.msra.mxu0 %v5419_v48  ;;  %2922 = vmatpush.msra.mxu1 %v5421_v15  ;;  %v2006_v27 = vrot.slane %v2005_v7, 4  ;;  %v2019_v53 = vmax.f32 %v1962_v29, %v1963_v5 }
 0x2ac   :  { %v5446_v44 = vsel %vm673_vm6, %v1856_v47, %v1849_v57  ;;  %v1973_v57 = vadd.f32 %v5324_v18, %v6596_v30  ;;  %v5466_v47 = vadd.f32 %v5291_v21, %v6663_v37  ;;  %v5471_v30 = vld [vmem:[#allocation9 + $0x150] sm:$0xff]  ;;  %v5481_v37 = vadd.f32 %v5291_v21, %v6664_v60 }
 0x2ad   :  { %3040 = vmatmul.f32.vlgmr.msra.gmra.mxu2 %v5446_v44  ;;  %3060 = vmatmul.f32.vlgmr.msra.gmra.mxu3 %v5446_v44  ;;  %v2007_v12 = vmax.f32 %v2005_v7, %v2006_v27  ;;  %v1842_v5 = vmul.f32 %v1840_v20, %v4892_v2  ;;  %v5493_v60 = vadd.f32 %v5324_v18, %v6598_v43  ;;  %v6665_v7 = vld [vmem:[#allocation49_spill] sm:$0xff]  ;;  %v2020_v28 = vrot.slane %v2019_v53, 4  ;;  %v3932_v43 = vld [vmem:[#allocation9 + $0x1c0] sm:$0xff] }
 0x2ae   :  { %2903 = vmatpush.msra.mxu0 %v5435_v42  ;;  %2923 = vmatpush.msra.mxu1 %v5437_v56  ;;  %v5497_v20 = vadd.f32 %v5291_v21, %v6665_v7  ;;  %v1995_v27 = vmax.f32 %v1993_v59, %v1994_v6  ;;  %v2033_v58 = vmax.f32 %v1966_v39, %v1967_v63  ;;  %v3933_v2 = vld [vmem:[#allocation9 + $0x1c8] sm:$0xff]  ;;  %v5523_v63 = vld [vmem:[#allocation9 + $0xf8] sm:$0xff] }
 0x2af   :  { %2836 = vmatmul.f32.vlgmr.msrb.gmra.mxu0 %v5148_v4  ;;  %2856 = vmatmul.f32.vlgmr.msrb.gmra.mxu1 %v5148_v4  ;;  %v1988_v4 = vmax.f32 %v1986_v25, %v1987_v35  ;;  %v2008_v29 = vrot.slane %v2007_v12, 2  ;;  %v2002_v25 = vmax.f32 %v2000_v9, %v2001_v50  ;;  %v2026_v35 = vmax.f32 %v1964_v40, %v1965_v16  ;;  %v6666_v6 = vld [vmem:[#allocation25_spill] sm:$0xff] }
 0x2b0   :  { %2904 = vmatpush.msra.mxu0 %v5452_v33  ;;  %2924 = vmatpush.msra.mxu1 %v5454_v36  ;;  %v5507_v59 = vadd.f32 %v5324_v18, %v6599_v34  ;;  %v5511_v7 = vadd.f32 %v5291_v21, %v6666_v6  ;;  %v2015_v9 = vrot.slane %v2014_v62, 2  ;;  %v2047_v50 = vmax.f32 %v1970_v17, %v1971_v46  ;;  %v5521_v34 = vld [vmem:[#allocation9 + $0xf0] sm:$0xff] }
 0x2b1   :  { %3188 = vmatpush.msra.mxu2 %v3930_v22  ;;  %3208 = vmatpush.msra.mxu3 %v3931_v3  ;;  %v5501_v22 = vld [vmem:[#allocation9 + $0x110] sm:$0xff]  ;;  %v5503_v3 = vld [vmem:[#allocation9 + $0x118] sm:$0xff]  ;;  %v5515_v40 = vsel %vm673_vm6, %v1842_v5, %v5392_v24  ;;  %v1989_v16 = vrot.slane %v1988_v4, 1  ;;  %v2027_v39 = vrot.slane %v2026_v35, 4  ;;  %v1996_v17 = vrot.slane %v1995_v27, 1 }
 0x2b2   :  { %2905 = vmatpush.msra.mxu0 %v5471_v30  ;;  %2925 = vmatpush.msra.mxu1 %v5473_v23  ;;  %v5525_v46 = vmax.f32 %v2007_v12, %v2008_v29  ;;  %v2034_v24 = vrot.slane %v2033_v58, 4  ;;  %v2054_v5 = vmax.f32 %v5458_v52, %v1973_v57  ;;  %v2048_v6 = vrot.slane %v2047_v50, 4  ;;  %v3934_v12 = vld [vmem:[#allocation9 + $0x1a0] sm:$0xff]  ;;  %v3935_v29 = vld [vmem:[#allocation9 + $0x1a8] sm:$0xff] }
 0x2b3   :  { %3189 = vmatpush.msra.mxu2 %v3932_v43  ;;  %3209 = vmatpush.msra.mxu3 %v3933_v2  ;;  %v2021_v2 = vmax.f32 %v2019_v53, %v2020_v28  ;;  %v5532_v53 = vadd.f32 %v5324_v18, %v6601_v41  ;;  %v2003_v28 = vrot.slane %v2002_v25, 1  ;;  %v5538_v52 = vmax.f32 %v2014_v62, %v2015_v9  ;;  %v6667_v41 = vld [vmem:[#allocation50_spill] sm:$0xff] }
 0x2b4   :  { %2906 = vmatpush.msra.mxu0 %v5487_v31  ;;  %2926 = vmatpush.msra.mxu1 %v5489_v55  ;;  %v2028_v57 = vmax.f32 %v2026_v35, %v2027_v39  ;;  %v2035_v19 = vmax.f32 %v2033_v58, %v2034_v24  ;;  %v2055_v14 = vrot.slane %v2054_v5, 4  ;;  %v5544_v61 = vadd.f32 %v5291_v21, %v6667_v41  ;;  %v5553_v9 = vld [vmem:[#allocation9 + $0xb0] sm:$0xff]  ;;  %v5555_v35 = vld [vmem:[#allocation9 + $0xb8] sm:$0xff]  ;;  %v3936_v58 = vld [vmem:[#allocation9 + $0x180] sm:$0xff] }
 0x2b5   :  { %3124 = vmatmul.f32.vlgmr.msrb.gmra.mxu2 %v5515_v40  ;;  %3144 = vmatmul.f32.vlgmr.msrb.gmra.mxu3 %v5515_v40  ;;  %v2022_v43 = vrot.slane %v2021_v2, 2  ;;  %6668 = vst [vmem:[#allocation44_spill] sm:$0xff] %v5553_v9  ;;  %v3937_v39 = vld [vmem:[#allocation9 + $0x188] sm:$0xff]  ;;  %v5557_v24 = vmax.f32 %v1995_v27, %v1996_v17  ;;  %v2010_v21 = vrot.slane %v5525_v46, 1  ;;  %v5564_v18 = vmax.f32 %v2002_v25, %v2003_v28  ;;  %v5566_v62 = vld [vmem:[#allocation9 + $0x90] sm:$0xff]  ;;  %v3938_v27 = vld [vmem:[#allocation9 + $0x160] sm:$0xff] }
 0x2b6   :  { %2907 = vmatpush.msra.mxu0 %v5501_v22  ;;  %2927 = vmatpush.msra.mxu1 %v5503_v3  ;;  %6669 = vst [vmem:[#allocation39_spill] sm:$0xff] %v5555_v35  ;;  %v2029_v26 = vrot.slane %v2028_v57, 2  ;;  %v2056_v41 = vmax.f32 %v2054_v5, %v2055_v14  ;;  %v3939_v17 = vld [vmem:[#allocation9 + $0x168] sm:$0xff]  ;;  %v2068_v25 = vmax.f32 %v5481_v37, %v5493_v60 }
 0x2b7   :  { %3190 = vmatpush.msra.mxu2 %v3934_v12  ;;  %3210 = vmatpush.msra.mxu3 %v3935_v29  ;;  %v5550_v12 = vmax.f32 %v1988_v4, %v1989_v16  ;;  %v5560_v29 = vmax.f32 %v2021_v2, %v2022_v43  ;;  %v2036_v4 = vrot.slane %v2035_v19, 2  ;;  %v2049_v16 = vmax.f32 %v2047_v50, %v2048_v6  ;;  %v5581_v6 = vld [vmem:[#allocation9 + $0x70] sm:$0xff] }
 0x2b8   :  { %2908 = vmatpush.msra.mxu0 %v5521_v34  ;;  %2928 = vmatpush.msra.mxu1 %v5523_v63  ;;  %6670 = vst [vmem:[#allocation42_spill] sm:$0xff] %v5566_v62  ;;  %v2017_v2 = vrot.slane %v5538_v52, 1  ;;  %v2030_v43 = vmax.f32 %v2028_v57, %v2029_v26  ;;  %v2057_v5 = vrot.slane %v2056_v41, 2  ;;  %v2075_v28 = vmax.f32 %v5497_v20, %v5507_v59  ;;  %v5583_v57 = vld [vmem:[#allocation9 + $0x78] sm:$0xff]  ;;  %v3940_v26 = vld [vmem:[#allocation9 + $0x140] sm:$0xff] }
 0x2b9   :  { %3191 = vmatpush.msra.mxu2 %v3936_v58  ;;  %3211 = vmatpush.msra.mxu3 %v3937_v39  ;;  %v5568_v58 = vld [vmem:[#allocation9 + $0x98] sm:$0xff]  ;;  %v2061_v39 = vmax.f32 %v5466_v47, %v5477_v0  ;;  %v5577_v14 = vmax.f32 %v2035_v19, %v2036_v4  ;;  %v2050_v50 = vrot.slane %v2049_v16, 2  ;;  %6671 = vst [vmem:[#allocation47_spill] sm:$0xff] %v5581_v6  ;;  %v3941_v0 = vld [vmem:[#allocation9 + $0x148] sm:$0xff]  ;;  %v2024_v37 = vrot.slane %v5560_v29, 1 }
 0x2ba   :  { %2909 = vmatpush.msra.mxu0 %v5534_v32  ;;  %2929 = vmatpush.msra.mxu1 %v5536_v10  ;;  %6672 = vst [vmem:[#allocation45_spill] sm:$0xff] %v5583_v57  ;;  %v5586_v47 = vmax.f32 %v5525_v46, %v2010_v21  ;;  %v2069_v60 = vrot.slane %v2068_v25, 4  ;;  %v2031_v20 = vrot.slane %v2030_v43, 1  ;;  %v2058_v4 = vmax.f32 %v2056_v41, %v2057_v5  ;;  %v3943_v46 = vld [vmem:[#allocation9 + $0x128] sm:$0xff] }
 0x2bb   :  { %3192 = vmatpush.msra.mxu2 %v3938_v27  ;;  %3212 = vmatpush.msra.mxu3 %v3939_v17  ;;  %v2062_v19 = vrot.slane %v2061_v39, 4  ;;  %v2051_v59 = vmax.f32 %v2049_v16, %v2050_v50  ;;  %v2076_v27 = vrot.slane %v2075_v28, 4  ;;  %v5591_v17 = vld [vmem:[#allocation9 + $0x50] sm:$0xff]  ;;  %v5596_v21 = vmax.f32 %v5538_v52, %v2017_v2  ;;  %v3944_v52 = vld [vmem:[#allocation9 + $0x100] sm:$0xff]  ;;  %v3945_v2 = vld [vmem:[#allocation9 + $0x108] sm:$0xff] }
 0x2bc   :  { %2910 = vmatpush.msra.mxu0 %v5553_v9  ;;  %2930 = vmatpush.msra.mxu1 %v5555_v35  ;;  %6673 = vst [vmem:[#allocation48_spill] sm:$0xff] %v5591_v17  ;;  %v2070_v9 = vmax.f32 %v2068_v25, %v2069_v60  ;;  %v2038_v16 = vrot.slane %v5577_v14, 1  ;;  %v2089_v60 = vmax.f32 %v5544_v61, %v5548_v38 }
 0x2bd   :  { %3193 = vmatpush.msra.mxu2 %v3940_v26  ;;  %3213 = vmatpush.msra.mxu3 %v3941_v0  ;;  %v5593_v26 = vld [vmem:[#allocation9 + $0x58] sm:$0xff]  ;;  %v3942_v0 = vld [vmem:[#allocation9 + $0x120] sm:$0xff]  ;;  %v2063_v35 = vmax.f32 %v2061_v39, %v2062_v19  ;;  %v2052_v41 = vrot.slane %v2051_v59, 1  ;;  %v2077_v50 = vmax.f32 %v2075_v28, %v2076_v27  ;;  %v2082_v19 = vmax.f32 %v5511_v7, %v5532_v53  ;;  %v3947_v7 = vld [vmem:[#allocation9 + $0xe8] sm:$0xff] }
 0x2be   :  { %2911 = vmatpush.msra.mxu0 %v5566_v62  ;;  %2931 = vmatpush.msra.mxu1 %v5568_v58  ;;  %6674 = vst [vmem:[#allocation51_spill] sm:$0xff] %v5593_v26  ;;  %v2071_v25 = vrot.slane %v2070_v9, 2  ;;  %v5614_v28 = vmax.f32 %v5560_v29, %v2024_v37  ;;  %v5616_v27 = vmax.f32 %v2030_v43, %v2031_v20  ;;  %v5620_v62 = vld [vmem:[#allocation9 + $0x18] sm:$0xff]  ;;  %v2103_v20 = vrot.slane %v5387_v54, 6 }
 0x2bf   :  { %3194 = vmatpush.msra.mxu2 %v3942_v0  ;;  %3214 = vmatpush.msra.mxu3 %v3943_v46  ;;  %v5603_v0 = vld [vmem:[#allocation9 + $0x30] sm:$0xff]  ;;  %v5605_v46 = vld [vmem:[#allocation9 + $0x38] sm:$0xff]  ;;  %v2064_v39 = vrot.slane %v2063_v35, 2  ;;  %v2078_v5 = vrot.slane %v2077_v50, 2  ;;  %6676 = vst [vmem:[#allocation83_spill] sm:$0xff] %v5620_v62  ;;  %v2083_v53 = vrot.slane %v2082_v19, 4  ;;  %v2039_v29 = vmax.f32 %v5577_v14, %v2038_v16 }
 0x2c0   :  { %2912 = vmatpush.msra.mxu0 %v5581_v6  ;;  %2932 = vmatpush.msra.mxu1 %v5583_v57  ;;  %v3946_v57 = vld [vmem:[#allocation9 + $0xe0] sm:$0xff]  ;;  %v2072_v38 = vmax.f32 %v2070_v9, %v2071_v25  ;;  %v2053_v43 = vmax.f32 %v2051_v59, %v2052_v41  ;;  %v3949_v6 = vld [vmem:[#allocation9 + $0xc8] sm:$0xff]  ;;  %v2104_v14 = vrot.slane %v5387_v54, 7  ;;  %v2107_v59 = vrot.slane %v5389_v45, 3 }
 0x2c1   :  { %3195 = vmatpush.msra.mxu2 %v3944_v52  ;;  %3215 = vmatpush.msra.mxu3 %v3945_v2  ;;  %v2059_v52 = vrot.slane %v2058_v4, 1  ;;  %v5618_v2 = vld [vmem:[#allocation9 + $0x10] sm:$0xff]  ;;  %v2065_v61 = vmax.f32 %v2063_v35, %v2064_v39  ;;  %v2079_v37 = vmax.f32 %v2077_v50, %v2078_v5  ;;  %v2084_v35 = vmax.f32 %v2082_v19, %v2083_v53 }
 0x2c2   :  { %2913 = vmatpush.msra.mxu0 %v5591_v17  ;;  %2933 = vmatpush.msra.mxu1 %v5593_v26  ;;  %6675 = vst [vmem:[#allocation82_spill] sm:$0xff] %v5618_v2  ;;  %v2090_v17 = vrot.slane %v2089_v60, 4  ;;  %v3948_v26 = vld [vmem:[#allocation9 + $0xc0] sm:$0xff]  ;;  %v6677_v16 = vmov 0.0   ;;  %v2108_v41 = vrot.slane %v5389_v45, 4  ;;  %v5637_v50 = vld [vmem:[#allocation8 + $0x3f0] sm:$0xff] }
 0x2c3   :  { %3196 = vmatpush.msra.mxu2 %v3946_v57  ;;  %3216 = vmatpush.msra.mxu3 %v3947_v7  ;;  %v2066_v57 = vrot.slane %v2065_v61, 1  ;;  %v2073_v7 = vrot.slane %v2072_v38, 1  ;;  %v2060_v39 = vmax.f32 %v2058_v4, %v2059_v52  ;;  %v2080_v25 = vrot.slane %v2079_v37, 1  ;;  %6678 = vst [vmem:[#allocation84_spill] sm:$0xff] %v5637_v50  ;;  %v5640_v4 = vld [vmem:[#allocation8 + $0x3f8] sm:$0xff] }
 0x2c4   :  { %2914 = vmatpush.msra.mxu0 %v5603_v0  ;;  %2934 = vmatpush.msra.mxu1 %v5605_v46  ;;  %v2091_v9 = vmax.f32 %v2089_v60, %v2090_v17  ;;  %v5635_v17 = vadd.f32 %v5550_v12, %v5387_v54  ;;  %6679 = vst [vmem:[#allocation85_spill] sm:$0xff] %v5640_v4  ;;  %v2109_v60 = vrot.slane %v5389_v45, 5  ;;  %v6680_v52 = vrot.slane %v5387_v54, 1  ;;  %v3953_v12 = vld [vmem:[#allocation9 + $0xa8] sm:$0xff] }
 0x2c5   :  { %3197 = vmatpush.msra.mxu2 %v3948_v26  ;;  %3217 = vmatpush.msra.mxu3 %v3949_v6  ;;  %v2085_v26 = vrot.slane %v2084_v35, 2  ;;  %v2067_v5 = vmax.f32 %v2065_v61, %v2066_v57  ;;  %v2074_v19 = vmax.f32 %v2072_v38, %v2073_v7  ;;  %v5655_v38 = vld [vmem:[#allocation8 + $0x3d0] sm:$0xff]  ;;  %v5658_v57 = vld [vmem:[#allocation8 + $0x3d8] sm:$0xff]  ;;  %v2111_v7 = vrot.slane %v5389_v45, 7 }
 0x2c6   :  { %2915 = vmatpush.msra.mxu0 %v5618_v2  ;;  %2935 = vmatpush.msra.mxu1 %v5620_v62  ;;  %v2092_v6 = vrot.slane %v2091_v9, 2  ;;  %v5647_v53 = vadd.f32 %v6680_v52, %v5557_v24  ;;  %6682 = vst [vmem:[#allocation68_spill] sm:$0xff] %v5655_v38  ;;  %v2081_v24 = vmax.f32 %v2079_v37, %v2080_v25  ;;  %v6686_v37 = vrot.slane %v5387_v54, 5 }
 0x2c7   :  { %2916 = vmatmul.f32.vlgmr.msra.gmra.mxu0 %v6677_v16  ;;  %2936 = vmatmul.f32.vlgmr.msra.gmra.mxu1 %v6677_v16  ;;  %v3952_v16 = vld [vmem:[#allocation9 + $0xa0] sm:$0xff]  ;;  %v2086_v62 = vmax.f32 %v2084_v35, %v2085_v26  ;;  %6683 = vst [vmem:[#allocation41_spill] sm:$0xff] %v5658_v57  ;;  %v6684_v35 = vrot.slane %v5387_v54, 3 }
 0x2c8   :  { %3064 = vmatpush.msrb.mxu0 %v5637_v50  ;;  %3084 = vmatpush.msrb.mxu1 %v5640_v4  ;;  %v2093_v2 = vmax.f32 %v2091_v9, %v2092_v6  ;;  %v2110_v50 = vrot.slane %v5389_v45, 6  ;;  %v6681_v4 = vrot.slane %v5387_v54, 2  ;;  %v3956_v6 = vld [vmem:[#allocation9 + $0x80] sm:$0xff]  ;;  %v5675_v25 = vadd.f32 %v6686_v37, %v5614_v28  ;;  %v3961_v37 = vld [vmem:[#allocation9 + $0x68] sm:$0xff] }
 0x2c9   :  { %3198 = vmatpush.msra.mxu2 %v3952_v16  ;;  %3218 = vmatpush.msra.mxu3 %v3953_v12  ;;  %v5665_v9 = vadd.f32 %v6684_v35, %v5586_v47  ;;  %v2087_v52 = vrot.slane %v2086_v62, 1  ;;  %v6687_v12 = vrot.slane %v5389_v45, 1  ;;  %v5681_v35 = vld [vmem:[#allocation8 + $0x3b0] sm:$0xff] }
 0x2ca   :  { %v5653_v61 = vadd.f32 %v6681_v4, %v5564_v18  ;;  %3065 = vmatpush.msrb.mxu0 %v5655_v38  ;;  %3085 = vmatpush.msrb.mxu1 %v5658_v57  ;;  %v6685_v18 = vrot.slane %v5387_v54, 4  ;;  %v3957_v4 = vld [vmem:[#allocation9 + $0x88] sm:$0xff]  ;;  %v2094_v16 = vrot.slane %v2093_v2, 1  ;;  %6688 = vst [vmem:[#allocation26_spill] sm:$0xff] %v5681_v35  ;;  %v6690_v54 = vrot.slane %v5389_v45, 2  ;;  %v5698_v38 = vld [vmem:[#allocation8 + $0x390] sm:$0xff] }
 0x2cb   :  { %3199 = vmatpush.msra.mxu2 %v3956_v6  ;;  %3219 = vmatpush.msra.mxu3 %v3957_v4  ;;  %v5679_v47 = vadd.f32 %v6687_v12, %v2053_v43  ;;  %v5690_v6 = vadd.f32 %v2104_v14, %v2039_v29  ;;  %v2145_v4 = vmax.f32 %v5647_v53, 0.0  ;;  %v3960_v43 = vld [vmem:[#allocation9 + $0x60] sm:$0xff]  ;;  %v2088_v12 = vmax.f32 %v2086_v62, %v2087_v52 }
 0x2cc   :  { %v5670_v26 = vadd.f32 %v6685_v18, %v5596_v21  ;;  %3066 = vmatpush.msrb.mxu0 %v5681_v35  ;;  %v5684_v21 = vld [vmem:[#allocation8 + $0x3b8] sm:$0xff]  ;;  %v5688_v18 = vadd.f32 %v2103_v20, %v5616_v27  ;;  %v2138_v28 = vadd.f32 %v6690_v54, %v2060_v39  ;;  %v2095_v35 = vmax.f32 %v2093_v2, %v2094_v16  ;;  %v3964_v2 = vld [vmem:[#allocation9 + $0x40] sm:$0xff]  ;;  %v3965_v39 = vld [vmem:[#allocation9 + $0x48] sm:$0xff] }
 0x2cd   :  { %6689 = vst [vmem:[#allocation24_spill] sm:$0xff] %v5684_v21  ;;  %3086 = vmatpush.msrb.mxu1 %v5684_v21  ;;  %3200 = vmatpush.msra.mxu2 %v3960_v43  ;;  %v5695_v57 = vadd.f32 %v2107_v59, %v2067_v5  ;;  %v2146_v21 = vmax.f32 %v5653_v61, 0.0  ;;  %v5701_v27 = vld [vmem:[#allocation8 + $0x398] sm:$0xff]  ;;  %v5704_v45 = vadd.f32 %v2108_v41, %v2074_v19  ;;  %v2144_v20 = vmax.f32 %v5635_v17, 0.0  ;;  %v5713_v61 = vld [vmem:[#allocation8 + $0x370] sm:$0xff] }
 0x2ce   :  { %3220 = vmatpush.msra.mxu3 %v3961_v37  ;;  %3067 = vmatpush.msrb.mxu0 %v5698_v38  ;;  %v5706_v29 = vadd.f32 %v2109_v60, %v2081_v24  ;;  %v2147_v62 = vmax.f32 %v5665_v9, 0.0  ;;  %v2148_v14 = vmax.f32 %v5670_v26, 0.0  ;;  %v2152_v59 = vmax.f32 %v5399_v8, 0.0  ;;  %v5716_v41 = vld [vmem:[#allocation8 + $0x378] sm:$0xff]  ;;  %v3968_v9 = vld [vmem:[#allocation9 + $0x20] sm:$0xff]  ;;  %v3969_v8 = vld [vmem:[#allocation9 + $0x28] sm:$0xff] }
 0x2cf   :  { %3087 = vmatpush.msrb.mxu1 %v5701_v27  ;;  %3201 = vmatpush.msra.mxu2 %v3964_v2  ;;  %v2153_v5 = vmax.f32 %v5679_v47, 0.0  ;;  %v2154_v53 = vmax.f32 %v2138_v28, 0.0  ;;  %v5719_v17 = vadd.f32 %v2110_v50, %v2088_v12  ;;  %v5721_v19 = vadd.f32 %v2111_v7, %v2095_v35  ;;  %v5727_v54 = vld [vmem:[#allocation8 + $0x350] sm:$0xff]  ;;  %v5730_v50 = vld [vmem:[#allocation8 + $0x358] sm:$0xff]  ;;  %v3972_v28 = vld [vmem:[#allocation9] sm:$0xff] }
 0x2d0   :  { %3221 = vmatpush.msra.mxu3 %v3965_v39  ;;  %3068 = vmatpush.msrb.mxu0 %v5713_v61  ;;  %v2149_v60 = vmax.f32 %v5675_v25, 0.0  ;;  %v2176_v24 = vrot.slane %v2145_v4, 7  ;;  %v2150_v26 = vmax.f32 %v5688_v18, 0.0  ;;  %v2151_v52 = vmax.f32 %v5690_v6, 0.0  ;;  %v3973_v6 = vld [vmem:[#allocation9 + $0x8] sm:$0xff]  ;;  %v5737_v37 = vld [vmem:[#allocation8 + $0x330] sm:$0xff] }
 0x2d1   :  { %3088 = vmatpush.msrb.mxu1 %v5716_v41  ;;  %3202 = vmatpush.msra.mxu2 %v3968_v9  ;;  %v2155_v16 = vmax.f32 %v5695_v57, 0.0  ;;  %v2178_v47 = vrot.slane %v2146_v21, 6  ;;  %v2156_v7 = vmax.f32 %v5704_v45, 0.0  ;;  %v2157_v25 = vmax.f32 %v5706_v29, 0.0  ;;  %v5740_v12 = vld [vmem:[#allocation8 + $0x338] sm:$0xff]  ;;  %v3976_v2 = vld [vmem:[#allocation8 + $0x3e0] sm:$0xff] }
 0x2d2   :  { %3222 = vmatpush.msra.mxu3 %v3969_v8  ;;  %3069 = vmatpush.msrb.mxu0 %v5727_v54  ;;  %v2177_v35 = vsel %vm673_vm6, %v2176_v24, %v2144_v20  ;;  %v2180_v18 = vrot.slane %v2147_v62, 5  ;;  %v2182_v21 = vrot.slane %v2148_v14, 4  ;;  %v2190_v4 = vrot.slane %v2153_v5, 7  ;;  %v3977_v39 = vld [vmem:[#allocation8 + $0x3e8] sm:$0xff]  ;;  %v5748_v9 = vld [vmem:[#allocation8 + $0x310] sm:$0xff] }
 0x2d3   :  { %3089 = vmatpush.msrb.mxu1 %v5730_v50  ;;  %3203 = vmatpush.msra.mxu2 %v3972_v28  ;;  %v2179_v57 = vsel %vm676_vm7, %v2178_v47, %v2177_v35  ;;  %v2192_v43 = vrot.slane %v2154_v53, 6  ;;  %v2158_v45 = vmax.f32 %v5719_v17, 0.0  ;;  %v2159_v29 = vmax.f32 %v5721_v19, 0.0  ;;  %v5751_v17 = vld [vmem:[#allocation8 + $0x318] sm:$0xff]  ;;  %v3980_v47 = vld [vmem:[#allocation8 + $0x3c0] sm:$0xff]  ;;  %v3981_v35 = vld [vmem:[#allocation8 + $0x3c8] sm:$0xff] }
 0x2d4   :  { %3223 = vmatpush.msra.mxu3 %v3973_v6  ;;  %3070 = vmatpush.msrb.mxu0 %v5737_v37  ;;  %v2181_v20 = vsel %vm679_vm8, %v2180_v18, %v2179_v57  ;;  %v2184_v62 = vrot.slane %v2149_v60, 3  ;;  %v2186_v5 = vrot.slane %v2150_v26, 2  ;;  %v2191_v53 = vsel %vm673_vm6, %v2190_v4, %v2152_v59  ;;  %v5758_v28 = vld [vmem:[#allocation8 + $0x2f0] sm:$0xff]  ;;  %v5761_v6 = vld [vmem:[#allocation8 + $0x2f8] sm:$0xff]  ;;  %v3985_v4 = vld [vmem:[#allocation8 + $0x3a8] sm:$0xff] }
 0x2d5   :  { %3090 = vmatpush.msrb.mxu1 %v5740_v12  ;;  %3343 = vmatpush.msrb.mxu2 %v3976_v2  ;;  %v2183_v14 = vsel %vm682_vm9, %v2182_v21, %v2181_v20  ;;  %v2194_v24 = vrot.slane %v2155_v16, 5  ;;  %v2193_v60 = vsel %vm676_vm7, %v2192_v43, %v2191_v53  ;;  %v2196_v8 = vrot.slane %v2156_v7, 4  ;;  %v3984_v21 = vld [vmem:[#allocation8 + $0x3a0] sm:$0xff]  ;;  %v5767_v20 = vld [vmem:[#allocation8 + $0x2d0] sm:$0xff] }
 0x2d6   :  { %3363 = vmatpush.msrb.mxu3 %v3977_v39  ;;  %3071 = vmatpush.msrb.mxu0 %v5748_v9  ;;  %v2185_v19 = vsel %vm685_vm10, %v2184_v62, %v2183_v14  ;;  %v2188_v26 = vrot.slane %v2151_v52, 1  ;;  %v2198_v18 = vrot.slane %v2157_v25, 3  ;;  %v2200_v57 = vrot.slane %v2158_v45, 2  ;;  %v5770_v62 = vld [vmem:[#allocation8 + $0x2d8] sm:$0xff]  ;;  %v3988_v45 = vld [vmem:[#allocation8 + $0x380] sm:$0xff]  ;;  %v3989_v39 = vld [vmem:[#allocation8 + $0x388] sm:$0xff] }
 0x2d7   :  { %3091 = vmatpush.msrb.mxu1 %v5751_v17  ;;  %3344 = vmatpush.msrb.mxu2 %v3980_v47  ;;  %v2187_v59 = vsel %vm688_vm11, %v2186_v5, %v2185_v19  ;;  %v2195_v16 = vsel %vm679_vm8, %v2194_v24, %v2193_v60  ;;  %v2202_v25 = vrot.slane %v2159_v29, 1  ;;  %v5775_v5 = vld [vmem:[#allocation8 + $0x2b0] sm:$0xff]  ;;  %v5778_v29 = vld [vmem:[#allocation8 + $0x2b8] sm:$0xff]  ;;  %v3992_v19 = vld [vmem:[#allocation8 + $0x360] sm:$0xff] }
 0x2d8   :  { %3364 = vmatpush.msrb.mxu3 %v3981_v35  ;;  %3072 = vmatpush.msrb.mxu0 %v5758_v28  ;;  %v2197_v7 = vsel %vm682_vm9, %v2196_v8, %v2195_v16  ;;  %v2189_v52 = vsel %vm691_vm12, %v2188_v26, %v2187_v59  ;;  %v3993_v60 = vld [vmem:[#allocation8 + $0x368] sm:$0xff]  ;;  %v5785_v8 = vld [vmem:[#allocation8 + $0x290] sm:$0xff]  ;;  %v5788_v47 = vld [vmem:[#allocation8 + $0x298] sm:$0xff] }
 0x2d9   :  { %3092 = vmatpush.msrb.mxu1 %v5761_v6  ;;  %3345 = vmatpush.msrb.mxu2 %v3984_v21  ;;  %v2199_v43 = vsel %vm685_vm10, %v2198_v18, %v2197_v7  ;;  %v3996_v35 = vld [vmem:[#allocation8 + $0x340] sm:$0xff]  ;;  %v3997_v59 = vld [vmem:[#allocation8 + $0x348] sm:$0xff]  ;;  %v5791_v26 = vld [vmem:[#allocation8 + $0x270] sm:$0xff] }
 0x2da   :  { %3365 = vmatpush.msrb.mxu3 %v3985_v4  ;;  %3073 = vmatpush.msrb.mxu0 %v5767_v20  ;;  %v2201_v2 = vsel %vm688_vm11, %v2200_v57, %v2199_v43  ;;  %v5794_v16 = vld [vmem:[#allocation8 + $0x278] sm:$0xff]  ;;  %v4000_v18 = vld [vmem:[#allocation8 + $0x320] sm:$0xff]  ;;  %v4001_v7 = vld [vmem:[#allocation8 + $0x328] sm:$0xff] }
 0x2db   :  { %3093 = vmatpush.msrb.mxu1 %v5770_v62  ;;  %3346 = vmatpush.msrb.mxu2 %v3988_v45  ;;  %v2203_v14 = vsel %vm691_vm12, %v2202_v25, %v2201_v2  ;;  %v5797_v57 = vld [vmem:[#allocation8 + $0x250] sm:$0xff]  ;;  %v5800_v21 = vld [vmem:[#allocation8 + $0x258] sm:$0xff]  ;;  %v4004_v4 = vld [vmem:[#allocation8 + $0x300] sm:$0xff] }
 0x2dc   :  { %3366 = vmatpush.msrb.mxu3 %v3989_v39  ;;  %3074 = vmatpush.msrb.mxu0 %v5775_v5  ;;  %v5781_v53 = vmax.f32 %v2189_v52, %v2203_v14  ;;  %v5783_v24 = vadd.f32 %v2203_v14, %v2189_v52  ;;  %v4005_v52 = vld [vmem:[#allocation8 + $0x308] sm:$0xff]  ;;  %v5803_v43 = vld [vmem:[#allocation8 + $0x230] sm:$0xff]  ;;  %v5806_v25 = vld [vmem:[#allocation8 + $0x238] sm:$0xff]  ;;  %v5809_v39 = vpop.f32.mrf.mxu3 }
 0x2dd   :  { %3094 = vmatpush.msrb.mxu1 %v5778_v29  ;;  %3347 = vmatpush.msrb.mxu2 %v3992_v19  ;;  %6692 = vst [vmem:[#allocation23_spill] sm:$0xff] %v5806_v25  ;;  %v4008_v2 = vld [vmem:[#allocation8 + $0x2e0] sm:$0xff]  ;;  %v4009_v45 = vld [vmem:[#allocation8 + $0x2e8] sm:$0xff]  ;;  %v5811_v14 = vld [vmem:[#allocation8 + $0x210] sm:$0xff] }
 0x2de   :  { %6691 = vst [vmem:[#allocation20_spill] sm:$0xff] %v5783_v24  ;;  %3367 = vmatpush.msrb.mxu3 %v3993_v60  ;;  %3075 = vmatpush.msrb.mxu0 %v5785_v8  ;;  %v5814_v19 = vld [vmem:[#allocation8 + $0x218] sm:$0xff]  ;;  %v5819_v60 = vld [vmem:[#allocation8 + $0x1f0] sm:$0xff] }
 0x2df   :  { %3095 = vmatpush.msrb.mxu1 %v5788_v47  ;;  %3348 = vmatpush.msrb.mxu2 %v3996_v35  ;;  %6693 = vst [vmem:[#allocation29_spill] sm:$0xff] %v5811_v14  ;;  %v5822_v35 = vld [vmem:[#allocation8 + $0x1f8] sm:$0xff] }
 0x2e0   :  { %3368 = vmatpush.msrb.mxu3 %v3997_v59  ;;  %3076 = vmatpush.msrb.mxu0 %v5791_v26  ;;  %6694 = vst [vmem:[#allocation31_spill] sm:$0xff] %v5814_v19  ;;  %v5825_v59 = vpop.f32.mrf.mxu2  ;;  %v5836_v24 = vld [vmem:[#allocation8 + $0x1b8] sm:$0xff] }
 0x2e1   :  { %3096 = vmatpush.msrb.mxu1 %v5794_v16  ;;  %3349 = vmatpush.msrb.mxu2 %v4000_v18  ;;  %6695 = vst [vmem:[#allocation28_spill] sm:$0xff] %v5819_v60  ;;  %v4014_v18 = vld [vmem:[#allocation8 + $0x2c0] sm:$0xff] }
 0x2e2   :  { %3369 = vmatpush.msrb.mxu3 %v4001_v7  ;;  %3077 = vmatpush.msrb.mxu0 %v5797_v57  ;;  %6696 = vst [vmem:[#allocation21_spill] sm:$0xff] %v5822_v35  ;;  %v4015_v7 = vld [vmem:[#allocation8 + $0x2c8] sm:$0xff] }
 0x2e3   :  { %3097 = vmatpush.msrb.mxu1 %v5800_v21  ;;  %3350 = vmatpush.msrb.mxu2 %v4004_v4  ;;  %v5827_v4 = vld [vmem:[#allocation8 + $0x1d0] sm:$0xff]  ;;  %6700 = vst [vmem:[#allocation38_spill] sm:$0xff] %v5836_v24 }
 0x2e4   :  { %3370 = vmatpush.msrb.mxu3 %v4005_v52  ;;  %3078 = vmatpush.msrb.mxu0 %v5803_v43  ;;  %6697 = vst [vmem:[#allocation32_spill] sm:$0xff] %v5827_v4  ;;  %v5830_v52 = vld [vmem:[#allocation8 + $0x1d8] sm:$0xff] }
 0x2e5   :  { %3098 = vmatpush.msrb.mxu1 %v5806_v25  ;;  %3351 = vmatpush.msrb.mxu2 %v4008_v2  ;;  %6698 = vst [vmem:[#allocation34_spill] sm:$0xff] %v5830_v52  ;;  %v4019_v2 = vld [vmem:[#allocation8 + $0x2a8] sm:$0xff]  ;;  %v5891_v25 = vld [vmem:[#allocation8 + $0xb0] sm:$0xff] }
 0x2e6   :  { %3371 = vmatpush.msrb.mxu3 %v4009_v45  ;;  %3079 = vmatpush.msrb.mxu0 %v5811_v14  ;;  %v5833_v45 = vld [vmem:[#allocation8 + $0x1b0] sm:$0xff] }
 0x2e7   :  { %3099 = vmatpush.msrb.mxu1 %v5814_v19  ;;  %3080 = vmatmul.f32.vlgmr.msrb.gmra.mxu0 %v5446_v44  ;;  %6699 = vst [vmem:[#allocation35_spill] sm:$0xff] %v5833_v45 }
 0x2e8   :  { %3100 = vmatmul.f32.vlgmr.msrb.gmra.mxu1 %v5446_v44  ;;  %3148 = vmatpush.msra.mxu0 %v5819_v60  ;;  %v4018_v44 = vld [vmem:[#allocation8 + $0x2a0] sm:$0xff]  ;;  %v5857_v60 = vld [vmem:[#allocation8 + $0x130] sm:$0xff] }
 0x2e9   :  { %3168 = vmatpush.msra.mxu1 %v5822_v35  ;;  %3352 = vmatpush.msrb.mxu2 %v4014_v18  ;;  %v4022_v18 = vld [vmem:[#allocation8 + $0x280] sm:$0xff]  ;;  %v5845_v35 = vld [vmem:[#allocation8 + $0x170] sm:$0xff]  ;;  %6707 = vst [vmem:[#allocation49_spill] sm:$0xff] %v5857_v60 }
 0x2ea   :  { %3372 = vmatpush.msrb.mxu3 %v4015_v7  ;;  %3149 = vmatpush.msra.mxu0 %v5827_v4  ;;  %v4023_v7 = vld [vmem:[#allocation8 + $0x288] sm:$0xff]  ;;  %v5839_v4 = vld [vmem:[#allocation8 + $0x190] sm:$0xff]  ;;  %6703 = vst [vmem:[#allocation40_spill] sm:$0xff] %v5845_v35 }
 0x2eb   :  { %3169 = vmatpush.msra.mxu1 %v5830_v52  ;;  %3353 = vmatpush.msrb.mxu2 %v4018_v44  ;;  %6701 = vst [vmem:[#allocation37_spill] sm:$0xff] %v5839_v4  ;;  %v5842_v52 = vld [vmem:[#allocation8 + $0x198] sm:$0xff]  ;;  %v4026_v44 = vld [vmem:[#allocation8 + $0x260] sm:$0xff] }
 0x2ec   :  { %3373 = vmatpush.msrb.mxu3 %v4019_v2  ;;  %3150 = vmatpush.msra.mxu0 %v5833_v45  ;;  %6702 = vst [vmem:[#allocation36_spill] sm:$0xff] %v5842_v52  ;;  %v4027_v2 = vld [vmem:[#allocation8 + $0x268] sm:$0xff]  ;;  %v2817_v45 = vpop.f32.mrf.mxu3 }
 0x2ed   :  { %3170 = vmatpush.msra.mxu1 %v5836_v24  ;;  %3354 = vmatpush.msrb.mxu2 %v4022_v18  ;;  %v5848_v18 = vld [vmem:[#allocation8 + $0x178] sm:$0xff]  ;;  %v5851_v24 = vld [vmem:[#allocation8 + $0x150] sm:$0xff] }
 0x2ee   :  { %3374 = vmatpush.msrb.mxu3 %v4023_v7  ;;  %3151 = vmatpush.msra.mxu0 %v5839_v4  ;;  %6704 = vst [vmem:[#allocation22_spill] sm:$0xff] %v5848_v18  ;;  %v4030_v7 = vld [vmem:[#allocation8 + $0x240] sm:$0xff]  ;;  %v4031_v4 = vld [vmem:[#allocation8 + $0x248] sm:$0xff] }
 0x2ef   :  { %3171 = vmatpush.msra.mxu1 %v5842_v52  ;;  %3355 = vmatpush.msrb.mxu2 %v4026_v44  ;;  %6705 = vst [vmem:[#allocation43_spill] sm:$0xff] %v5851_v24  ;;  %v5854_v44 = vld [vmem:[#allocation8 + $0x158] sm:$0xff]  ;;  %v4034_v52 = vld [vmem:[#allocation8 + $0x220] sm:$0xff] }
 0x2f0   :  { %3375 = vmatpush.msrb.mxu3 %v4027_v2  ;;  %3152 = vmatpush.msra.mxu0 %v5845_v35  ;;  %6706 = vst [vmem:[#allocation46_spill] sm:$0xff] %v5854_v44  ;;  %v2797_v2 = vpop.f32.mrf.mxu2  ;;  %v4035_v35 = vld [vmem:[#allocation8 + $0x228] sm:$0xff] }
 0x2f1   :  { %3172 = vmatpush.msra.mxu1 %v5848_v18  ;;  %3356 = vmatpush.msrb.mxu2 %v4030_v7  ;;  %v5860_v7 = vld [vmem:[#allocation8 + $0x138] sm:$0xff]  ;;  %v5863_v18 = vld [vmem:[#allocation8 + $0x110] sm:$0xff] }
 0x2f2   :  { %3376 = vmatpush.msrb.mxu3 %v4031_v4  ;;  %3153 = vmatpush.msra.mxu0 %v5851_v24  ;;  %6708 = vst [vmem:[#allocation25_spill] sm:$0xff] %v5860_v7  ;;  %v4038_v4 = vld [vmem:[#allocation8 + $0x200] sm:$0xff]  ;;  %v4039_v24 = vld [vmem:[#allocation8 + $0x208] sm:$0xff] }
 0x2f3   :  { %3173 = vmatpush.msra.mxu1 %v5854_v44  ;;  %3357 = vmatpush.msrb.mxu2 %v4034_v52  ;;  %6709 = vst [vmem:[#allocation50_spill] sm:$0xff] %v5863_v18  ;;  %v5866_v44 = vld [vmem:[#allocation8 + $0x118] sm:$0xff] }
 0x2f4   :  { %3377 = vmatpush.msrb.mxu3 %v4035_v35  ;;  %3154 = vmatpush.msra.mxu0 %v5857_v60  ;;  %6710 = vst [vmem:[#allocation86_spill] sm:$0xff] %v5866_v44  ;;  %v5872_v35 = vld [vmem:[%s6358_s9 + $0x3] ss:$8 sm:$0xf]  ;;  %v2897_v52 = vpop.f32.mrf.mxu3 }
 0x2f5   :  { %3174 = vmatpush.msra.mxu1 %v5860_v7  ;;  %3358 = vmatpush.msrb.mxu2 %v4038_v4  ;;  %v5874_v60 = vld [vmem:[#allocation8 + $0xf0] sm:$0xff]  ;;  %v5877_v4 = vld [vmem:[#allocation8 + $0xf8] sm:$0xff]  ;;  %v5888_v14 = vperm.slane %v5872_v35, 1 }
 0x2f6   :  { %3378 = vmatpush.msrb.mxu3 %v4039_v24  ;;  %3155 = vmatpush.msra.mxu0 %v5863_v18  ;;  %6711 = vst [vmem:[#allocation87_spill] sm:$0xff] %v5874_v60  ;;  %v2818_v24 = vadd.f32 %v2817_v45, %v5809_v39  ;;  %v5881_v18 = vld [vmem:[#allocation8 + $0xd0] sm:$0xff]  ;;  %v5894_v39 = vld [vmem:[#allocation8 + $0xb8] sm:$0xff] }
 0x2f7   :  { %3175 = vmatpush.msra.mxu1 %v5866_v44  ;;  %6712 = vst [vmem:[#allocation88_spill] sm:$0xff] %v5881_v18  ;;  %v5884_v44 = vld [vmem:[#allocation8 + $0xd8] sm:$0xff] }
 0x2f8   :  { %3156 = vmatpush.msra.mxu0 %v5874_v60  ;;  %6713 = vst [vmem:[#allocation89_spill] sm:$0xff] %v5884_v44  ;;  %v2877_v7 = vpop.f32.mrf.mxu2  ;;  %v2941_v19 = vadd.f32 %v2897_v52, %v2818_v24  ;;  %v2798_v60 = vadd.f32 %v2797_v2, %v5825_v59  ;;  %v5903_v52 = vld [vmem:[#allocation8 + $0x98] sm:$0xff]  ;;  %v5907_v2 = vld [vmem:[#allocation8 + $0x70] sm:$0xff] }
 0x2f9   :  { %3176 = vmatpush.msra.mxu1 %v5877_v4  ;;  %6714 = vst [vmem:[#allocation90_spill] sm:$0xff] %v5888_v14  ;;  %v5910_v24 = vld [vmem:[#allocation8 + $0x78] sm:$0xff] }
 0x2fa   :  { %3157 = vmatpush.msra.mxu0 %v5881_v18  ;;  %v2940_v45 = vadd.f32 %v2877_v7, %v2798_v60  ;;  %v5898_v18 = vperm.slane %v5872_v35, 0  ;;  %6717 = vst [vmem:[#allocation93_spill] sm:$0xff] %v5903_v52  ;;  %v2954_v59 = vadd.f32 %v5888_v14, %v2941_v19  ;;  %v5914_v7 = vld [vmem:[#allocation8 + $0x50] sm:$0xff]  ;;  %v5923_v14 = vld [vmem:[#allocation8 + $0x38] sm:$0xff] }
 0x2fb   :  { %3177 = vmatpush.msra.mxu1 %v5884_v44  ;;  %v5900_v44 = vld [vmem:[#allocation8 + $0x90] sm:$0xff]  ;;  %6718 = vst [vmem:[#allocation94_spill] sm:$0xff] %v5907_v2 }
 0x2fc   :  { %3158 = vmatpush.msra.mxu0 %v5891_v25  ;;  %6715 = vst [vmem:[#allocation91_spill] sm:$0xff] %v5898_v18  ;;  %v2953_v60 = vadd.f32 %v5898_v18, %v2940_v45  ;;  %v5920_v19 = vld [vmem:[#allocation8 + $0x30] sm:$0xff]  ;;  %v5929_v45 = vld [vmem:[#allocation8 + $0x18] sm:$0xff] }
 0x2fd   :  { %3178 = vmatpush.msra.mxu1 %v5894_v39  ;;  %6716 = vst [vmem:[#allocation92_spill] sm:$0xff] %v5900_v44 }
 0x2fe   :  { %3159 = vmatpush.msra.mxu0 %v5900_v44  ;;  %6719 = vst [vmem:[#allocation95_spill] sm:$0xff] %v5910_v24  ;;  %v5917_v44 = vld [vmem:[#allocation8 + $0x58] sm:$0xff] }
 0x2ff   :  { %3179 = vmatpush.msra.mxu1 %v5903_v52  ;;  %v3766_v52 = vmul.f32 -1.442695, %v2954_v59 }
 0x300   :  { %3160 = vmatpush.msra.mxu0 %v5907_v2  ;;  %v5926_v2 = vld [vmem:[#allocation8 + $0x10] sm:$0xff] }
 0x301   :  { %3180 = vmatpush.msra.mxu1 %v5910_v24  ;;  %v3765_v24 = vmul.f32 -1.442695, %v2953_v60  ;;  %3830 = vpow2.f32 %v3766_v52  ;;  %v6727_v60 = vld [vmem:[#allocation51_spill] sm:$0xff] }
 0x302   :  { %3161 = vmatpush.msra.mxu0 %v5914_v7 }
 0x303   :  { %3181 = vmatpush.msra.mxu1 %v5917_v44  ;;  %3832 = vpow2.f32 %v3765_v24  ;;  %v6726_v24 = vld [vmem:[#allocation48_spill] sm:$0xff] }
 0x304   :  { %3162 = vmatpush.msra.mxu0 %v5920_v19 }
 0x305   :  { %3182 = vmatpush.msra.mxu1 %v5923_v14 }
 0x306   :  { %3163 = vmatpush.msra.mxu0 %v5926_v2 }
 0x307   :  { %3183 = vmatpush.msra.mxu1 %v5929_v45  ;;  %3164 = vmatmul.f32.vlgmr.msra.gmra.mxu0 %v5515_v40  ;;  %v3831_v59 = vpop.eup %3830 }
 0x308   :  { %3184 = vmatmul.f32.vlgmr.msra.gmra.mxu1 %v5515_v40  ;;  %3228 = vmatpush.msrb.mxu0 %v5394_v1  ;;  %v5942_v40 = vadd.f32 1.0, %v3831_v59  ;;  %v5946_v1 = vpop.f32.mrf.mxu0 }
 0x309   :  { %3248 = vmatpush.msrb.mxu1 %v5396_v13  ;;  %v3833_v52 = vpop.eup %3832 }
 0x30a   :  { %3229 = vmatpush.msrb.mxu0 %v5407_v51  ;;  %v5950_v13 = vadd.f32 1.0, %v3833_v52  ;;  %3834 = vrcp.f32 %v5942_v40  ;;  %v5953_v51 = vpop.f32.mrf.mxu1  ;;  %vm2985_vm15 = vweird.f32 %v5942_v40 }
 0x30b   :  { %3249 = vmatpush.msrb.mxu1 %v5409_v11 }
 0x30c   :  { %3230 = vmatpush.msrb.mxu0 %v5419_v48  ;;  %3836 = vrcp.f32 %v5950_v13  ;;  %vm2966_vm2 = vweird.f32 %v5950_v13 }
 0x30d   :  { %3250 = vmatpush.msrb.mxu1 %v5421_v15 }
 0x30e   :  { %3231 = vmatpush.msrb.mxu0 %v5435_v42  ;;  %v6721_v42 = vld [vmem:[#allocation44_spill] sm:$0xff] }
 0x30f   :  { %3251 = vmatpush.msrb.mxu1 %v5437_v56  ;;  %v6722_v56 = vld [vmem:[#allocation39_spill] sm:$0xff] }
 0x310   :  { %3232 = vmatpush.msrb.mxu0 %v5452_v33  ;;  %v5962_v11 = vpop.eup %3834 }
 0x311   :  { %3252 = vmatpush.msrb.mxu1 %v5454_v36  ;;  %v2981_v36 = vmul.f32 %v5962_v11, %v5942_v40  ;;  %vm2986_vm14 = vweird.f32 %v5962_v11 }
 0x312   :  { %3233 = vmatpush.msrb.mxu0 %v5471_v30  ;;  %v5974_v33 = vpop.eup %3836  ;;  %vm6005_vm1 = vmor %vm2985_vm15, %vm2986_vm14 }
 0x313   :  { %3253 = vmatpush.msrb.mxu1 %v5473_v23  ;;  %vm2967_vm0 = vweird.f32 %v5974_v33 }
 0x314   :  { %3234 = vmatpush.msrb.mxu0 %v5487_v31  ;;  %v6720_v31 = vld [vmem:[#allocation74_spill] sm:$0xff]  ;;  %vm6017_vm3 = vmor %vm2966_vm2, %vm2967_vm0 }
 0x315   :  { %3254 = vmatpush.msrb.mxu1 %v5489_v55  ;;  %v2224_v55 = vadd.f32 %v5946_v1, %v6622_v49  ;;  %v2962_v49 = vmul.f32 %v5974_v33, %v5950_v13 }
 0x316   :  { %3235 = vmatpush.msrb.mxu0 %v5501_v22  ;;  %v6724_v22 = vld [vmem:[#allocation47_spill] sm:$0xff] }
 0x317   :  { %3255 = vmatpush.msrb.mxu1 %v5503_v3  ;;  %v6725_v3 = vld [vmem:[#allocation45_spill] sm:$0xff]  ;;  %v2963_v59 = vsub.f32 1.0, %v2962_v49 }
 0x318   :  { %3236 = vmatpush.msrb.mxu0 %v5521_v34  ;;  %v2982_v34 = vsub.f32 1.0, %v2981_v36  ;;  %v6733_v49 = vld [vmem:[#allocation41_spill] sm:$0xff] }
 0x319   :  { %3256 = vmatpush.msrb.mxu1 %v5523_v63 }
 0x31a   :  { %3237 = vmatpush.msrb.mxu0 %v5534_v32 }
 0x31b   :  { %3257 = vmatpush.msrb.mxu1 %v5536_v10  ;;  %v5966_v48 = vpop.f32.mrf.mxu0  ;;  %v1945_v32 = vpop.f32.mrf.mxu1  ;;  %v6723_v10 = vld [vmem:[#allocation42_spill] sm:$0xff] }
 0x31c   :  { %v2225_v15 = vadd.f32 %v5966_v48, %v6720_v31  ;;  %3238 = vmatpush.msrb.mxu0 %v6721_v42  ;;  %v6729_v31 = vld [vmem:[#allocation83_spill] sm:$0xff]  ;;  %v6731_v42 = vld [vmem:[#allocation85_spill] sm:$0xff] }
 0x31d   :  { %3258 = vmatpush.msrb.mxu1 %v6722_v56 }
 0x31e   :  { %v2296_v30 = vmax.f32 %v2224_v55, %v2225_v15  ;;  %3239 = vmatpush.msrb.mxu0 %v6723_v10  ;;  %v6728_v55 = vld [vmem:[#allocation82_spill] sm:$0xff]  ;;  %v6730_v15 = vld [vmem:[#allocation84_spill] sm:$0xff] }
 0x31f   :  { %3259 = vmatpush.msrb.mxu1 %v5568_v58  ;;  %v2983_v58 = vmul.f32 %v5962_v11, %v2982_v34  ;;  %v6735_v34 = vld [vmem:[#allocation24_spill] sm:$0xff] }
 0x320   :  { %v2297_v23 = vrot.slane %v2296_v30, 4  ;;  %3240 = vmatpush.msrb.mxu0 %v6724_v22  ;;  %v2989_v22 = vand.u32 2147483647, %v5942_v40 }
 0x321   :  { %3260 = vmatpush.msrb.mxu1 %v6725_v3  ;;  %v6734_v3 = vld [vmem:[#allocation26_spill] sm:$0xff] }
 0x322   :  { %v2298_v63 = vmax.f32 %v2296_v30, %v2297_v23  ;;  %3241 = vmatpush.msrb.mxu0 %v6726_v24  ;;  %v2964_v30 = vmul.f32 %v5974_v33, %v2963_v59  ;;  %v2991_v23 = vand.u32 2147483648, %v5942_v40  ;;  %v2972_v59 = vand.u32 2147483648, %v5950_v13 }
 0x323   :  { %3261 = vmatpush.msrb.mxu1 %v6727_v60  ;;  %v2753_v56 = vpop.f32.mrf.mxu0  ;;  %v2773_v36 = vpop.f32.mrf.mxu1  ;;  %vm2990_vm4 = vcmp.eq.f32.partialorder %v2989_v22, 8.507059e+37 }
 0x324   :  { %3242 = vmatpush.msrb.mxu0 %v5603_v0  ;;  %v2299_v52 = vrot.slane %v2298_v63, 2  ;;  %v2984_v0 = vadd.f32 %v5962_v11, %v2983_v58  ;;  %v2992_v40 = vor.u32 1.1754944e-38, %v2991_v23  ;;  %v6741_v23 = vld [vmem:[#allocation52_spill] sm:$0xff] }
 0x325   :  { %3262 = vmatpush.msrb.mxu1 %v5605_v46  ;;  %v6732_v46 = vld [vmem:[#allocation68_spill] sm:$0xff]  ;;  %v2210_v22 = vadd.f32 %v5946_v1, %v6741_v23 }
 0x326   :  { %3243 = vmatpush.msrb.mxu0 %v6728_v55  ;;  %v2300_v10 = vmax.f32 %v2298_v63, %v2299_v52  ;;  %v2965_v63 = vadd.f32 %v5974_v33, %v2964_v30  ;;  %v2988_v58 = vsel %vm6005_vm1, %v5962_v11, %v2984_v0  ;;  %v2970_v52 = vand.u32 2147483647, %v5950_v13  ;;  %v6748_v55 = vld [vmem:[#allocation30_spill] sm:$0xff] }
 0x327   :  { %3263 = vmatpush.msrb.mxu1 %v6729_v31  ;;  %v2993_v31 = vsel %vm2990_vm4, %v2992_v40, %v2988_v58  ;;  %v6747_v40 = vld [vmem:[#allocation67_spill] sm:$0xff] }
 0x328   :  { %3383 = vmatpush.msra.mxu0 %v6730_v15  ;;  %v2301_v60 = vrot.slane %v2300_v10, 1  ;;  %v2969_v13 = vsel %vm6017_vm3, %v5974_v33, %v2965_v63  ;;  %vm2971_vm5 = vcmp.eq.f32.partialorder %v2970_v52, 8.507059e+37  ;;  %v6743_v63 = vld [vmem:[#allocation27_spill] sm:$0xff]  ;;  %v2222_v52 = vadd.f32 %v5946_v1, %v6747_v40  ;;  %v6757_v40 = vld [vmem:[#allocation60_spill] sm:$0xff] }
 0x329   :  { %3403 = vmatpush.msra.mxu1 %v6731_v42  ;;  %v2973_v42 = vor.u32 1.1754944e-38, %v2972_v59  ;;  %v2214_v24 = vadd.f32 %v5946_v1, %v6743_v63  ;;  %v6746_v59 = vld [vmem:[#allocation65_spill] sm:$0xff]  ;;  %v6754_v63 = vld [vmem:[#allocation54_spill] sm:$0xff] }
 0x32a   :  { %3384 = vmatpush.msra.mxu0 %v6732_v46  ;;  %v2302_v15 = vmax.f32 %v2300_v10, %v2301_v60  ;;  %v2220_v58 = vadd.f32 %v5946_v1, %v6746_v59 }
 0x32b   :  { %3404 = vmatpush.msra.mxu1 %v6733_v49  ;;  %v6036_v30 = vsel %vm2971_vm5, %v2973_v42, %v2969_v13  ;;  %v6749_v13 = vld [vmem:[#allocation66_spill] sm:$0xff] }
 0x32c   :  { %3385 = vmatpush.msra.mxu0 %v6734_v3  ;;  %v6742_v3 = vld [vmem:[#allocation55_spill] sm:$0xff] }
 0x32d   :  { %3405 = vmatpush.msra.mxu1 %v6735_v34  ;;  %v2212_v34 = vadd.f32 %v5946_v1, %v6742_v3 }
 0x32e   :  { %3386 = vmatpush.msra.mxu0 %v5698_v38  ;;  %v4058_v38 = vld [vmem:[%s6358_s9 + $0x2] ss:$0 sm:$0xff] }
 0x32f   :  { %3406 = vmatpush.msra.mxu1 %v5701_v27  ;;  %v6027_v27 = vadd.f32 %v4058_v38, %v5953_v51  ;;  %v6029_v11 = vadd.f32 %v4058_v38, %v1945_v32  ;;  %v6038_v51 = vmul.f32 0.0, %v2993_v31  ;;  %v6079_v38 = vadd.f32 %v5946_v1, %v6748_v55 }
 0x330   :  { %3387 = vmatpush.msra.mxu0 %v5713_v61  ;;  %v2837_v61 = vpop.f32.mrf.mxu0  ;;  %v2215_v55 = vadd.f32 %v5966_v48, %v6757_v40  ;;  %v6762_v40 = vld [vmem:[#allocation76_spill] sm:$0xff] }
 0x331   :  { %3407 = vmatpush.msra.mxu1 %v5716_v41  ;;  %v2857_v41 = vpop.f32.mrf.mxu1  ;;  %v6048_v0 = vadd.f32 %v2302_v15, %v6029_v11  ;;  %v6050_v46 = vadd.f32 %v2837_v61, %v2753_v56  ;;  %v6065_v56 = vperm.slane %v5872_v35, 2  ;;  %v6751_v15 = vld [vmem:[#allocation78_spill] sm:$0xff]  ;;  %v6752_v61 = vld [vmem:[#allocation33_spill] sm:$0xff] }
 0x332   :  { %3388 = vmatpush.msra.mxu0 %v5727_v54  ;;  %v6052_v49 = vadd.f32 %v2857_v41, %v2773_v36  ;;  %v6745_v36 = vld [vmem:[#allocation58_spill] sm:$0xff]  ;;  %v6093_v42 = vadd.f32 %v5946_v1, %v6751_v15  ;;  %v6097_v41 = vadd.f32 %v5946_v1, %v6752_v61 }
 0x333   :  { %3408 = vmatpush.msra.mxu1 %v5730_v50  ;;  %v2218_v60 = vadd.f32 %v5946_v1, %v6745_v36  ;;  %v6756_v36 = vld [vmem:[#allocation53_spill] sm:$0xff]  ;;  %v6759_v61 = vld [vmem:[#allocation62_spill] sm:$0xff] }
 0x334   :  { %3389 = vmatpush.msra.mxu0 %v5737_v37  ;;  %v6740_v37 = vld [vmem:[#allocation57_spill] sm:$0xff]  ;;  %v2213_v59 = vadd.f32 %v5966_v48, %v6756_v36  ;;  %v6761_v36 = vld [vmem:[#allocation64_spill] sm:$0xff] }
 0x335   :  { %3409 = vmatpush.msra.mxu1 %v5740_v12  ;;  %v2208_v12 = vadd.f32 %v5946_v1, %v6740_v37  ;;  %v6753_v37 = vld [vmem:[#allocation73_spill] sm:$0xff]  ;;  %v2223_v54 = vadd.f32 %v5966_v48, %v6761_v36 }
 0x336   :  { %3390 = vmatpush.msra.mxu0 %v5748_v9  ;;  %v6744_v9 = vld [vmem:[#allocation56_spill] sm:$0xff]  ;;  %v6101_v23 = vadd.f32 %v5946_v1, %v6753_v37  ;;  %v2219_v37 = vadd.f32 %v5966_v48, %v6759_v61  ;;  %v6765_v36 = vld [vmem:[#allocation69_spill] sm:$0xff] }
 0x337   :  { %3410 = vmatpush.msra.mxu1 %v5751_v17  ;;  %v2216_v17 = vadd.f32 %v5946_v1, %v6744_v9  ;;  %v2209_v9 = vadd.f32 %v5966_v48, %v6754_v63  ;;  %v6760_v63 = vld [vmem:[#allocation61_spill] sm:$0xff] }
 0x338   :  { %3391 = vmatpush.msra.mxu0 %v5758_v28  ;;  %v6083_v28 = vadd.f32 %v5946_v1, %v6749_v13  ;;  %v6113_v13 = vperm.slane %v5872_v35, 3  ;;  %v6127_v35 = vadd.f32 %v5946_v1, %v6762_v40  ;;  %v2359_v40 = vrot.slane %v6027_v27, 6 }
 0x339   :  { %3411 = vmatpush.msra.mxu1 %v5761_v6  ;;  %v6750_v6 = vld [vmem:[#allocation75_spill] sm:$0xff]  ;;  %v2240_v10 = vmax.f32 %v2208_v12, %v2209_v9 }
 0x33a   :  { %v6087_v31 = vadd.f32 %v5946_v1, %v6750_v6  ;;  %3392 = vmatpush.msra.mxu0 %v5767_v20  ;;  %v6755_v20 = vld [vmem:[#allocation59_spill] sm:$0xff]  ;;  %v6143_v1 = vadd.f32 %v5966_v48, %v6765_v36 }
 0x33b   :  { %3412 = vmatpush.msra.mxu1 %v5770_v62  ;;  %v2211_v62 = vadd.f32 %v5966_v48, %v6755_v20  ;;  %v6758_v6 = vld [vmem:[#allocation63_spill] sm:$0xff]  ;;  %v2221_v20 = vadd.f32 %v5966_v48, %v6760_v63  ;;  %v6764_v63 = vld [vmem:[#allocation72_spill] sm:$0xff]  ;;  %v2241_v32 = vrot.slane %v2240_v10, 4 }
 0x33c   :  { %3393 = vmatpush.msra.mxu0 %v5775_v5  ;;  %v2217_v15 = vadd.f32 %v5966_v48, %v6758_v6  ;;  %v6763_v6 = vld [vmem:[#allocation70_spill] sm:$0xff]  ;;  %v6139_v50 = vadd.f32 %v5966_v48, %v6764_v63  ;;  %v2254_v5 = vmax.f32 %v2212_v34, %v2213_v59  ;;  %v6766_v12 = vld [vmem:[#allocation71_spill] sm:$0xff] }
 0x33d   :  { %3413 = vmatpush.msra.mxu1 %v5778_v29  ;;  %v6135_v61 = vadd.f32 %v5966_v48, %v6763_v6  ;;  %v2247_v29 = vmax.f32 %v2210_v22, %v2211_v62  ;;  %v2275_v6 = vmax.f32 %v2218_v60, %v2219_v37  ;;  %v2282_v3 = vmax.f32 %v2220_v58, %v2221_v20  ;;  %v6767_v9 = vld [vmem:[#allocation23_spill] sm:$0xff] }
 0x33e   :  { %3394 = vmatpush.msra.mxu0 %v5785_v8  ;;  %v2261_v8 = vmax.f32 %v2214_v24, %v2215_v55  ;;  %v2255_v18 = vrot.slane %v2254_v5, 4  ;;  %v2233_v22 = vadd.f32 %v5966_v48, %v6766_v12  ;;  %v2289_v55 = vmax.f32 %v2222_v52, %v2223_v54 }
 0x33f   :  { %3414 = vmatpush.msra.mxu1 %v5788_v47  ;;  %v2268_v47 = vmax.f32 %v2216_v17, %v2217_v15  ;;  %v2248_v33 = vrot.slane %v2247_v29, 4  ;;  %v2283_v24 = vrot.slane %v2282_v3, 4 }
 0x340   :  { %3395 = vmatpush.msra.mxu0 %v5791_v26  ;;  %v2262_v36 = vrot.slane %v2261_v8, 4  ;;  %v2276_v26 = vrot.slane %v2275_v6, 4  ;;  %v2256_v60 = vmax.f32 %v2254_v5, %v2255_v18 }
 0x341   :  { %3415 = vmatpush.msra.mxu1 %v5794_v16  ;;  %v2269_v34 = vrot.slane %v2268_v47, 4  ;;  %v2242_v16 = vmax.f32 %v2240_v10, %v2241_v32  ;;  %v2249_v17 = vmax.f32 %v2247_v29, %v2248_v33  ;;  %v6768_v33 = vld [vmem:[#allocation29_spill] sm:$0xff] }
 0x342   :  { %3396 = vmatpush.msra.mxu0 %v5797_v57  ;;  %v2263_v58 = vmax.f32 %v2261_v8, %v2262_v36  ;;  %v2277_v59 = vmax.f32 %v2275_v6, %v2276_v26  ;;  %v2363_v57 = vrot.slane %v6029_v11, 3  ;;  %v2257_v12 = vrot.slane %v2256_v60, 2  ;;  %v6770_v26 = vld [vmem:[#allocation80_spill] sm:$0xff] }
 0x343   :  { %3416 = vmatpush.msra.mxu1 %v5800_v21  ;;  %v2270_v62 = vmax.f32 %v2268_v47, %v2269_v34  ;;  %v2243_v37 = vrot.slane %v2242_v16, 2  ;;  %v2250_v20 = vrot.slane %v2249_v17, 2  ;;  %v2284_v8 = vmax.f32 %v2282_v3, %v2283_v24 }
 0x344   :  { %3397 = vmatpush.msra.mxu0 %v5803_v43  ;;  %v2917_v21 = vpop.f32.mrf.mxu0  ;;  %v2937_v15 = vpop.f32.mrf.mxu1  ;;  %v2264_v63 = vrot.slane %v2263_v58, 2  ;;  %v6769_v43 = vld [vmem:[#allocation31_spill] sm:$0xff]  ;;  %v2278_v5 = vrot.slane %v2277_v59, 2  ;;  %v2258_v52 = vmax.f32 %v2256_v60, %v2257_v12 }
 0x345   :  { %3417 = vmatpush.msra.mxu1 %v6767_v9  ;;  %v2942_v32 = vadd.f32 %v2917_v21, %v6050_v46  ;;  %v2943_v18 = vadd.f32 %v2937_v15, %v6052_v49  ;;  %v2271_v10 = vrot.slane %v2270_v62, 2  ;;  %v2244_v29 = vmax.f32 %v2242_v16, %v2243_v37  ;;  %v6771_v49 = vld [vmem:[#allocation81_spill] sm:$0xff] }
 0x346   :  { %3398 = vmatpush.msra.mxu0 %v6768_v33  ;;  %v2251_v54 = vmax.f32 %v2249_v17, %v2250_v20  ;;  %v2265_v36 = vmax.f32 %v2263_v58, %v2264_v63  ;;  %v2235_v46 = vadd.f32 %v5966_v48, %v6770_v26  ;;  %v2237_v9 = vadd.f32 %v5966_v48, %v6771_v49  ;;  %v6772_v21 = vld [vmem:[#allocation77_spill] sm:$0xff] }
 0x347   :  { %3418 = vmatpush.msra.mxu1 %v6769_v43  ;;  %v2955_v47 = vadd.f32 %v6065_v56, %v2942_v32  ;;  %v2956_v6 = vadd.f32 %v6113_v13, %v2943_v18  ;;  %v2272_v34 = vmax.f32 %v2270_v62, %v2271_v10  ;;  %v6168_v15 = vadd.f32 %v5966_v48, %v6772_v21 }
 0x348   :  { %v2290_v16 = vrot.slane %v2289_v55, 4  ;;  %v2279_v3 = vmax.f32 %v2277_v59, %v2278_v5  ;;  %v2245_v60 = vrot.slane %v2244_v29, 1  ;;  %v2252_v37 = vrot.slane %v2251_v54, 1 }
 0x349   :  { %3838 = vtanh.f32 %v2955_v47  ;;  %v3767_v17 = vmul.f32 -1.442695, %v2956_v6  ;;  %v2259_v63 = vrot.slane %v2258_v52, 1  ;;  %v2266_v62 = vrot.slane %v2265_v36, 1 }
 0x34a   :  { %v2273_v20 = vrot.slane %v2272_v34, 1  ;;  %v2285_v12 = vrot.slane %v2284_v8, 2  ;;  %v2291_v32 = vmax.f32 %v2289_v55, %v2290_v16  ;;  %v2303_v48 = vmax.f32 %v6079_v38, %v6135_v61 }
 0x34b   :  { %3840 = vpow2.f32 %v3767_v17  ;;  %v2310_v18 = vmax.f32 %v6083_v28, %v6139_v50  ;;  %v2317_v59 = vmax.f32 %v6087_v31, %v6143_v1  ;;  %v2280_v33 = vrot.slane %v2279_v3, 1 }
 0x34c   :  { %v2324_v43 = vmax.f32 %v6093_v42, %v2233_v22  ;;  %v2331_v10 = vmax.f32 %v6097_v41, %v2235_v46  ;;  %v2338_v5 = vmax.f32 %v6101_v23, %v2237_v9  ;;  %v2292_v47 = vrot.slane %v2291_v32, 2 }
 0x34d   :  { %v2304_v6 = vrot.slane %v2303_v48, 4  ;;  %v2311_v26 = vrot.slane %v2310_v18, 4  ;;  %v2318_v55 = vrot.slane %v2317_v59, 4  ;;  %v2246_v21 = vmax.f32 %v2244_v29, %v2245_v60 }
 0x34e   :  { %v6181_v38 = vmax.f32 %v2251_v54, %v2252_v37  ;;  %v2325_v61 = vrot.slane %v2324_v43, 4  ;;  %v2332_v50 = vrot.slane %v2331_v10, 4  ;;  %v6183_v28 = vmax.f32 %v2258_v52, %v2259_v63 }
 0x34f   :  { %v3839_v49 = vpop.eup %3838  ;;  %v2286_v31 = vmax.f32 %v2284_v8, %v2285_v12  ;;  %v2305_v1 = vmax.f32 %v2303_v48, %v2304_v6  ;;  %v2312_v16 = vmax.f32 %v2310_v18, %v2311_v26  ;;  %v2319_v22 = vmax.f32 %v2317_v59, %v2318_v55 }
 0x350   :  { %v3016_v41 = vmul.f32 %v3839_v49, %v6036_v30  ;;  %v2326_v23 = vmax.f32 %v2324_v43, %v2325_v61  ;;  %v2333_v46 = vmax.f32 %v2331_v10, %v2332_v50  ;;  %v2293_v17 = vmax.f32 %v2291_v32, %v2292_v47 }
 0x351   :  { %v3841_v42 = vpop.eup %3840  ;;  %v2306_v58 = vrot.slane %v2305_v1, 2  ;;  %v2339_v29 = vrot.slane %v2338_v5, 4  ;;  %v2313_v54 = vrot.slane %v2312_v16, 2  ;;  %v2320_v60 = vrot.slane %v2319_v22, 2 }
 0x352   :  { %v6186_v9 = vadd.f32 1.0, %v3841_v42  ;;  %v2327_v37 = vrot.slane %v2326_v23, 2  ;;  %v2334_v24 = vrot.slane %v2333_v46, 2  ;;  %v2267_v52 = vmax.f32 %v2265_v36, %v2266_v62 }
 0x353   :  { %v2274_v63 = vmax.f32 %v2272_v34, %v2273_v20  ;;  %v2281_v8 = vmax.f32 %v2279_v3, %v2280_v33  ;;  %v2287_v12 = vrot.slane %v2286_v31, 1  ;;  %v6189_v48 = vadd.f32 %v3016_v41, %v6038_v51 }
 0x354   :  { %3842 = vrcp.f32 %v6186_v9  ;;  %v2307_v30 = vmax.f32 %v2305_v1, %v2306_v58  ;;  %v2314_v18 = vmax.f32 %v2312_v16, %v2313_v54  ;;  %v3011_v59 = vand.u32 2147483648, %v6186_v9 }
 0x355   :  { %v2294_v32 = vrot.slane %v2293_v17, 1  ;;  %v2321_v43 = vmax.f32 %v2319_v22, %v2320_v60  ;;  %v2328_v10 = vmax.f32 %v2326_v23, %v2327_v37  ;;  %v2335_v26 = vmax.f32 %v2333_v46, %v2334_v24 }
 0x356   :  { %v2308_v47 = vrot.slane %v2307_v30, 1  ;;  %v2315_v6 = vrot.slane %v2314_v18, 1  ;;  %v2340_v55 = vmax.f32 %v2338_v5, %v2339_v29  ;;  %v3009_v36 = vand.u32 2147483647, %v6186_v9 }
 0x357   :  { %v2322_v34 = vrot.slane %v2321_v43, 1  ;;  %v2329_v3 = vrot.slane %v2328_v10, 1  ;;  %v2345_v51 = vmax.f32 %v6127_v35, %v6168_v15  ;;  %3844 = vtanh.f32 %v6189_v48 }
 0x358   :  { %v2288_v58 = vmax.f32 %v2286_v31, %v2287_v12  ;;  %v2336_v62 = vrot.slane %v2335_v26, 1  ;;  %v2341_v20 = vrot.slane %v2340_v55, 2  ;;  %vm3005_vm13 = vweird.f32 %v6186_v9 }
 0x359   :  { %v3012_v33 = vor.u32 1.1754944e-38, %v3011_v59  ;;  %v2295_v49 = vmax.f32 %v2293_v17, %v2294_v32  ;;  %v2346_v61 = vrot.slane %v2345_v51, 4  ;;  %v2309_v24 = vmax.f32 %v2307_v30, %v2308_v47 }
 0x35a   :  { %v3843_v50 = vpop.eup %3842  ;;  %v2316_v5 = vmax.f32 %v2314_v18, %v2315_v6  ;;  %v2342_v1 = vmax.f32 %v2340_v55, %v2341_v20  ;;  %v2366_v16 = vrot.slane %v6029_v11, 6  ;;  %vm6200_vm14 = vcmp.eq.f32.partialorder %v3009_v36, 8.507059e+37 }
 0x35b   :  { %v3001_v42 = vmul.f32 %v3843_v50, %v6186_v9  ;;  %v2323_v15 = vmax.f32 %v2321_v43, %v2322_v34  ;;  %v2330_v31 = vmax.f32 %v2328_v10, %v2329_v3  ;;  %v2347_v41 = vmax.f32 %v2345_v51, %v2346_v61 }
 0x35c   :  { %v2337_v22 = vmax.f32 %v2335_v26, %v2336_v62  ;;  %v2343_v23 = vrot.slane %v2342_v1, 1  ;;  %v2367_v46 = vrot.slane %v6029_v11, 7  ;;  %v2384_v17 = vadd.f32 %v2246_v21, %v6027_v27 }
 0x35d   :  { %v3002_v29 = vsub.f32 1.0, %v3001_v42  ;;  %vm3006_vm15 = vweird.f32 %v3843_v50  ;;  %v2348_v54 = vrot.slane %v2347_v41, 2  ;;  %v6775_v60 = vrot.slane %v6027_v27, 1  ;;  %v3845_v12 = vpop.eup %3844 }
 0x35e   :  { %v2344_v30 = vmax.f32 %v2342_v1, %v2343_v23  ;;  %v6776_v18 = vrot.slane %v6027_v27, 2  ;;  %v6777_v32 = vrot.slane %v6027_v27, 3  ;;  %v6778_v10 = vrot.slane %v6027_v27, 4  ;;  %vm3007_vm0 = vmor %vm3005_vm13, %vm3006_vm15 }
 0x35f   :  { %v2385_v37 = vadd.f32 %v6775_v60, %v6181_v38  ;;  %v3003_v21 = vmul.f32 %v3843_v50, %v3002_v29  ;;  %v2349_v6 = vmax.f32 %v2347_v41, %v2348_v54  ;;  %v6779_v26 = vrot.slane %v6027_v27, 5 }
 0x360   :  { %v2386_v59 = vadd.f32 %v6776_v18, %v6183_v28  ;;  %v2387_v43 = vadd.f32 %v6777_v32, %v2267_v52  ;;  %v2388_v47 = vadd.f32 %v6778_v10, %v2274_v63  ;;  %v2390_v38 = vadd.f32 %v2359_v40, %v2288_v58  ;;  %v4059_v32 = vld [vmem:[#allocation8 + $0x1e0] sm:$0xff] }
 0x361   :  { %v2389_v55 = vadd.f32 %v6779_v26, %v2281_v8  ;;  %v6780_v36 = vrot.slane %v6027_v27, 7  ;;  %v6781_v28 = vrot.slane %v6029_v11, 1  ;;  %v6782_v52 = vrot.slane %v6029_v11, 2  ;;  %v6786_v26 = vld [vmem:[#allocation21_spill] sm:$0xff] }
 0x362   :  { %v2395_v63 = vadd.f32 %v2363_v57, %v2323_v15  ;;  %v3004_v62 = vadd.f32 %v3843_v50, %v3003_v21  ;;  %v2350_v20 = vrot.slane %v2349_v6, 1  ;;  %v6783_v8 = vrot.slane %v6029_v11, 4 }
 0x363   :  { %v6222_v34 = vadd.f32 %v6780_v36, %v2295_v49  ;;  %v2393_v3 = vadd.f32 %v6781_v28, %v2309_v24  ;;  %v2394_v51 = vadd.f32 %v6782_v52, %v2316_v5  ;;  %v2401_v1 = vmax.f32 %v2385_v37, 0.0  ;;  %v4061_v28 = vld [vmem:[#allocation8 + $0x1c0] sm:$0xff] }
 0x364   :  { %v2396_v61 = vadd.f32 %v6783_v8, %v2330_v31  ;;  %v6784_v27 = vrot.slane %v6029_v11, 5  ;;  %v6237_v58 = vadd.f32 %v2366_v16, %v2344_v30  ;;  %v2400_v49 = vmax.f32 %v2384_v17, 0.0 }
 0x365   :  { %v2402_v24 = vmax.f32 %v2386_v59, 0.0  ;;  %v3008_v5 = vsel %vm3007_vm0, %v3843_v50, %v3004_v62  ;;  %v2351_v42 = vmax.f32 %v2349_v6, %v2350_v20  ;;  %v2403_v57 = vmax.f32 %v2387_v43, 0.0  ;;  %v4060_v43 = vld [vmem:[#allocation8 + $0x1e8] sm:$0xff]  ;;  %v6788_v20 = vld [vmem:[#allocation34_spill] sm:$0xff] }
 0x366   :  { %v2397_v40 = vadd.f32 %v6784_v27, %v2337_v22  ;;  %v2404_v15 = vmax.f32 %v2388_v47, 0.0  ;;  %v3013_v41 = vsel %vm6200_vm14, %v3012_v33, %v3008_v5  ;;  %v2405_v31 = vmax.f32 %v2389_v55, 0.0  ;;  %v6785_v6 = vld [vmem:[#allocation28_spill] sm:$0xff] }
 0x367   :  { %v2409_v23 = vmax.f32 %v2393_v3, 0.0  ;;  %v2410_v29 = vmax.f32 %v2394_v51, 0.0  ;;  %v3019_v54 = vmul.f32 %v3845_v12, %v3013_v41  ;;  %v2399_v9 = vadd.f32 %v2367_v46, %v2351_v42  ;;  %v4062_v3 = vld [vmem:[#allocation8 + $0x1c8] sm:$0xff] }
 0x368   :  { %v2406_v60 = vmax.f32 %v2390_v38, 0.0  ;;  %v2432_v37 = vrot.slane %v2401_v1, 7  ;;  %v2407_v11 = vmax.f32 %v6222_v34, 0.0  ;;  %v2408_v16 = vmax.f32 %v6048_v0, 0.0  ;;  %v6787_v62 = vld [vmem:[#allocation32_spill] sm:$0xff] }
 0x369   :  { %v2411_v22 = vmax.f32 %v2395_v63, 0.0  ;;  %v2434_v17 = vrot.slane %v2402_v24, 6  ;;  %3204 = vmatmul.f32.vlgmr.msra.gmra.mxu2 %v3019_v54  ;;  %3224 = vmatmul.f32.vlgmr.msra.gmra.mxu3 %v3019_v54  ;;  %v2412_v50 = vmax.f32 %v2396_v61, 0.0  ;;  %v2413_v30 = vmax.f32 %v2397_v40, 0.0  ;;  %v4063_v40 = vld [vmem:[#allocation8 + $0x1a0] sm:$0xff] }
 0x36a   :  { %v2433_v35 = vsel %vm673_vm6, %v2432_v37, %v2400_v49  ;;  %v2436_v33 = vrot.slane %v2403_v57, 5  ;;  %3244 = vmatmul.f32.vlgmr.msrb.gmra.mxu0 %v3019_v54  ;;  %3264 = vmatmul.f32.vlgmr.msrb.gmra.mxu1 %v3019_v54  ;;  %v2438_v46 = vrot.slane %v2404_v15, 4  ;;  %v2446_v18 = vrot.slane %v2409_v23, 7  ;;  %v6790_v57 = vld [vmem:[#allocation35_spill] sm:$0xff]  ;;  %v6791_v15 = vld [vmem:[#allocation38_spill] sm:$0xff]  ;;  %v4066_v54 = vld [vmem:[#allocation8 + $0x188] sm:$0xff] }
 0x36b   :  { %v2435_v12 = vsel %vm676_vm7, %v2434_v17, %v2433_v35  ;;  %v2448_v59 = vrot.slane %v2410_v29, 6  ;;  %3427 = vmatpush.msra.mxu2 %v4059_v32  ;;  %3447 = vmatpush.msra.mxu3 %v4060_v43  ;;  %v2414_v0 = vmax.f32 %v6237_v58, 0.0  ;;  %v2415_v10 = vmax.f32 %v2399_v9, 0.0  ;;  %v4064_v58 = vld [vmem:[#allocation8 + $0x1a8] sm:$0xff]  ;;  %v4065_v29 = vld [vmem:[#allocation8 + $0x180] sm:$0xff] }
 0x36c   :  { %v2437_v47 = vsel %vm679_vm8, %v2436_v33, %v2435_v12  ;;  %v2440_v21 = vrot.slane %v2405_v31, 3  ;;  %3467 = vmatpush.msrb.mxu0 %v6785_v6  ;;  %3487 = vmatpush.msrb.mxu1 %v6786_v26  ;;  %v2442_v38 = vrot.slane %v2406_v60, 2  ;;  %v2447_v36 = vsel %vm673_vm6, %v2446_v18, %v2408_v16  ;;  %v6792_v60 = vld [vmem:[#allocation37_spill] sm:$0xff]  ;;  %v6793_v37 = vld [vmem:[#allocation36_spill] sm:$0xff]  ;;  %v6796_v12 = vld [vmem:[#allocation22_spill] sm:$0xff] }
 0x36d   :  { %v2439_v55 = vsel %vm682_vm9, %v2438_v46, %v2437_v47  ;;  %v2450_v34 = vrot.slane %v2411_v22, 5  ;;  %3428 = vmatpush.msra.mxu2 %v4061_v28  ;;  %3448 = vmatpush.msra.mxu3 %v4062_v3  ;;  %v2449_v51 = vsel %vm676_vm7, %v2448_v59, %v2447_v36  ;;  %v2452_v63 = vrot.slane %v2412_v50, 4  ;;  %v4067_v50 = vld [vmem:[#allocation8 + $0x160] sm:$0xff]  ;;  %v4070_v59 = vld [vmem:[#allocation8 + $0x148] sm:$0xff] }
 0x36e   :  { %v2441_v52 = vsel %vm685_vm10, %v2440_v21, %v2439_v55  ;;  %3468 = vmatpush.msrb.mxu0 %v6787_v62  ;;  %3488 = vmatpush.msrb.mxu1 %v6788_v20  ;;  %v2444_v61 = vrot.slane %v2407_v11, 1  ;;  %v2454_v27 = vrot.slane %v2413_v30, 3  ;;  %v2456_v24 = vrot.slane %v2414_v0, 2  ;;  %v6794_v11 = vld [vmem:[#allocation20_spill] sm:$0xff]  ;;  %v6797_v43 = vld [vmem:[#allocation43_spill] sm:$0xff]  ;;  %v6798_v0 = vld [vmem:[#allocation46_spill] sm:$0xff] }
 0x36f   :  { %v2443_v8 = vsel %vm688_vm11, %v2442_v38, %v2441_v52  ;;  %v2451_v1 = vsel %vm679_vm8, %v2450_v34, %v2449_v51  ;;  %3429 = vmatpush.msra.mxu2 %v4063_v40  ;;  %3449 = vmatpush.msra.mxu3 %v4064_v58  ;;  %v6789_v5 = vrot.slane %v5781_v53, 4  ;;  %v2458_v23 = vrot.slane %v2415_v10, 1  ;;  %v4068_v30 = vld [vmem:[#allocation8 + $0x168] sm:$0xff]  ;;  %v4069_v18 = vld [vmem:[#allocation8 + $0x140] sm:$0xff]  ;;  %v6801_v51 = vld [vmem:[#allocation50_spill] sm:$0xff] }
 0x370   :  { %v2453_v49 = vsel %vm682_vm9, %v2452_v63, %v2451_v1  ;;  %3469 = vmatpush.msrb.mxu0 %v6790_v57  ;;  %3489 = vmatpush.msrb.mxu1 %v6791_v15  ;;  %v2445_v41 = vsel %vm691_vm12, %v2444_v61, %v2443_v8  ;;  %v2469_v16 = vrot.slane %v6794_v11, 4  ;;  %v6795_v33 = vld [vmem:[#allocation40_spill] sm:$0xff]  ;;  %v6799_v38 = vld [vmem:[#allocation49_spill] sm:$0xff]  ;;  %v6802_v63 = vld [vmem:[#allocation86_spill] sm:$0xff] }
 0x371   :  { %v2486_v42 = vmax.f32 %v5781_v53, %v6789_v5  ;;  %v2455_v31 = vsel %vm685_vm10, %v2454_v27, %v2453_v49  ;;  %3430 = vmatpush.msra.mxu2 %v4065_v29  ;;  %3450 = vmatpush.msra.mxu3 %v4066_v54  ;;  %v4071_v6 = vld [vmem:[#allocation8 + $0x120] sm:$0xff]  ;;  %v4072_v26 = vld [vmem:[#allocation8 + $0x128] sm:$0xff] }
 0x372   :  { %v2457_v9 = vsel %vm688_vm11, %v2456_v24, %v2455_v31  ;;  %3470 = vmatpush.msrb.mxu0 %v6792_v60  ;;  %3490 = vmatpush.msrb.mxu1 %v6793_v37  ;;  %v2470_v10 = vadd.f32 %v2469_v16, %v6794_v11  ;;  %v6800_v36 = vld [vmem:[#allocation25_spill] sm:$0xff]  ;;  %v4073_v28 = vld [vmem:[#allocation8 + $0x100] sm:$0xff]  ;;  %v6808_v16 = vld [vmem:[#allocation94_spill] sm:$0xff] }
 0x373   :  { %v2459_v53 = vsel %vm691_vm12, %v2458_v23, %v2457_v9  ;;  %v2487_v22 = vrot.slane %v2486_v42, 2  ;;  %3431 = vmatpush.msra.mxu2 %v4067_v50  ;;  %3451 = vmatpush.msra.mxu3 %v4068_v30  ;;  %v4074_v3 = vld [vmem:[#allocation8 + $0x108] sm:$0xff]  ;;  %v4075_v61 = vld [vmem:[#allocation8 + $0xe0] sm:$0xff] }
 0x374   :  { %v2491_v17 = vmax.f32 %v2445_v41, %v2459_v53  ;;  %v2475_v35 = vadd.f32 %v2459_v53, %v2445_v41  ;;  %3471 = vmatpush.msrb.mxu0 %v6795_v33  ;;  %3491 = vmatpush.msrb.mxu1 %v6796_v12  ;;  %v2471_v62 = vrot.slane %v2470_v10, 2  ;;  %v4076_v1 = vld [vmem:[#allocation8 + $0xe8] sm:$0xff]  ;;  %v6803_v27 = vld [vmem:[#allocation87_spill] sm:$0xff] }
 0x375   :  { %3432 = vmatpush.msra.mxu2 %v4069_v18  ;;  %3452 = vmatpush.msra.mxu3 %v4070_v59  ;;  %v2488_v47 = vmax.f32 %v2486_v42, %v2487_v22  ;;  %v4077_v49 = vld [vmem:[#allocation8 + $0xc0] sm:$0xff]  ;;  %v4078_v24 = vld [vmem:[#allocation8 + $0xc8] sm:$0xff] }
 0x376   :  { %v2492_v46 = vrot.slane %v2491_v17, 4  ;;  %v2476_v32 = vrot.slane %v2475_v35, 4  ;;  %3472 = vmatpush.msrb.mxu0 %v6797_v43  ;;  %3492 = vmatpush.msrb.mxu1 %v6798_v0  ;;  %v6804_v5 = vld [vmem:[#allocation88_spill] sm:$0xff]  ;;  %v6805_v42 = vld [vmem:[#allocation89_spill] sm:$0xff]  ;;  %v2472_v57 = vadd.f32 %v2471_v62, %v2470_v10  ;;  %v6809_v22 = vld [vmem:[#allocation95_spill] sm:$0xff] }
 0x377   :  { %3433 = vmatpush.msra.mxu2 %v4071_v6  ;;  %3453 = vmatpush.msra.mxu3 %v4072_v26  ;;  %v2489_v20 = vrot.slane %v2488_v47, 1  ;;  %v4079_v31 = vld [vmem:[#allocation8 + $0xa0] sm:$0xff]  ;;  %v4080_v23 = vld [vmem:[#allocation8 + $0xa8] sm:$0xff]  ;;  %v4094_v43 = vld [vmem:[#allocation9 + $0x1f8] sm:$0xff] }
 0x378   :  { %v2493_v21 = vmax.f32 %v2491_v17, %v2492_v46  ;;  %v2477_v55 = vadd.f32 %v2476_v32, %v2475_v35  ;;  %3473 = vmatpush.msrb.mxu0 %v6799_v38  ;;  %3493 = vmatpush.msrb.mxu1 %v6800_v36  ;;  %v4081_v54 = vld [vmem:[#allocation8 + $0x80] sm:$0xff]  ;;  %v4082_v9 = vld [vmem:[#allocation8 + $0x88] sm:$0xff]  ;;  %v2473_v60 = vrot.slane %v2472_v57, 1  ;;  %v4101_v6 = vld [vmem:[#allocation9 + $0x1b0] sm:$0xff] }
 0x379   :  { %3434 = vmatpush.msra.mxu2 %v4073_v28  ;;  %3454 = vmatpush.msra.mxu3 %v4074_v3  ;;  %v2490_v15 = vmax.f32 %v2488_v47, %v2489_v20  ;;  %v6806_v37 = vld [vmem:[#allocation92_spill] sm:$0xff]  ;;  %v6807_v53 = vld [vmem:[#allocation93_spill] sm:$0xff]  ;;  %v6810_v35 = vld [vmem:[#allocation79_spill] sm:$0xff] }
 0x37a   :  { %v2494_v34 = vrot.slane %v2493_v21, 2  ;;  %v2478_v52 = vrot.slane %v2477_v55, 2  ;;  %3474 = vmatpush.msrb.mxu0 %v6801_v51  ;;  %3494 = vmatpush.msrb.mxu1 %v6802_v63  ;;  %v2474_v17 = vadd.f32 %v2473_v60, %v2472_v57  ;;  %v4085_v50 = vld [vmem:[#allocation8 + $0x40] sm:$0xff]  ;;  %v4086_v30 = vld [vmem:[#allocation8 + $0x48] sm:$0xff]  ;;  %v4102_v26 = vld [vmem:[#allocation9 + $0x1b8] sm:$0xff] }
 0x37b   :  { %3435 = vmatpush.msra.mxu2 %v4075_v61  ;;  %3455 = vmatpush.msra.mxu3 %v4076_v1  ;;  %v4087_v12 = vld [vmem:[#allocation8 + $0x20] sm:$0xff]  ;;  %v4088_v46 = vld [vmem:[#allocation8 + $0x28] sm:$0xff]  ;;  %v4105_v36 = vld [vmem:[#allocation9 + $0x190] sm:$0xff] }
 0x37c   :  { %v2495_v8 = vmax.f32 %v2493_v21, %v2494_v34  ;;  %3475 = vmatpush.msrb.mxu0 %v6803_v27  ;;  %3495 = vmatpush.msrb.mxu1 %v5877_v4  ;;  %v2479_v40 = vadd.f32 %v2478_v52, %v2477_v55  ;;  %v2482_v18 = vmul.f32 %v2474_v17, %v6810_v35  ;;  %v4089_v59 = vld [vmem:[#allocation8] sm:$0xff]  ;;  %v4090_v32 = vld [vmem:[#allocation8 + $0x8] sm:$0xff]  ;;  %v4106_v34 = vld [vmem:[#allocation9 + $0x198] sm:$0xff] }
 0x37d   :  { %3436 = vmatpush.msra.mxu2 %v4077_v49  ;;  %3456 = vmatpush.msra.mxu3 %v4078_v24  ;;  %v4095_v0 = vld [vmem:[#allocation9 + $0x1c0] sm:$0xff]  ;;  %v4096_v10 = vld [vmem:[#allocation9 + $0x1c8] sm:$0xff]  ;;  %v4109_v52 = vld [vmem:[#allocation9 + $0x170] sm:$0xff] }
 0x37e   :  { %v2496_v58 = vrot.slane %v2495_v8, 1  ;;  %3476 = vmatpush.msrb.mxu0 %v6804_v5  ;;  %3496 = vmatpush.msrb.mxu1 %v6805_v42  ;;  %v2480_v4 = vrot.slane %v2479_v40, 1  ;;  %v4099_v47 = vld [vmem:[#allocation9 + $0x1a0] sm:$0xff]  ;;  %v4100_v21 = vld [vmem:[#allocation9 + $0x1a8] sm:$0xff]  ;;  %v4110_v51 = vld [vmem:[#allocation9 + $0x178] sm:$0xff] }
 0x37f   :  { %3437 = vmatpush.msra.mxu2 %v4079_v31  ;;  %3457 = vmatpush.msra.mxu3 %v4080_v23  ;;  %v4103_v55 = vld [vmem:[#allocation9 + $0x180] sm:$0xff]  ;;  %v4104_v38 = vld [vmem:[#allocation9 + $0x188] sm:$0xff]  ;;  %v4113_v20 = vld [vmem:[#allocation9 + $0x150] sm:$0xff] }
 0x380   :  { %v2497_v41 = vmax.f32 %v2495_v8, %v2496_v58  ;;  %3477 = vmatpush.msrb.mxu0 %v5891_v25  ;;  %3497 = vmatpush.msrb.mxu1 %v5894_v39  ;;  %v2481_v11 = vadd.f32 %v2480_v4, %v2479_v40  ;;  %v4083_v25 = vld [vmem:[#allocation8 + $0x60] sm:$0xff]  ;;  %v4084_v39 = vld [vmem:[#allocation8 + $0x68] sm:$0xff]  ;;  %v4114_v8 = vld [vmem:[#allocation9 + $0x158] sm:$0xff] }
 0x381   :  { %3438 = vmatpush.msra.mxu2 %v4081_v54  ;;  %3458 = vmatpush.msra.mxu3 %v4082_v9  ;;  %v4107_v28 = vld [vmem:[#allocation9 + $0x160] sm:$0xff]  ;;  %v4108_v3 = vld [vmem:[#allocation9 + $0x168] sm:$0xff]  ;;  %v4117_v27 = vld [vmem:[#allocation9 + $0x130] sm:$0xff] }
 0x382   :  { %v3341_v29 = vsel %vm673_vm6, %v2497_v41, %v2490_v15  ;;  %3478 = vmatpush.msrb.mxu0 %v6806_v37  ;;  %3498 = vmatpush.msrb.mxu1 %v6807_v53  ;;  %v2483_v33 = vmul.f32 %v2481_v11, %v6810_v35  ;;  %v4111_v63 = vld [vmem:[#allocation9 + $0x140] sm:$0xff]  ;;  %v4112_v62 = vld [vmem:[#allocation9 + $0x148] sm:$0xff]  ;;  %v4118_v40 = vld [vmem:[#allocation9 + $0x138] sm:$0xff] }
 0x383   :  { %3359 = vmatmul.f32.vlgmr.msrb.gmra.mxu2 %v3341_v29  ;;  %3379 = vmatmul.f32.vlgmr.msrb.gmra.mxu3 %v3341_v29  ;;  %v4115_v61 = vld [vmem:[#allocation9 + $0x120] sm:$0xff]  ;;  %v4116_v1 = vld [vmem:[#allocation9 + $0x128] sm:$0xff]  ;;  %v4121_v24 = vld [vmem:[#allocation9 + $0x110] sm:$0xff] }
 0x384   :  { %3399 = vmatmul.f32.vlgmr.msra.gmra.mxu0 %v3341_v29  ;;  %3419 = vmatmul.f32.vlgmr.msra.gmra.mxu1 %v3341_v29  ;;  %v4119_v58 = vld [vmem:[#allocation9 + $0x100] sm:$0xff]  ;;  %v4120_v49 = vld [vmem:[#allocation9 + $0x108] sm:$0xff]  ;;  %v4122_v5 = vld [vmem:[#allocation9 + $0x118] sm:$0xff] }
 0x385   :  { %3439 = vmatpush.msra.mxu2 %v4083_v25  ;;  %3459 = vmatpush.msra.mxu3 %v4084_v39  ;;  %v4123_v42 = vld [vmem:[#allocation9 + $0xe0] sm:$0xff]  ;;  %v4124_v57 = vld [vmem:[#allocation9 + $0xe8] sm:$0xff]  ;;  %v4125_v15 = vld [vmem:[#allocation9 + $0xf0] sm:$0xff] }
 0x386   :  { %3479 = vmatpush.msrb.mxu0 %v6808_v16  ;;  %3499 = vmatpush.msrb.mxu1 %v6809_v22  ;;  %v4126_v41 = vld [vmem:[#allocation9 + $0xf8] sm:$0xff]  ;;  %v4127_v31 = vld [vmem:[#allocation9 + $0xc0] sm:$0xff]  ;;  %v4128_v23 = vld [vmem:[#allocation9 + $0xc8] sm:$0xff] }
 0x387   :  { %3440 = vmatpush.msra.mxu2 %v4085_v50  ;;  %3460 = vmatpush.msra.mxu3 %v4086_v30  ;;  %v4129_v4 = vld [vmem:[#allocation9 + $0xd0] sm:$0xff]  ;;  %v4130_v29 = vld [vmem:[#allocation9 + $0xd8] sm:$0xff]  ;;  %v4131_v54 = vld [vmem:[#allocation9 + $0xa0] sm:$0xff] }
 0x388   :  { %3480 = vmatpush.msrb.mxu0 %v5914_v7  ;;  %3500 = vmatpush.msrb.mxu1 %v5917_v44  ;;  %v3425_v44 = vsel %vm673_vm6, %v2483_v33, %v2482_v18  ;;  %v4091_v7 = vld [vmem:[#allocation9 + $0x1e0] sm:$0xff]  ;;  %v4132_v9 = vld [vmem:[#allocation9 + $0xa8] sm:$0xff]  ;;  %v4133_v60 = vld [vmem:[#allocation9 + $0xb0] sm:$0xff] }
 0x389   :  { %3441 = vmatpush.msra.mxu2 %v4087_v12  ;;  %3461 = vmatpush.msra.mxu3 %v4088_v46  ;;  %v4134_v37 = vld [vmem:[#allocation9 + $0xb8] sm:$0xff]  ;;  %v4135_v53 = vld [vmem:[#allocation9 + $0x80] sm:$0xff]  ;;  %v4136_v11 = vld [vmem:[#allocation9 + $0x88] sm:$0xff] }
 0x38a   :  { %3481 = vmatpush.msrb.mxu0 %v5920_v19  ;;  %3501 = vmatpush.msrb.mxu1 %v5923_v14  ;;  %v4092_v19 = vld [vmem:[#allocation9 + $0x1e8] sm:$0xff]  ;;  %v4093_v14 = vld [vmem:[#allocation9 + $0x1f0] sm:$0xff]  ;;  %v4138_v39 = vld [vmem:[#allocation9 + $0x98] sm:$0xff] }
 0x38b   :  { %3442 = vmatpush.msra.mxu2 %v4089_v59  ;;  %3462 = vmatpush.msra.mxu3 %v4090_v32  ;;  %v4137_v25 = vld [vmem:[#allocation9 + $0x90] sm:$0xff]  ;;  %v4139_v16 = vld [vmem:[#allocation9 + $0x60] sm:$0xff]  ;;  %v4140_v22 = vld [vmem:[#allocation9 + $0x68] sm:$0xff] }
 0x38c   :  { %3482 = vmatpush.msrb.mxu0 %v5926_v2  ;;  %3502 = vmatpush.msrb.mxu1 %v5929_v45  ;;  %v4097_v2 = vld [vmem:[#allocation9 + $0x1d0] sm:$0xff]  ;;  %v4098_v45 = vld [vmem:[#allocation9 + $0x1d8] sm:$0xff]  ;;  %v4143_v30 = vld [vmem:[#allocation9 + $0x40] sm:$0xff] }
 0x38d   :  { %3443 = vmatmul.f32.vlgmr.msra.gmra.mxu2 %v3425_v44  ;;  %3463 = vmatmul.f32.vlgmr.msra.gmra.mxu3 %v3425_v44  ;;  %v4141_v17 = vld [vmem:[#allocation9 + $0x70] sm:$0xff]  ;;  %v4142_v50 = vld [vmem:[#allocation9 + $0x78] sm:$0xff]  ;;  %v4144_v35 = vld [vmem:[#allocation9 + $0x48] sm:$0xff] }
 0x38e   :  { %3483 = vmatmul.f32.vlgmr.msrb.gmra.mxu0 %v3425_v44  ;;  %3503 = vmatmul.f32.vlgmr.msrb.gmra.mxu1 %v3425_v44  ;;  %v4145_v33 = vld [vmem:[#allocation9 + $0x50] sm:$0xff]  ;;  %v4146_v12 = vld [vmem:[#allocation9 + $0x58] sm:$0xff]  ;;  %v4147_v46 = vld [vmem:[#allocation9 + $0x20] sm:$0xff] }
 0x38f   :  { %3507 = vmatpush.msrb.mxu2 %v4091_v7  ;;  %3527 = vmatpush.msrb.mxu3 %v4092_v19  ;;  %v4148_v18 = vld [vmem:[#allocation9 + $0x28] sm:$0xff]  ;;  %v4149_v59 = vld [vmem:[#allocation9 + $0x30] sm:$0xff]  ;;  %v4150_v32 = vld [vmem:[#allocation9 + $0x38] sm:$0xff] }
 0x390   :  { %3547 = vmatpush.msra.mxu0 %v4093_v14  ;;  %3567 = vmatpush.msra.mxu1 %v4094_v43  ;;  %v4151_v44 = vld [vmem:[#allocation9] sm:$0xff]  ;;  %v4152_v7 = vld [vmem:[#allocation9 + $0x8] sm:$0xff]  ;;  %v4153_v19 = vld [vmem:[#allocation9 + $0x10] sm:$0xff]  ;;  %v3101_v43 = vpop.f32.mrf.mxu1 }
 0x391   :  { %3508 = vmatpush.msrb.mxu2 %v4095_v0  ;;  %3528 = vmatpush.msrb.mxu3 %v4096_v10  ;;  %v4154_v14 = vld [vmem:[#allocation9 + $0x18] sm:$0xff]  ;;  %v3041_v0 = vpop.f32.mrf.mxu2  ;;  %v3061_v10 = vpop.f32.mrf.mxu3 }
 0x392   :  { %3548 = vmatpush.msra.mxu0 %v4097_v2  ;;  %3568 = vmatpush.msra.mxu1 %v4098_v45 }
 0x393   :  { %3509 = vmatpush.msrb.mxu2 %v4099_v47  ;;  %3529 = vmatpush.msrb.mxu3 %v4100_v21 }
 0x394   :  { %3549 = vmatpush.msra.mxu0 %v4101_v6  ;;  %3569 = vmatpush.msra.mxu1 %v4102_v26 }
 0x395   :  { %3510 = vmatpush.msrb.mxu2 %v4103_v55  ;;  %3530 = vmatpush.msrb.mxu3 %v4104_v38 }
 0x396   :  { %3550 = vmatpush.msra.mxu0 %v4105_v36  ;;  %3570 = vmatpush.msra.mxu1 %v4106_v34  ;;  %v3081_v34 = vpop.f32.mrf.mxu0 }
 0x397   :  { %3511 = vmatpush.msrb.mxu2 %v4107_v28  ;;  %3531 = vmatpush.msrb.mxu3 %v4108_v3 }
 0x398   :  { %3551 = vmatpush.msra.mxu0 %v4109_v52  ;;  %3571 = vmatpush.msra.mxu1 %v4110_v51  ;;  %v3185_v2 = vpop.f32.mrf.mxu1 }
 0x399   :  { %3512 = vmatpush.msrb.mxu2 %v4111_v63  ;;  %3532 = vmatpush.msrb.mxu3 %v4112_v62  ;;  %v3125_v45 = vpop.f32.mrf.mxu2  ;;  %v3145_v47 = vpop.f32.mrf.mxu3  ;;  %v3186_v21 = vadd.f32 %v3185_v2, %v3101_v43  ;;  %v6811_v62 = vld [vmem:[#allocation91_spill] sm:$0xff] }
 0x39a   :  { %3552 = vmatpush.msra.mxu0 %v4113_v20  ;;  %3572 = vmatpush.msra.mxu1 %v4114_v8  ;;  %v3126_v38 = vadd.f32 %v3125_v45, %v3041_v0  ;;  %v3146_v36 = vadd.f32 %v3145_v47, %v3061_v10  ;;  %v6812_v8 = vld [vmem:[#allocation90_spill] sm:$0xff] }
 0x39b   :  { %3513 = vmatpush.msrb.mxu2 %v4115_v61  ;;  %3533 = vmatpush.msrb.mxu3 %v4116_v1 }
 0x39c   :  { %3553 = vmatpush.msra.mxu0 %v4117_v27  ;;  %3573 = vmatpush.msra.mxu1 %v4118_v40 }
 0x39d   :  { %3514 = vmatpush.msrb.mxu2 %v4119_v58  ;;  %3534 = vmatpush.msrb.mxu3 %v4120_v49 }
 0x39e   :  { %3554 = vmatpush.msra.mxu0 %v4121_v24  ;;  %3574 = vmatpush.msra.mxu1 %v4122_v5  ;;  %v3165_v40 = vpop.f32.mrf.mxu0 }
 0x39f   :  { %3515 = vmatpush.msrb.mxu2 %v4123_v42  ;;  %3535 = vmatpush.msrb.mxu3 %v4124_v57 }
 0x3a0   :  { %3555 = vmatpush.msra.mxu0 %v4125_v15  ;;  %3575 = vmatpush.msra.mxu1 %v4126_v41  ;;  %v3166_v41 = vadd.f32 %v3165_v40, %v3081_v34 }
 0x3a1   :  { %3516 = vmatpush.msrb.mxu2 %v4127_v31  ;;  %3536 = vmatpush.msrb.mxu3 %v4128_v23 }
 0x3a2   :  { %3556 = vmatpush.msra.mxu0 %v4129_v4  ;;  %3576 = vmatpush.msra.mxu1 %v4130_v29 }
 0x3a3   :  { %3517 = vmatpush.msrb.mxu2 %v4131_v54  ;;  %3537 = vmatpush.msrb.mxu3 %v4132_v9 }
 0x3a4   :  { %3557 = vmatpush.msra.mxu0 %v4133_v60  ;;  %3577 = vmatpush.msra.mxu1 %v4134_v37 }
 0x3a5   :  { %3518 = vmatpush.msrb.mxu2 %v4135_v53  ;;  %3538 = vmatpush.msrb.mxu3 %v4136_v11 }
 0x3a6   :  { %3558 = vmatpush.msra.mxu0 %v4137_v25  ;;  %3578 = vmatpush.msra.mxu1 %v4138_v39 }
 0x3a7   :  { %3519 = vmatpush.msrb.mxu2 %v4139_v16  ;;  %3539 = vmatpush.msrb.mxu3 %v4140_v22 }
 0x3a8   :  { %3559 = vmatpush.msra.mxu0 %v4141_v17  ;;  %3579 = vmatpush.msra.mxu1 %v4142_v50 }
 0x3a9   :  { %3520 = vmatpush.msrb.mxu2 %v4143_v30  ;;  %3540 = vmatpush.msrb.mxu3 %v4144_v35 }
 0x3aa   :  { %3560 = vmatpush.msra.mxu0 %v4145_v33  ;;  %3580 = vmatpush.msra.mxu1 %v4146_v12 }
 0x3ab   :  { %3521 = vmatpush.msrb.mxu2 %v4147_v46  ;;  %3541 = vmatpush.msrb.mxu3 %v4148_v18 }
 0x3ac   :  { %3561 = vmatpush.msra.mxu0 %v4149_v59  ;;  %3581 = vmatpush.msra.mxu1 %v4150_v32 }
 0x3ad   :  { %3522 = vmatpush.msrb.mxu2 %v4151_v44  ;;  %3542 = vmatpush.msrb.mxu3 %v4152_v7 }
 0x3ae   :  { %3562 = vmatpush.msra.mxu0 %v4153_v19  ;;  %3582 = vmatpush.msra.mxu1 %v4154_v14 }
 0x3e7   :  { %v3265_v6 = vpop.f32.mrf.mxu1  ;;  %v3245_v57 = vpop.f32.mrf.mxu0 }
 0x3e8   :  { %v3271_v26 = vadd.f32 %v3265_v6, %v3186_v21  ;;  %v3270_v31 = vadd.f32 %v3245_v57, %v3166_v41  ;;  %v3670_v41 = vld [vmem:[#allocation11 + $0x60] sm:$0xff] }
 0x3ea   :  { %v3275_v55 = vadd.f32 %v3271_v26, %v6113_v13  ;;  %v3274_v29 = vadd.f32 %v3270_v31, %v6065_v56 }
 0x3ec   :  { %v3770_v28 = vmul.f32 -1.442695, %v3275_v55  ;;  %v3205_v3 = vpop.f32.mrf.mxu2  ;;  %v3225_v52 = vpop.f32.mrf.mxu3 }
 0x3ed   :  { %v3268_v51 = vadd.f32 %v3205_v3, %v3126_v38  ;;  %v3269_v63 = vadd.f32 %v3225_v52, %v3146_v36 }
 0x3ee   :  { %3846 = vpow2.f32 %v3770_v28 }
 0x3ef   :  { %v3272_v20 = vadd.f32 %v3268_v51, %v6811_v62  ;;  %v3273_v61 = vadd.f32 %v3269_v63, %v6812_v8 }
 0x3f1   :  { %v3768_v1 = vmul.f32 -1.442695, %v3272_v20  ;;  %v3769_v27 = vmul.f32 -1.442695, %v3273_v61  ;;  %v3673_v61 = vld [vmem:[#allocation11 + $0x78] sm:$0xff] }
 0x3f2   :  { %3675 = vmatpush.msra.mxu2 %v3673_v61  ;;  %v3703_v61 = vld [vmem:[#allocation12 + $0x38] sm:$0xff] }
 0x3f3   :  { %3848 = vpow2.f32 %v3768_v1  ;;  %v3672_v1 = vld [vmem:[#allocation11 + $0x70] sm:$0xff] }
 0x3f4   :  { %v3847_v58 = vpop.eup %3846  ;;  %3850 = vpow2.f32 %v3769_v27  ;;  %3676 = vmatpush.msra.mxu2 %v3672_v1 }
 0x3f5   :  { %v3318_v49 = vadd.f32 1.0, %v3847_v58 }
 0x3f7   :  { %3852 = vrcp.f32 %v3318_v49  ;;  %v3330_v2 = vand.u32 2147483648, %v3318_v49  ;;  %vm3324_vm3 = vweird.f32 %v3318_v49  ;;  %v3328_v45 = vand.u32 2147483647, %v3318_v49 }
 0x3f9   :  { %v3849_v24 = vpop.eup %3848  ;;  %v3331_v21 = vor.u32 1.1754944e-38, %v3330_v2  ;;  %vm3329_vm5 = vcmp.eq.f32.partialorder %v3328_v45, 8.507059e+37  ;;  %v3706_v45 = vld [vmem:[#allocation12 + $0x50] sm:$0xff] }
 0x3fa   :  { %v3851_v5 = vpop.eup %3850  ;;  %v3279_v42 = vadd.f32 1.0, %v3849_v24 }
 0x3fb   :  { %v3298_v15 = vadd.f32 1.0, %v3851_v5 }
 0x3fc   :  { %3854 = vrcp.f32 %v3279_v42  ;;  %v3291_v11 = vand.u32 2147483648, %v3279_v42  ;;  %v3289_v16 = vand.u32 2147483647, %v3279_v42  ;;  %vm3285_vm8 = vweird.f32 %v3279_v42 }
 0x3fd   :  { %3856 = vrcp.f32 %v3298_v15  ;;  %v3853_v23 = vpop.eup %3852  ;;  %v3310_v22 = vand.u32 2147483648, %v3298_v15  ;;  %v3308_v50 = vand.u32 2147483647, %v3298_v15  ;;  %vm3304_vm10 = vweird.f32 %v3298_v15 }
 0x3fe   :  { %v3320_v37 = vmul.f32 %v3853_v23, %v3318_v49  ;;  %3858 = vtanh.f32 %v3274_v29  ;;  %v3292_v33 = vor.u32 1.1754944e-38, %v3291_v11  ;;  %vm3290_vm11 = vcmp.eq.f32.partialorder %v3289_v16, 8.507059e+37  ;;  %v3664_v16 = vld [vmem:[#allocation11 + $0x30] sm:$0xff] }
 0x3ff   :  { %v3311_v18 = vor.u32 1.1754944e-38, %v3310_v22  ;;  %vm3309_vm1 = vcmp.eq.f32.partialorder %v3308_v50, 8.507059e+37  ;;  %vm3325_vm2 = vweird.f32 %v3853_v23  ;;  %v3711_v50 = vld [vmem:[#allocation12 + $0x78] sm:$0xff] }
 0x400   :  { %v3321_v30 = vsub.f32 1.0, %v3320_v37  ;;  %vm3326_vm4 = vmor %vm3324_vm3, %vm3325_vm2  ;;  %v3667_v37 = vld [vmem:[#allocation11 + $0x48] sm:$0xff]  ;;  %3713 = vmatpush.msra.mxu3 %v3711_v50 }
 0x401   :  { %v3400_v27 = vpop.f32.mrf.mxu0 }
 0x402   :  { %v3855_v4 = vpop.eup %3854  ;;  %v3322_v19 = vmul.f32 %v3853_v23, %v3321_v30  ;;  %v3710_v30 = vld [vmem:[#allocation12 + $0x70] sm:$0xff] }
 0x403   :  { %v3857_v54 = vpop.eup %3856  ;;  %v3281_v9 = vmul.f32 %v3855_v4, %v3279_v42  ;;  %vm3286_vm6 = vweird.f32 %v3855_v4  ;;  %v3671_v42 = vld [vmem:[#allocation11 + $0x68] sm:$0xff]  ;;  %3714 = vmatpush.msra.mxu3 %v3710_v30  ;;  %v3712_v30 = vld [vmem:[%s6358_s9 + $0x5] ss:$0 sm:$0xff] }
 0x404   :  { %v3300_v60 = vmul.f32 %v3857_v54, %v3298_v15  ;;  %vm3305_vm7 = vweird.f32 %v3857_v54  ;;  %vm3287_vm9 = vmor %vm3285_vm8, %vm3286_vm6  ;;  %v3859_v59 = vpop.eup %3858  ;;  %v3323_v10 = vadd.f32 %v3853_v23, %v3322_v19  ;;  %3677 = vmatpush.msra.mxu2 %v3671_v42 }
 0x405   :  { %v3282_v53 = vsub.f32 1.0, %v3281_v9  ;;  %vm3306_vm12 = vmor %vm3304_vm10, %vm3305_vm7 }
 0x406   :  { %v3301_v25 = vsub.f32 1.0, %v3300_v60  ;;  %v3327_v47 = vsel %vm3326_vm4, %v3853_v23, %v3323_v10  ;;  %v3360_v38 = vpop.f32.mrf.mxu2  ;;  %v3380_v36 = vpop.f32.mrf.mxu3  ;;  %3678 = vmatpush.msra.mxu2 %v3670_v41 }
 0x407   :  { %v3283_v39 = vmul.f32 %v3855_v4, %v3282_v53  ;;  %v3332_v26 = vsel %vm3329_vm5, %v3331_v21, %v3327_v47  ;;  %v3666_v53 = vld [vmem:[#allocation11 + $0x40] sm:$0xff]  ;;  %v3659_v21 = vld [vmem:[#allocation11 + $0x8] sm:$0xff] }
 0x408   :  { %v3302_v17 = vmul.f32 %v3857_v54, %v3301_v25 }
 0x409   :  { %v3284_v35 = vadd.f32 %v3855_v4, %v3283_v39 }
 0x40a   :  { %v3303_v12 = vadd.f32 %v3857_v54, %v3302_v17 }
 0x40b   :  { %v3288_v46 = vsel %vm3287_vm9, %v3855_v4, %v3284_v35  ;;  %v3484_v9 = vpop.f32.mrf.mxu0 }
 0x40c   :  { %v3307_v32 = vsel %vm3306_vm12, %v3857_v54, %v3303_v12  ;;  %v3293_v44 = vsel %vm3290_vm11, %v3292_v33, %v3288_v46  ;;  %v3668_v54 = vld [vmem:[#allocation11 + $0x50] sm:$0xff]  ;;  %v3485_v35 = vadd.f32 %v3484_v9, %v3400_v27  ;;  %v3663_v33 = vld [vmem:[#allocation11 + $0x28] sm:$0xff] }
 0x40d   :  { %v3312_v7 = vsel %vm3309_vm1, %v3311_v18, %v3307_v32  ;;  %v3335_v14 = vmul.f32 %v3859_v59, %v3293_v44  ;;  %v3709_v12 = vld [vmem:[#allocation12 + $0x68] sm:$0xff]  ;;  %v3662_v18 = vld [vmem:[#allocation11 + $0x20] sm:$0xff]  ;;  %v3661_v32 = vld [vmem:[#allocation11 + $0x18] sm:$0xff] }
 0x40e   :  { %v3334_v43 = vmul.f32 %v3312_v7, %v6189_v48  ;;  %v3420_v48 = vpop.f32.mrf.mxu1  ;;  %v3708_v59 = vld [vmem:[#allocation12 + $0x60] sm:$0xff]  ;;  %3715 = vmatpush.msra.mxu3 %v3709_v12  ;;  %v3707_v7 = vld [vmem:[#allocation12 + $0x58] sm:$0xff] }
 0x410   :  { %v6304_v0 = vadd.f32 %v3335_v14, %v3334_v43  ;;  %v3444_v28 = vpop.f32.mrf.mxu2  ;;  %v3464_v3 = vpop.f32.mrf.mxu3  ;;  %v3660_v43 = vld [vmem:[#allocation11 + $0x10] sm:$0xff]  ;;  %3716 = vmatpush.msra.mxu3 %v3708_v59 }
 0x411   :  { %v3445_v40 = vadd.f32 %v3444_v28, %v3360_v38  ;;  %v3465_v58 = vadd.f32 %v3464_v3, %v3380_v36  ;;  %v3658_v38 = vld [vmem:[#allocation11] sm:$0xff] }
 0x412   :  { %3860 = vtanh.f32 %v6304_v0  ;;  %3717 = vmatpush.msra.mxu3 %v3707_v7  ;;  %v3704_v3 = vld [vmem:[#allocation12 + $0x40] sm:$0xff] }
 0x414   :  { %3718 = vmatpush.msra.mxu3 %v3706_v45 }
 0x416   :  { %v3504_v34 = vpop.f32.mrf.mxu1 }
 0x417   :  { %v3505_v52 = vadd.f32 %v3504_v34, %v3420_v48 }
 0x418   :  { %v3861_v6 = vpop.eup %3860 }
 0x419   :  { %v3338_v55 = vmul.f32 %v3861_v6, %v3332_v26 }
 0x41b   :  { %3523 = vmatmul.f32.vlgmr.msrb.gmra.mxu2 %v3338_v55  ;;  %3543 = vmatmul.f32.vlgmr.msrb.gmra.mxu3 %v3338_v55 }
 0x41c   :  { %3563 = vmatmul.f32.vlgmr.msra.gmra.mxu0 %v3338_v55  ;;  %3583 = vmatmul.f32.vlgmr.msra.gmra.mxu1 %v3338_v55  ;;  %v3705_v55 = vld [vmem:[#allocation12 + $0x48] sm:$0xff] }
 0x41d   :  { %3719 = vmatpush.msra.mxu3 %v3705_v55 }
 0x41f   :  { %3720 = vmatpush.msra.mxu3 %v3704_v3 }
 0x421   :  { %3721 = vmatpush.msra.mxu3 %v3703_v61 }
 0x499   :  { %v3584_v51 = vpop.f32.mrf.mxu1  ;;  %v3564_v22 = vpop.f32.mrf.mxu0 }
 0x49a   :  { %v3590_v63 = vadd.f32 %v3584_v51, %v3505_v52  ;;  %v3589_v46 = vadd.f32 %v3564_v22, %v3485_v35 }
 0x49c   :  { %v3594_v20 = vadd.f32 %v3590_v63, %v6113_v13  ;;  %v3669_v13 = vld [vmem:[#allocation11 + $0x58] sm:$0xff]  ;;  %v3593_v14 = vadd.f32 %v3589_v46, %v6065_v56 }
 0x49d   :  { %3679 = vmatpush.msra.mxu2 %v3669_v13  ;;  %v3700_v13 = vld [vmem:[#allocation12 + $0x20] sm:$0xff] }
 0x49e   :  { %v3773_v49 = vmul.f32 -1.442695, %v3594_v20  ;;  %v3524_v24 = vpop.f32.mrf.mxu2  ;;  %v3544_v5 = vpop.f32.mrf.mxu3 }
 0x49f   :  { %v3587_v57 = vadd.f32 %v3524_v24, %v3445_v40  ;;  %v3588_v15 = vadd.f32 %v3544_v5, %v3465_v58  ;;  %3680 = vmatpush.msra.mxu2 %v3668_v54  ;;  %v3699_v54 = vld [vmem:[#allocation12 + $0x18] sm:$0xff] }
 0x4a0   :  { %3862 = vpow2.f32 %v3773_v49  ;;  %v3702_v49 = vld [vmem:[#allocation12 + $0x30] sm:$0xff] }
 0x4a1   :  { %v3591_v31 = vadd.f32 %v3587_v57, %v6811_v62  ;;  %v3592_v23 = vadd.f32 %v3588_v15, %v6812_v8  ;;  %3681 = vmatpush.msra.mxu2 %v3667_v37  ;;  %v3665_v62 = vld [vmem:[#allocation11 + $0x38] sm:$0xff]  ;;  %3722 = vmatpush.msra.mxu3 %v3702_v49 }
 0x4a3   :  { %v3771_v4 = vmul.f32 -1.442695, %v3591_v31  ;;  %v3772_v29 = vmul.f32 -1.442695, %v3592_v23  ;;  %3682 = vmatpush.msra.mxu2 %v3666_v53  ;;  %v3701_v31 = vld [vmem:[#allocation12 + $0x28] sm:$0xff] }
 0x4a4   :  { %3723 = vmatpush.msra.mxu3 %v3701_v31 }
 0x4a5   :  { %3864 = vpow2.f32 %v3771_v4  ;;  %3683 = vmatpush.msra.mxu2 %v3665_v62 }
 0x4a6   :  { %v3863_v60 = vpop.eup %3862  ;;  %3866 = vpow2.f32 %v3772_v29  ;;  %3724 = vmatpush.msra.mxu3 %v3700_v13 }
 0x4a7   :  { %v6310_v11 = vadd.f32 1.0, %v3863_v60  ;;  %3684 = vmatpush.msra.mxu2 %v3664_v16  ;;  %v3696_v16 = vld [vmem:[#allocation12] sm:$0xff] }
 0x4a8   :  { %3725 = vmatpush.msra.mxu3 %v3699_v54 }
 0x4a9   :  { %3868 = vrcp.f32 %v6310_v11  ;;  %3685 = vmatpush.msra.mxu2 %v3663_v33  ;;  %v3649_v9 = vand.u32 2147483648, %v6310_v11  ;;  %vm3643_vm11 = vweird.f32 %v6310_v11  ;;  %v3647_v60 = vand.u32 2147483647, %v6310_v11 }
 0x4ab   :  { %v3865_v25 = vpop.eup %3864  ;;  %3686 = vmatpush.msra.mxu2 %v3662_v18  ;;  %v3650_v37 = vor.u32 1.1754944e-38, %v3649_v9  ;;  %vm3648_vm1 = vcmp.eq.f32.partialorder %v3647_v60, 8.507059e+37 }
 0x4ac   :  { %v3867_v8 = vpop.eup %3866  ;;  %v6312_v39 = vadd.f32 1.0, %v3865_v25 }
 0x4ad   :  { %v6315_v17 = vadd.f32 1.0, %v3867_v8  ;;  %3687 = vmatpush.msra.mxu2 %v3661_v32  ;;  %v3698_v8 = vld [vmem:[#allocation12 + $0x10] sm:$0xff] }
 0x4ae   :  { %3870 = vrcp.f32 %v6312_v39  ;;  %v3610_v56 = vand.u32 2147483648, %v6312_v39  ;;  %v3608_v34 = vand.u32 2147483647, %v6312_v39  ;;  %vm3604_vm15 = vweird.f32 %v6312_v39  ;;  %3726 = vmatpush.msra.mxu3 %v3698_v8 }
 0x4af   :  { %3872 = vrcp.f32 %v6315_v17  ;;  %v6319_v44 = vpop.eup %3868  ;;  %3688 = vmatpush.msra.mxu2 %v3660_v43  ;;  %v3629_v28 = vand.u32 2147483648, %v6315_v17  ;;  %v3627_v51 = vand.u32 2147483647, %v6315_v17  ;;  %vm3623_vm6 = vweird.f32 %v6315_v17 }
 0x4b0   :  { %v3639_v6 = vmul.f32 %v6319_v44, %v6310_v11  ;;  %3874 = vtanh.f32 %v3593_v14  ;;  %v3611_v1 = vor.u32 1.1754944e-38, %v3610_v56  ;;  %vm3609_vm7 = vcmp.eq.f32.partialorder %v3608_v34, 8.507059e+37  ;;  %v3674_v11 = vld [vmem:[%s6358_s9 + $0x4] ss:$0 sm:$0xff] }
 0x4b1   :  { %3689 = vmatpush.msra.mxu2 %v3659_v21  ;;  %v3630_v40 = vor.u32 1.1754944e-38, %v3629_v28  ;;  %vm3628_vm9 = vcmp.eq.f32.partialorder %v3627_v51, 8.507059e+37  ;;  %vm3644_vm10 = vweird.f32 %v6319_v44 }
 0x4b2   :  { %v3640_v63 = vsub.f32 1.0, %v3639_v6  ;;  %vm3645_vm12 = vmor %vm3643_vm11, %vm3644_vm10 }
 0x4b3   :  { %3690 = vmatpush.msra.mxu2 %v3658_v38 }
 0x4b4   :  { %v3871_v19 = vpop.eup %3870  ;;  %v3641_v15 = vmul.f32 %v6319_v44, %v3640_v63 }
 0x4b5   :  { %v3873_v10 = vpop.eup %3872  ;;  %v3600_v2 = vmul.f32 %v3871_v19, %v6312_v39  ;;  %vm3605_vm13 = vweird.f32 %v3871_v19  ;;  %v3697_v39 = vld [vmem:[#allocation12 + $0x8] sm:$0xff] }
 0x4b6   :  { %v3619_v47 = vmul.f32 %v3873_v10, %v6315_v17  ;;  %vm3624_vm14 = vweird.f32 %v3873_v10  ;;  %vm3606_vm0 = vmor %vm3604_vm15, %vm3605_vm13  ;;  %v3875_v24 = vpop.eup %3874  ;;  %v3642_v29 = vadd.f32 %v6319_v44, %v3641_v15  ;;  %3727 = vmatpush.msra.mxu3 %v3697_v39 }
 0x4b7   :  { %v3601_v26 = vsub.f32 1.0, %v3600_v2  ;;  %vm3625_vm8 = vmor %vm3623_vm6, %vm3624_vm14 }
 0x4b8   :  { %v3620_v48 = vsub.f32 1.0, %v3619_v47  ;;  %3728 = vmatpush.msra.mxu3 %v3696_v16 }
 0x4b9   :  { %v3602_v36 = vmul.f32 %v3871_v19, %v3601_v26 }
 0x4ba   :  { %v3621_v52 = vmul.f32 %v3873_v10, %v3620_v48 }
 0x4bb   :  { %v3603_v20 = vadd.f32 %v3871_v19, %v3602_v36 }
 0x4bc   :  { %v3622_v27 = vadd.f32 %v3873_v10, %v3621_v52 }
 0x4bd   :  { %v3607_v58 = vsel %vm3606_vm0, %v3871_v19, %v3603_v20 }
 0x4be   :  { %v3612_v5 = vsel %vm3609_vm7, %v3611_v1, %v3607_v58  ;;  %v3626_v42 = vsel %vm3625_vm8, %v3873_v10, %v3622_v27 }
 0x4bf   :  { %v3631_v57 = vsel %vm3628_vm9, %v3630_v40, %v3626_v42  ;;  %v3654_v41 = vmul.f32 %v3875_v24, %v3612_v5 }
 0x4c0   :  { %v3653_v23 = vmul.f32 %v3631_v57, %v6304_v0  ;;  %v3646_v0 = vsel %vm3645_vm12, %v6319_v44, %v3642_v29 }
 0x4c1   :  { %v3651_v62 = vsel %vm3648_vm1, %v3650_v37, %v3646_v0 }
 0x4c2   :  { %v3655_v4 = vadd.f32 %v3654_v41, %v3653_v23 }
 0x4c4   :  { %3876 = vtanh.f32 %v3655_v4 }
 0x4ca   :  { %v3877_v53 = vpop.eup %3876 }
 0x4cb   :  { %v3657_v25 = vmul.f32 %v3877_v53, %v3651_v62 }
 0x4cd   :  { %3691 = vmatmul.f32.vlgmr.msra.gmra.mxu2 %v3657_v25 }
 0x550   :  { %v3692_v22 = vpop.f32.mrf.mxu2 }
 0x551   :  { %v3693_v17 = vadd.f32 %v3692_v22, %v3674_v11 }
 0x553   :  { %v3695_v50 = vmax.f32 %v3693_v17, 0.0 }
 0x555   :  { %3729 = vmatmul.f32.vlgmr.msra.gmra.mxu3 %v3695_v50 }
 0x5d8   :  { %v3730_v35 = vpop.f32.mrf.mxu3 }
 0x5d9   :  { %v3731_v33 = vadd.f32 %v3730_v35, %v3712_v30 }
 0x5db   :  { %3733 = vst [vmem:[#allocation14] sm:$0x3] %v3731_v33 }
 0x5dc   :  { %3744 = dma.vmem_to_hbm [thread:$0]  %s3740_s25, 32, %s3742_s27, [#allocation5]  }
 0x5dd   :  { %4331 = dma.done.wait [#allocation5], 32  }
 0x5de   :  { %4332 = vsyncadd [#allocation5], 4294967264 }
 0x5df   :  { %3749 = vsyncpa [#allocation4], 1 }
 0x5e0   :  { %3750 = vsyncpa [#allocation7], 1 }
 0x5e1   :  { %3751 = vsyncpa [#allocation10], 1 }
 0x5e2   :  { %3752 = vsyncpa [#allocation13], 1 }
 0x5e3   :  { %3753 = vsyncpa [#allocation5], 1 }

</bundles_post_ra>
